<compile_context>
chip_gen: v7x
topology: tpu7x:2x2x1
jax: 0.10.0
libtpu: 0.0.40
codegen_flags: <defaults>
</compile_context>

<pallas_src>
import jax
import jax.numpy as jnp
import numpy as np
from jax.experimental import pallas as pl
from jax.experimental.pallas import tpu as pltpu

EPS = 1e-5        # nn.BatchNorm2d default eps
LANES = 128       # TPU vreg lane width


# ------------------------------ small helpers -------------------------------

def _round_up(a, b):
    return (a + b - 1) // b * b


def _pad_to(a, shape):
    return jnp.pad(a, [(0, t - s) for s, t in zip(a.shape, shape)])


def _pad_vec(v, n):
    return jnp.zeros((n,), jnp.float32).at[: v.shape[0]].set(v.astype(jnp.float32))


def _vmem_limit_bytes():
    """3/4 of physical VMEM (64 MiB on v7x, 128 MiB on v5e/v6e), capped at 96 MiB."""
    phys = 64 * 1024 * 1024
    try:
        v = int(getattr(pltpu.get_tpu_info(), "vmem_capacity_bytes", 0))
        if v > 0:
            phys = v
    except Exception:
        pass
    return max(32 * 1024 * 1024, min(phys * 3 // 4, 96 * 1024 * 1024))


def _compiler_params():
    return pltpu.CompilerParams(
        dimension_semantics=("parallel",),        # per-image grid, megacore-safe
        vmem_limit_bytes=_vmem_limit_bytes())


# ------------------------------ Pallas kernels -------------------------------

def _make_conv3x3_kernel(s, ho, wo, hph):
    """Pass 1: z1 = conv3x3(x) via 9 in-kernel tap matmuls over the phase view,
    plus per-image partial BN statistics (sum, sumsq)."""

    def kernel(x_ref, w_ref, z_ref, st_ref, acc_ref):
        acc_ref[...] = jnp.zeros_like(acc_ref)
        for ki in range(3):
            for kj in range(3):
                p = (ki % s) * s + (kj % s)
                r0 = p * hph + ki // s
                c0 = kj // s
                tap = x_ref[0, r0:r0 + ho, c0:c0 + wo, :]
                acc_ref[...] += jnp.dot(tap.reshape(ho * wo, tap.shape[-1]),
                                        w_ref[ki * 3 + kj],
                                        preferred_element_type=jnp.float32)
        acc = acc_ref[...]
        z_ref[0] = acc.reshape(ho, wo, acc.shape[-1]).astype(z_ref.dtype)
        st_ref[0] = jnp.concatenate(
            [jnp.sum(acc, axis=0, keepdims=True),
             jnp.sum(acc * acc, axis=0, keepdims=True)], axis=0)

    return kernel


def _make_bn_relu_conv3x3_kernel(ho, wo):
    """Pass 2: y1 = relu(z1*scale1 + shift1) kept in a padded VMEM scratch,
    z2 = conv3x3(y1) (9 tap matmuls), plus partial BN2 statistics."""

    def kernel(z1_ref, p1_ref, w2_ref, z2_ref, st_ref, ypad_ref, acc_ref):
        y = jnp.maximum(
            z1_ref[0].astype(jnp.float32) * p1_ref[0:1, :] + p1_ref[1:2, :], 0.0)
        ypad_ref[...] = jnp.zeros_like(ypad_ref)       # zero border (conv pad=1)
        ypad_ref[1:ho + 1, 1:wo + 1, :] = y
        acc_ref[...] = jnp.zeros_like(acc_ref)
        for ki in range(3):
            for kj in range(3):
                tap = ypad_ref[ki:ki + ho, kj:kj + wo, :].astype(jnp.bfloat16)
                acc_ref[...] += jnp.dot(tap.reshape(ho * wo, tap.shape[-1]),
                                        w2_ref[ki * 3 + kj],
                                        preferred_element_type=jnp.float32)
        acc = acc_ref[...]
        z2_ref[0] = acc.reshape(ho, wo, acc.shape[-1]).astype(z2_ref.dtype)
        st_ref[0] = jnp.concatenate(
            [jnp.sum(acc, axis=0, keepdims=True),
             jnp.sum(acc * acc, axis=0, keepdims=True)], axis=0)

    return kernel


def _make_bn2_add_relu_kernel(ho, wo, r0, c0, project):
    """Pass 3: out = relu(z2*scale2 + shift2 + shortcut).  The shortcut is the
    identity pixels or the fused 1x1 projection, read from the phase view."""

    if project:
        def kernel(z2_ref, p2_ref, xs_ref, w3_ref, o_ref):
            cp = z2_ref.shape[-1]
            y = z2_ref[0].astype(jnp.float32) * p2_ref[0:1, :] + p2_ref[1:2, :]
            xs = xs_ref[0, r0:r0 + ho, c0:c0 + wo, :]
            res = jnp.dot(xs.reshape(ho * wo, xs.shape[-1]), w3_ref[...],
                          preferred_element_type=jnp.float32) + p2_ref[2:3, :]
            o_ref[0] = jnp.maximum(y + res.reshape(ho, wo, cp), 0.0)
    else:
        def kernel(z2_ref, p2_ref, xs_ref, o_ref):
            y = z2_ref[0].astype(jnp.float32) * p2_ref[0:1, :] + p2_ref[1:2, :]
            xr = xs_ref[0, r0:r0 + ho, c0:c0 + wo, :].astype(jnp.float32)
            o_ref[0] = jnp.maximum(y + xr, 0.0)

    return kernel


# ---------------------------- pallas_call wrappers ---------------------------

def _conv1_call(x_phases, w1, ho, wo, s, hph):
    n, mrow, wph, cin_p = x_phases.shape
    cp = w1.shape[-1]
    return pl.pallas_call(
        _make_conv3x3_kernel(s, ho, wo, hph),
        grid=(n,),
        in_specs=[pl.BlockSpec((1, mrow, wph, cin_p), lambda i: (i, 0, 0, 0)),
                  pl.BlockSpec((9, cin_p, cp), lambda i: (0, 0, 0))],
        out_specs=(pl.BlockSpec((1, ho, wo, cp), lambda i: (i, 0, 0, 0)),
                   pl.BlockSpec((1, 2, cp), lambda i: (i, 0, 0))),
        out_shape=(jax.ShapeDtypeStruct((n, ho, wo, cp), jnp.bfloat16),
                   jax.ShapeDtypeStruct((n, 2, cp), jnp.float32)),
        scratch_shapes=[pltpu.VMEM((ho * wo, cp), jnp.float32)],
        compiler_params=_compiler_params(),
    )(x_phases, w1)


def _conv2_call(z1, p1, w2, ho, wo):
    n, _, _, cp = z1.shape
    return pl.pallas_call(
        _make_bn_relu_conv3x3_kernel(ho, wo),
        grid=(n,),
        in_specs=[pl.BlockSpec((1, ho, wo, cp), lambda i: (i, 0, 0, 0)),
                  pl.BlockSpec((8, cp), lambda i: (0, 0)),
                  pl.BlockSpec((9, cp, cp), lambda i: (0, 0, 0))],
        out_specs=(pl.BlockSpec((1, ho, wo, cp), lambda i: (i, 0, 0, 0)),
                   pl.BlockSpec((1, 2, cp), lambda i: (i, 0, 0))),
        out_shape=(jax.ShapeDtypeStruct((n, ho, wo, cp), jnp.bfloat16),
                   jax.ShapeDtypeStruct((n, 2, cp), jnp.float32)),
        scratch_shapes=[pltpu.VMEM((ho + 2, wo + 2, cp), jnp.float32),
                        pltpu.VMEM((ho * wo, cp), jnp.float32)],
        compiler_params=_compiler_params(),
    )(z1, p1, w2)


def _out_call(z2, p2, x_phases, w3, ho, wo, hph, phase, r0, c0):
    n, _, wph, cin_p = x_phases.shape
    cp = z2.shape[-1]
    project = w3 is not None
    in_specs = [pl.BlockSpec((1, ho, wo, cp), lambda i: (i, 0, 0, 0)),
                pl.BlockSpec((8, cp), lambda i: (0, 0)),
                # only the phase block holding the shortcut pixels is loaded
                pl.BlockSpec((1, hph, wph, cin_p), lambda i: (i, phase, 0, 0))]
    args = [z2, p2, x_phases]
    if project:
        in_specs.append(pl.BlockSpec((cin_p, cp), lambda i: (0, 0)))
        args.append(w3)
    return pl.pallas_call(
        _make_bn2_add_relu_kernel(ho, wo, r0, c0, project),
        grid=(n,),
        in_specs=in_specs,
        out_specs=pl.BlockSpec((1, ho, wo, cp), lambda i: (i, 0, 0, 0)),
        out_shape=jax.ShapeDtypeStruct((n, ho, wo, cp), jnp.float32),
        compiler_params=_compiler_params(),
    )(*args)


# --------------------------------- JAX glue ----------------------------------

def _space_to_depth_phases(x_nhwc, s, cin_p):
    """Zero-pad (conv pad=1 + channel pad) and space-to-depth so every 3x3 tap
    and the strided shortcut pixel set are contiguous static slices.

    Returns (N, s*s*Hph, Wph, cin_p) bf16 with phase p = (r%s)*s + (c%s)
    stored at rows [p*Hph, (p+1)*Hph)."""
    n, h, w, c = x_nhwc.shape
    hp, wp = h + 2, w + 2
    hph, wph = -(-hp // s), -(-wp // s)
    xp = jnp.pad(x_nhwc, ((0, 0),
                          (1, hph * s - hp + 1),
                          (1, wph * s - wp + 1),
                          (0, cin_p - c)))
    xp = xp.reshape(n, hph, s, wph, s, cin_p)
    xp = jnp.transpose(xp, (0, 2, 4, 1, 3, 5))
    return xp.reshape(n, s * s * hph, wph, cin_p).astype(jnp.bfloat16), hph


def _bn_affine(partial_stats, gamma, beta, m, cp, bias=None):
    """Reduce per-image (sum, sumsq) partials into a packed (8, cp) f32 tile:
    row0 = gamma*rsqrt(var+eps), row1 = beta - mean*row0, row2 = extra bias."""
    st = jnp.sum(partial_stats, axis=0)                 # (2, cp)
    mean = st[0] / m
    var = st[1] / m - mean * mean                       # biased (training) var
    scale = _pad_vec(gamma, cp) * jax.lax.rsqrt(var + EPS)
    shift = _pad_vec(beta, cp) - mean * scale
    packed = jnp.zeros((8, cp), jnp.float32).at[0].set(scale).at[1].set(shift)
    if bias is not None:
        packed = packed.at[2].set(_pad_vec(bias, cp))
    return packed


def residual_forward(x, params, use_1x1conv, strides):
    """Pallas implementation of Residual.forward (training-mode BatchNorm)."""
    n, cin, h, w = x.shape
    cout = params["w1"].shape[0]
    s = int(strides)
    ho = (h + 2 - 3) // s + 1
    wo = (w + 2 - 3) // s + 1
    m = n * ho * wo
    cp = _round_up(cout, LANES)
    cin_p = _round_up(cin, LANES)

    x_nhwc = jnp.transpose(x, (0, 2, 3, 1)).astype(jnp.float32)
    x_phases, hph = _space_to_depth_phases(x_nhwc, s, cin_p)

    # Weights as (ki*3+kj, Cin, Cout), channel-padded, bf16.  b1/b2 are not
    # applied: they cancel exactly under training-mode BatchNorm.
    w1 = jnp.transpose(params["w1"], (2, 3, 1, 0)).reshape(9, cin, cout)
    w1 = _pad_to(w1, (9, cin_p, cp)).astype(jnp.bfloat16)
    w2 = jnp.transpose(params["w2"], (2, 3, 1, 0)).reshape(9, cout, cout)
    w2 = _pad_to(w2, (9, cp, cp)).astype(jnp.bfloat16)

    # Pass 1: conv1 + partial BN1 stats.
    z1, st1 = _conv1_call(x_phases, w1, ho, wo, s, hph)
    p1 = _bn_affine(st1, params["g1"], params["beta1"], m, cp)

    # Pass 2: BN1 + ReLU + conv2 + partial BN2 stats (y1 never leaves VMEM).
    z2, st2 = _conv2_call(z1, p1, w2, ho, wo)

    # Pass 3: BN2 + shortcut (+ fused 1x1 projection) + ReLU.
    # Shortcut pixel x[oh*s, ow*s] sits at phase (1%s)*s+(1%s), offset 1//s.
    phase, off = (1 % s) * s + (1 % s), 1 // s
    if use_1x1conv:
        w3 = _pad_to(params["w3"].reshape(cout, cin).T,
                     (cin_p, cp)).astype(jnp.bfloat16)
        p2 = _bn_affine(st2, params["g2"], params["beta2"], m, cp,
                        bias=params["b3"])
        out = _out_call(z2, p2, x_phases, w3, ho, wo, hph, phase, off, off)
    else:
        assert cin == cout and s == 1, "identity shortcut needs matching shapes"
        p2 = _bn_affine(st2, params["g2"], params["beta2"], m, cp)
        out = _out_call(z2, p2, x_phases, None, ho, wo, hph, phase, off, off)

    out = out[:, :, :, :cout]
    return jnp.transpose(out, (0, 3, 1, 2))              # back to NCHW


# ----------------------------- pure-JAX reference -----------------------------

def _conv2d_ref(x, w, b, stride, pad):
    y = jax.lax.conv_general_dilated(
        x, w, (stride, stride), [(pad, pad), (pad, pad)],
        dimension_numbers=("NCHW", "OIHW", "NCHW"),
        precision=jax.lax.Precision.HIGHEST)
    return y + b[None, :, None, None]


def _bn_ref(x, g, beta):
    mean = x.mean(axis=(0, 2, 3), keepdims=True)
    var = ((x - mean) ** 2).mean(axis=(0, 2, 3), keepdims=True)
    return g[None, :, None, None] * (x - mean) / jnp.sqrt(var + EPS) \
        + beta[None, :, None, None]


def residual_reference(x, params, use_1x1conv, strides):
    y = jnp.maximum(_bn_ref(_conv2d_ref(x, params["w1"], params["b1"], strides, 1),
                            params["g1"], params["beta1"]), 0.0)
    y = _bn_ref(_conv2d_ref(y, params["w2"], params["b2"], 1, 1),
                params["g2"], params["beta2"])
    xr = _conv2d_ref(x, params["w3"], params["b3"], strides, 0) if use_1x1conv else x
    return jnp.maximum(y + xr, 0.0)


# ------------------------------------ main ------------------------------------

def _make_params(key, cin, cout, use_1x1conv):
    ks = jax.random.split(key, 8)
    p = {
        "w1": 0.1 * jax.random.normal(ks[0], (cout, cin, 3, 3), jnp.float32),
        "b1": 0.1 * jax.random.normal(ks[1], (cout,), jnp.float32),
        "w2": 0.1 * jax.random.normal(ks[2], (cout, cout, 3, 3), jnp.float32),
        "b2": 0.1 * jax.random.normal(ks[3], (cout,), jnp.float32),
        "g1": 1.0 + 0.1 * jax.random.normal(ks[4], (cout,), jnp.float32),
        "beta1": 0.1 * jax.random.normal(ks[5], (cout,), jnp.float32),
        "g2": 1.0 + 0.1 * jax.random.normal(ks[6], (cout,), jnp.float32),
        "beta2": 0.1 * jax.random.normal(ks[7], (cout,), jnp.float32),
        "w3": None, "b3": None,
    }
    if use_1x1conv:
        k3a, k3b = jax.random.split(jax.random.fold_in(key, 99))
        p["w3"] = 0.1 * jax.random.normal(k3a, (cout, cin, 1, 1), jnp.float32)
        p["b3"] = 0.1 * jax.random.normal(k3b, (cout,), jnp.float32)
    return p


if __name__ == "__main__":
    key = jax.random.PRNGKey(0)
    fwd = jax.jit(residual_forward, static_argnums=(2, 3))
    # bf16 matmul operands / bf16-stored intermediates vs f32 HIGHEST reference.
    TOL = dict(rtol=4e-2, atol=4e-2)

    # Config A: projection shortcut, stride 2 (downsampling block)
    kx, kp = jax.random.split(key)
    x_a = jax.random.normal(kx, (2, 4, 16, 16), jnp.float32)
    params_a = _make_params(kp, 4, 8, use_1x1conv=True)
    out_a = jax.block_until_ready(fwd(x_a, params_a, True, 2))
    ref_a = residual_reference(x_a, params_a, True, 2)
    np.testing.assert_allclose(np.asarray(out_a), np.asarray(ref_a), **TOL)

    # Config B: identity shortcut, stride 1
    kx2, kp2 = jax.random.split(jax.random.fold_in(key, 1))
    x_b = jax.random.normal(kx2, (2, 8, 16, 16), jnp.float32)
    params_b = _make_params(kp2, 8, 8, use_1x1conv=False)
    out_b = jax.block_until_ready(fwd(x_b, params_b, False, 1))
    ref_b = residual_reference(x_b, params_b, False, 1)
    np.testing.assert_allclose(np.asarray(out_b), np.asarray(ref_b), **TOL)

    # Config C: larger spatial extent, projection shortcut at stride 1
    kx3, kp3 = jax.random.split(jax.random.fold_in(key, 2))
    x_c = jax.random.normal(kx3, (2, 4, 32, 32), jnp.float32)
    params_c = _make_params(kp3, 4, 8, use_1x1conv=True)
    out_c = jax.block_until_ready(fwd(x_c, params_c, True, 1))
    ref_c = residual_reference(x_c, params_c, True, 1)
    np.testing.assert_allclose(np.asarray(out_c), np.asarray(ref_c), **TOL)

    print("KERNEL_OK")
</pallas_src>

<mosaic_0001>
module attributes {stable_mosaic.version = 11 : i64} {
  func.func @kernel(%arg0: i32, %arg1: memref<1x36x9x128xbf16, #tpu.memory_space<vmem>>, %arg2: memref<9x128x128xbf16, #tpu.memory_space<vmem>>, %arg3: memref<1x8x8x128xbf16, #tpu.memory_space<vmem>>, %arg4: memref<1x2x128xf32, #tpu.memory_space<vmem>>, %arg5: memref<64x128xf32, #tpu.memory_space<vmem>>) attributes {dimension_semantics = [#tpu.dimension_semantics<parallel>], iteration_bounds = array<i64: 2>, scalar_prefetch = 0 : i64, scratch_operands = 1 : i64, tpu.core_type = #tpu.core_type<tc>, window_params = [{transform_indices = @transform_0, window_bounds = array<i64: 1, 36, 9, 128>}, {pipeline_mode = #tpu.pipeline_mode<synchronous>, transform_indices = @transform_1, window_bounds = array<i64: 9, 128, 128>}, {transform_indices = @transform_2, window_bounds = array<i64: 1, 8, 8, 128>}, {transform_indices = @transform_3, window_bounds = array<i64: 1, 2, 128>}]} {
    %cst = arith.constant 0.000000e+00 : f32
    %0 = vector.broadcast %cst : f32 to vector<64x128xf32>
    %c0 = arith.constant 0 : index
    %c0_0 = arith.constant 0 : index
    %1 = vector.load %arg5[%c0, %c0_0] : memref<64x128xf32, #tpu.memory_space<vmem>>, vector<64x128xf32>
    tpu.vector_store %arg5[%c0, %c0_0], %0 {strides = array<i32>} : memref<64x128xf32, #tpu.memory_space<vmem>>, vector<64x128xf32>,
    %c0_1 = arith.constant 0 : index
    %c0_2 = arith.constant 0 : index
    %c0_3 = arith.constant 0 : index
    %c0_4 = arith.constant 0 : index
    %2 = vector.load %arg1[%c0_1, %c0_2, %c0_3, %c0_4] : memref<1x36x9x128xbf16, #tpu.memory_space<vmem>>, vector<1x8x8x128xbf16>
    %3 = vector.shape_cast %2 : vector<1x8x8x128xbf16> to vector<8x8x128xbf16>
    %c0_5 = arith.constant 0 : index
    %c0_6 = arith.constant 0 : index
    %4 = vector.load %arg5[%c0_5, %c0_6] : memref<64x128xf32, #tpu.memory_space<vmem>>, vector<64x128xf32>
    %5 = vector.shape_cast %3 : vector<8x8x128xbf16> to vector<64x128xbf16>
    %c0_7 = arith.constant 0 : index
    %c0_8 = arith.constant 0 : index
    %c0_9 = arith.constant 0 : index
    %6 = vector.load %arg2[%c0_7, %c0_8, %c0_9] : memref<9x128x128xbf16, #tpu.memory_space<vmem>>, vector<1x128x128xbf16>
    %7 = vector.shape_cast %6 : vector<1x128x128xbf16> to vector<128x128xbf16>
    %cst_10 = arith.constant dense<0.000000e+00> : vector<64x128xf32>
    %8 = tpu.matmul %5, %7, %cst_10 {dimension_numbers = #tpu.dot_dimension_numbers<[1], [0], [0], [1], [0, 0, 1, 1], [], []>} : vector<64x128xbf16>, vector<128x128xbf16>, vector<64x128xf32> -> vector<64x128xf32>
    %9 = arith.addf %4, %8 : vector<64x128xf32>
    %c0_11 = arith.constant 0 : index
    %c0_12 = arith.constant 0 : index
    %10 = vector.load %arg5[%c0_11, %c0_12] : memref<64x128xf32, #tpu.memory_space<vmem>>, vector<64x128xf32>
    tpu.vector_store %arg5[%c0_11, %c0_12], %9 {strides = array<i32>} : memref<64x128xf32, #tpu.memory_space<vmem>>, vector<64x128xf32>,
    %c0_13 = arith.constant 0 : index
    %c9 = arith.constant 9 : index
    %c0_14 = arith.constant 0 : index
    %c0_15 = arith.constant 0 : index
    %11 = vector.load %arg1[%c0_13, %c9, %c0_14, %c0_15] : memref<1x36x9x128xbf16, #tpu.memory_space<vmem>>, vector<1x8x8x128xbf16>
    %12 = vector.shape_cast %11 : vector<1x8x8x128xbf16> to vector<8x8x128xbf16>
    %c0_16 = arith.constant 0 : index
    %c0_17 = arith.constant 0 : index
    %13 = vector.load %arg5[%c0_16, %c0_17] : memref<64x128xf32, #tpu.memory_space<vmem>>, vector<64x128xf32>
    %14 = vector.shape_cast %12 : vector<8x8x128xbf16> to vector<64x128xbf16>
    %c1 = arith.constant 1 : index
    %c0_18 = arith.constant 0 : index
    %c0_19 = arith.constant 0 : index
    %15 = vector.load %arg2[%c1, %c0_18, %c0_19] : memref<9x128x128xbf16, #tpu.memory_space<vmem>>, vector<1x128x128xbf16>
    %16 = vector.shape_cast %15 : vector<1x128x128xbf16> to vector<128x128xbf16>
    %cst_20 = arith.constant dense<0.000000e+00> : vector<64x128xf32>
    %17 = tpu.matmul %14, %16, %cst_20 {dimension_numbers = #tpu.dot_dimension_numbers<[1], [0], [0], [1], [0, 0, 1, 1], [], []>} : vector<64x128xbf16>, vector<128x128xbf16>, vector<64x128xf32> -> vector<64x128xf32>
    %18 = arith.addf %13, %17 : vector<64x128xf32>
    %c0_21 = arith.constant 0 : index
    %c0_22 = arith.constant 0 : index
    %19 = vector.load %arg5[%c0_21, %c0_22] : memref<64x128xf32, #tpu.memory_space<vmem>>, vector<64x128xf32>
    tpu.vector_store %arg5[%c0_21, %c0_22], %18 {strides = array<i32>} : memref<64x128xf32, #tpu.memory_space<vmem>>, vector<64x128xf32>,
    %c0_23 = arith.constant 0 : index
    %c0_24 = arith.constant 0 : index
    %c1_25 = arith.constant 1 : index
    %c0_26 = arith.constant 0 : index
    %20 = vector.load %arg1[%c0_23, %c0_24, %c1_25, %c0_26] : memref<1x36x9x128xbf16, #tpu.memory_space<vmem>>, vector<1x8x8x128xbf16>
    %21 = vector.shape_cast %20 : vector<1x8x8x128xbf16> to vector<8x8x128xbf16>
    %c0_27 = arith.constant 0 : index
    %c0_28 = arith.constant 0 : index
    %22 = vector.load %arg5[%c0_27, %c0_28] : memref<64x128xf32, #tpu.memory_space<vmem>>, vector<64x128xf32>
    %23 = vector.shape_cast %21 : vector<8x8x128xbf16> to vector<64x128xbf16>
    %c2 = arith.constant 2 : index
    %c0_29 = arith.constant 0 : index
    %c0_30 = arith.constant 0 : index
    %24 = vector.load %arg2[%c2, %c0_29, %c0_30] : memref<9x128x128xbf16, #tpu.memory_space<vmem>>, vector<1x128x128xbf16>
    %25 = vector.shape_cast %24 : vector<1x128x128xbf16> to vector<128x128xbf16>
    %cst_31 = arith.constant dense<0.000000e+00> : vector<64x128xf32>
    %26 = tpu.matmul %23, %25, %cst_31 {dimension_numbers = #tpu.dot_dimension_numbers<[1], [0], [0], [1], [0, 0, 1, 1], [], []>} : vector<64x128xbf16>, vector<128x128xbf16>, vector<64x128xf32> -> vector<64x128xf32>
    %27 = arith.addf %22, %26 : vector<64x128xf32>
    %c0_32 = arith.constant 0 : index
    %c0_33 = arith.constant 0 : index
    %28 = vector.load %arg5[%c0_32, %c0_33] : memref<64x128xf32, #tpu.memory_space<vmem>>, vector<64x128xf32>
    tpu.vector_store %arg5[%c0_32, %c0_33], %27 {strides = array<i32>} : memref<64x128xf32, #tpu.memory_space<vmem>>, vector<64x128xf32>,
    %c0_34 = arith.constant 0 : index
    %c18 = arith.constant 18 : index
    %c0_35 = arith.constant 0 : index
    %c0_36 = arith.constant 0 : index
    %29 = vector.load %arg1[%c0_34, %c18, %c0_35, %c0_36] : memref<1x36x9x128xbf16, #tpu.memory_space<vmem>>, vector<1x8x8x128xbf16>
    %30 = vector.shape_cast %29 : vector<1x8x8x128xbf16> to vector<8x8x128xbf16>
    %c0_37 = arith.constant 0 : index
    %c0_38 = arith.constant 0 : index
    %31 = vector.load %arg5[%c0_37, %c0_38] : memref<64x128xf32, #tpu.memory_space<vmem>>, vector<64x128xf32>
    %32 = vector.shape_cast %30 : vector<8x8x128xbf16> to vector<64x128xbf16>
    %c3 = arith.constant 3 : index
    %c0_39 = arith.constant 0 : index
    %c0_40 = arith.constant 0 : index
    %33 = vector.load %arg2[%c3, %c0_39, %c0_40] : memref<9x128x128xbf16, #tpu.memory_space<vmem>>, vector<1x128x128xbf16>
    %34 = vector.shape_cast %33 : vector<1x128x128xbf16> to vector<128x128xbf16>
    %cst_41 = arith.constant dense<0.000000e+00> : vector<64x128xf32>
    %35 = tpu.matmul %32, %34, %cst_41 {dimension_numbers = #tpu.dot_dimension_numbers<[1], [0], [0], [1], [0, 0, 1, 1], [], []>} : vector<64x128xbf16>, vector<128x128xbf16>, vector<64x128xf32> -> vector<64x128xf32>
    %36 = arith.addf %31, %35 : vector<64x128xf32>
    %c0_42 = arith.constant 0 : index
    %c0_43 = arith.constant 0 : index
    %37 = vector.load %arg5[%c0_42, %c0_43] : memref<64x128xf32, #tpu.memory_space<vmem>>, vector<64x128xf32>
    tpu.vector_store %arg5[%c0_42, %c0_43], %36 {strides = array<i32>} : memref<64x128xf32, #tpu.memory_space<vmem>>, vector<64x128xf32>,
    %c0_44 = arith.constant 0 : index
    %c27 = arith.constant 27 : index
    %c0_45 = arith.constant 0 : index
    %c0_46 = arith.constant 0 : index
    %38 = vector.load %arg1[%c0_44, %c27, %c0_45, %c0_46] : memref<1x36x9x128xbf16, #tpu.memory_space<vmem>>, vector<1x8x8x128xbf16>
    %39 = vector.shape_cast %38 : vector<1x8x8x128xbf16> to vector<8x8x128xbf16>
    %c0_47 = arith.constant 0 : index
    %c0_48 = arith.constant 0 : index
    %40 = vector.load %arg5[%c0_47, %c0_48] : memref<64x128xf32, #tpu.memory_space<vmem>>, vector<64x128xf32>
    %41 = vector.shape_cast %39 : vector<8x8x128xbf16> to vector<64x128xbf16>
    %c4 = arith.constant 4 : index
    %c0_49 = arith.constant 0 : index
    %c0_50 = arith.constant 0 : index
    %42 = vector.load %arg2[%c4, %c0_49, %c0_50] : memref<9x128x128xbf16, #tpu.memory_space<vmem>>, vector<1x128x128xbf16>
    %43 = vector.shape_cast %42 : vector<1x128x128xbf16> to vector<128x128xbf16>
    %cst_51 = arith.constant dense<0.000000e+00> : vector<64x128xf32>
    %44 = tpu.matmul %41, %43, %cst_51 {dimension_numbers = #tpu.dot_dimension_numbers<[1], [0], [0], [1], [0, 0, 1, 1], [], []>} : vector<64x128xbf16>, vector<128x128xbf16>, vector<64x128xf32> -> vector<64x128xf32>
    %45 = arith.addf %40, %44 : vector<64x128xf32>
    %c0_52 = arith.constant 0 : index
    %c0_53 = arith.constant 0 : index
    %46 = vector.load %arg5[%c0_52, %c0_53] : memref<64x128xf32, #tpu.memory_space<vmem>>, vector<64x128xf32>
    tpu.vector_store %arg5[%c0_52, %c0_53], %45 {strides = array<i32>} : memref<64x128xf32, #tpu.memory_space<vmem>>, vector<64x128xf32>,
    %c0_54 = arith.constant 0 : index
    %c18_55 = arith.constant 18 : index
    %c1_56 = arith.constant 1 : index
    %c0_57 = arith.constant 0 : index
    %47 = vector.load %arg1[%c0_54, %c18_55, %c1_56, %c0_57] : memref<1x36x9x128xbf16, #tpu.memory_space<vmem>>, vector<1x8x8x128xbf16>
    %48 = vector.shape_cast %47 : vector<1x8x8x128xbf16> to vector<8x8x128xbf16>
    %c0_58 = arith.constant 0 : index
    %c0_59 = arith.constant 0 : index
    %49 = vector.load %arg5[%c0_58, %c0_59] : memref<64x128xf32, #tpu.memory_space<vmem>>, vector<64x128xf32>
    %50 = vector.shape_cast %48 : vector<8x8x128xbf16> to vector<64x128xbf16>
    %c5 = arith.constant 5 : index
    %c0_60 = arith.constant 0 : index
    %c0_61 = arith.constant 0 : index
    %51 = vector.load %arg2[%c5, %c0_60, %c0_61] : memref<9x128x128xbf16, #tpu.memory_space<vmem>>, vector<1x128x128xbf16>
    %52 = vector.shape_cast %51 : vector<1x128x128xbf16> to vector<128x128xbf16>
    %cst_62 = arith.constant dense<0.000000e+00> : vector<64x128xf32>
    %53 = tpu.matmul %50, %52, %cst_62 {dimension_numbers = #tpu.dot_dimension_numbers<[1], [0], [0], [1], [0, 0, 1, 1], [], []>} : vector<64x128xbf16>, vector<128x128xbf16>, vector<64x128xf32> -> vector<64x128xf32>
    %54 = arith.addf %49, %53 : vector<64x128xf32>
    %c0_63 = arith.constant 0 : index
    %c0_64 = arith.constant 0 : index
    %55 = vector.load %arg5[%c0_63, %c0_64] : memref<64x128xf32, #tpu.memory_space<vmem>>, vector<64x128xf32>
    tpu.vector_store %arg5[%c0_63, %c0_64], %54 {strides = array<i32>} : memref<64x128xf32, #tpu.memory_space<vmem>>, vector<64x128xf32>,
    %c0_65 = arith.constant 0 : index
    %c1_66 = arith.constant 1 : index
    %c0_67 = arith.constant 0 : index
    %c0_68 = arith.constant 0 : index
    %56 = vector.load %arg1[%c0_65, %c1_66, %c0_67, %c0_68] : memref<1x36x9x128xbf16, #tpu.memory_space<vmem>>, vector<1x8x8x128xbf16>
    %57 = vector.shape_cast %56 : vector<1x8x8x128xbf16> to vector<8x8x128xbf16>
    %c0_69 = arith.constant 0 : index
    %c0_70 = arith.constant 0 : index
    %58 = vector.load %arg5[%c0_69, %c0_70] : memref<64x128xf32, #tpu.memory_space<vmem>>, vector<64x128xf32>
    %59 = vector.shape_cast %57 : vector<8x8x128xbf16> to vector<64x128xbf16>
    %c6 = arith.constant 6 : index
    %c0_71 = arith.constant 0 : index
    %c0_72 = arith.constant 0 : index
    %60 = vector.load %arg2[%c6, %c0_71, %c0_72] : memref<9x128x128xbf16, #tpu.memory_space<vmem>>, vector<1x128x128xbf16>
    %61 = vector.shape_cast %60 : vector<1x128x128xbf16> to vector<128x128xbf16>
    %cst_73 = arith.constant dense<0.000000e+00> : vector<64x128xf32>
    %62 = tpu.matmul %59, %61, %cst_73 {dimension_numbers = #tpu.dot_dimension_numbers<[1], [0], [0], [1], [0, 0, 1, 1], [], []>} : vector<64x128xbf16>, vector<128x128xbf16>, vector<64x128xf32> -> vector<64x128xf32>
    %63 = arith.addf %58, %62 : vector<64x128xf32>
    %c0_74 = arith.constant 0 : index
    %c0_75 = arith.constant 0 : index
    %64 = vector.load %arg5[%c0_74, %c0_75] : memref<64x128xf32, #tpu.memory_space<vmem>>, vector<64x128xf32>
    tpu.vector_store %arg5[%c0_74, %c0_75], %63 {strides = array<i32>} : memref<64x128xf32, #tpu.memory_space<vmem>>, vector<64x128xf32>,
    %c0_76 = arith.constant 0 : index
    %c10 = arith.constant 10 : index
    %c0_77 = arith.constant 0 : index
    %c0_78 = arith.constant 0 : index
    %65 = vector.load %arg1[%c0_76, %c10, %c0_77, %c0_78] : memref<1x36x9x128xbf16, #tpu.memory_space<vmem>>, vector<1x8x8x128xbf16>
    %66 = vector.shape_cast %65 : vector<1x8x8x128xbf16> to vector<8x8x128xbf16>
    %c0_79 = arith.constant 0 : index
    %c0_80 = arith.constant 0 : index
    %67 = vector.load %arg5[%c0_79, %c0_80] : memref<64x128xf32, #tpu.memory_space<vmem>>, vector<64x128xf32>
    %68 = vector.shape_cast %66 : vector<8x8x128xbf16> to vector<64x128xbf16>
    %c7 = arith.constant 7 : index
    %c0_81 = arith.constant 0 : index
    %c0_82 = arith.constant 0 : index
    %69 = vector.load %arg2[%c7, %c0_81, %c0_82] : memref<9x128x128xbf16, #tpu.memory_space<vmem>>, vector<1x128x128xbf16>
    %70 = vector.shape_cast %69 : vector<1x128x128xbf16> to vector<128x128xbf16>
    %cst_83 = arith.constant dense<0.000000e+00> : vector<64x128xf32>
    %71 = tpu.matmul %68, %70, %cst_83 {dimension_numbers = #tpu.dot_dimension_numbers<[1], [0], [0], [1], [0, 0, 1, 1], [], []>} : vector<64x128xbf16>, vector<128x128xbf16>, vector<64x128xf32> -> vector<64x128xf32>
    %72 = arith.addf %67, %71 : vector<64x128xf32>
    %c0_84 = arith.constant 0 : index
    %c0_85 = arith.constant 0 : index
    %73 = vector.load %arg5[%c0_84, %c0_85] : memref<64x128xf32, #tpu.memory_space<vmem>>, vector<64x128xf32>
    tpu.vector_store %arg5[%c0_84, %c0_85], %72 {strides = array<i32>} : memref<64x128xf32, #tpu.memory_space<vmem>>, vector<64x128xf32>,
    %c0_86 = arith.constant 0 : index
    %c1_87 = arith.constant 1 : index
    %c1_88 = arith.constant 1 : index
    %c0_89 = arith.constant 0 : index
    %74 = vector.load %arg1[%c0_86, %c1_87, %c1_88, %c0_89] : memref<1x36x9x128xbf16, #tpu.memory_space<vmem>>, vector<1x8x8x128xbf16>
    %75 = vector.shape_cast %74 : vector<1x8x8x128xbf16> to vector<8x8x128xbf16>
    %c0_90 = arith.constant 0 : index
    %c0_91 = arith.constant 0 : index
    %76 = vector.load %arg5[%c0_90, %c0_91] : memref<64x128xf32, #tpu.memory_space<vmem>>, vector<64x128xf32>
    %77 = vector.shape_cast %75 : vector<8x8x128xbf16> to vector<64x128xbf16>
    %c8 = arith.constant 8 : index
    %c0_92 = arith.constant 0 : index
    %c0_93 = arith.constant 0 : index
    %78 = vector.load %arg2[%c8, %c0_92, %c0_93] : memref<9x128x128xbf16, #tpu.memory_space<vmem>>, vector<1x128x128xbf16>
    %79 = vector.shape_cast %78 : vector<1x128x128xbf16> to vector<128x128xbf16>
    %cst_94 = arith.constant dense<0.000000e+00> : vector<64x128xf32>
    %80 = tpu.matmul %77, %79, %cst_94 {dimension_numbers = #tpu.dot_dimension_numbers<[1], [0], [0], [1], [0, 0, 1, 1], [], []>} : vector<64x128xbf16>, vector<128x128xbf16>, vector<64x128xf32> -> vector<64x128xf32>
    %81 = arith.addf %76, %80 : vector<64x128xf32>
    %c0_95 = arith.constant 0 : index
    %c0_96 = arith.constant 0 : index
    %82 = vector.load %arg5[%c0_95, %c0_96] : memref<64x128xf32, #tpu.memory_space<vmem>>, vector<64x128xf32>
    tpu.vector_store %arg5[%c0_95, %c0_96], %81 {strides = array<i32>} : memref<64x128xf32, #tpu.memory_space<vmem>>, vector<64x128xf32>,
    %c0_97 = arith.constant 0 : index
    %c0_98 = arith.constant 0 : index
    %83 = vector.load %arg5[%c0_97, %c0_98] : memref<64x128xf32, #tpu.memory_space<vmem>>, vector<64x128xf32>
    %84 = vector.shape_cast %83 : vector<64x128xf32> to vector<8x8x128xf32>
    %85 = arith.truncf %84 : vector<8x8x128xf32> to vector<8x8x128xbf16>
    %c0_99 = arith.constant 0 : index
    %c0_100 = arith.constant 0 : index
    %c0_101 = arith.constant 0 : index
    %c0_102 = arith.constant 0 : index
    %86 = vector.load %arg3[%c0_99, %c0_100, %c0_101, %c0_102] : memref<1x8x8x128xbf16, #tpu.memory_space<vmem>>, vector<1x8x8x128xbf16>
    %87 = vector.shape_cast %86 : vector<1x8x8x128xbf16> to vector<8x8x128xbf16>
    %88 = vector.shape_cast %85 : vector<8x8x128xbf16> to vector<1x8x8x128xbf16>
    tpu.vector_store %arg3[%c0_99, %c0_100, %c0_101, %c0_102], %88 {strides = array<i32>} : memref<1x8x8x128xbf16, #tpu.memory_space<vmem>>, vector<1x8x8x128xbf16>,
    %cst_103 = arith.constant dense<0.000000e+00> : vector<128xf32>
    %89 = vector.multi_reduction <add>, %83, %cst_103 [0] : vector<64x128xf32> to vector<128xf32>
    %90 = vector.shape_cast %89 : vector<128xf32> to vector<1x128xf32>
    %91 = arith.mulf %83, %83 : vector<64x128xf32>
    %cst_104 = arith.constant dense<0.000000e+00> : vector<128xf32>
    %92 = vector.multi_reduction <add>, %91, %cst_104 [0] : vector<64x128xf32> to vector<128xf32>
    %93 = vector.shape_cast %92 : vector<128xf32> to vector<1x128xf32>
    %94 = tpu.concatenate %90, %93 in 0 : vector<1x128xf32>, vector<1x128xf32> -> vector<2x128xf32>
    %c0_105 = arith.constant 0 : index
    %c0_106 = arith.constant 0 : index
    %c0_107 = arith.constant 0 : index
    %95 = vector.load %arg4[%c0_105, %c0_106, %c0_107] : memref<1x2x128xf32, #tpu.memory_space<vmem>>, vector<1x2x128xf32>
    %96 = vector.shape_cast %95 : vector<1x2x128xf32> to vector<2x128xf32>
    %97 = vector.shape_cast %94 : vector<2x128xf32> to vector<1x2x128xf32>
    tpu.vector_store %arg4[%c0_105, %c0_106, %c0_107], %97 {strides = array<i32>} : memref<1x2x128xf32, #tpu.memory_space<vmem>>, vector<1x2x128xf32>,
    return
  }
  func.func @transform_0(%arg0: i32) -> (i32, i32, i32, i32) {
    %c0_i32 = arith.constant 0 : i32
    %c0_i32_0 = arith.constant 0 : i32
    %c0_i32_1 = arith.constant 0 : i32
    %c0_i32_2 = arith.constant 0 : i32
    return %arg0, %c0_i32, %c0_i32_0, %c0_i32_1 : i32, i32, i32, i32
  }
  func.func @transform_1(%arg0: i32) -> (i32, i32, i32) {
    %c0_i32 = arith.constant 0 : i32
    %c0_i32_0 = arith.constant 0 : i32
    %c0_i32_1 = arith.constant 0 : i32
    %c0_i32_2 = arith.constant 0 : i32
    return %c0_i32, %c0_i32_0, %c0_i32_1 : i32, i32, i32
  }
  func.func @transform_2(%arg0: i32) -> (i32, i32, i32, i32) {
    %c0_i32 = arith.constant 0 : i32
    %c0_i32_0 = arith.constant 0 : i32
    %c0_i32_1 = arith.constant 0 : i32
    %c0_i32_2 = arith.constant 0 : i32
    return %arg0, %c0_i32, %c0_i32_0, %c0_i32_1 : i32, i32, i32, i32
  }
  func.func @transform_3(%arg0: i32) -> (i32, i32, i32) {
    %c0_i32 = arith.constant 0 : i32
    %c0_i32_0 = arith.constant 0 : i32
    %c0_i32_1 = arith.constant 0 : i32
    return %arg0, %c0_i32, %c0_i32_0 : i32, i32, i32
  }
}

module attributes {stable_mosaic.version = 11 : i64} {
  func.func @kernel(%arg0: i32, %arg1: memref<1x8x8x128xbf16, #tpu.memory_space<vmem>>, %arg2: memref<8x128xf32, #tpu.memory_space<vmem>>, %arg3: memref<9x128x128xbf16, #tpu.memory_space<vmem>>, %arg4: memref<1x8x8x128xbf16, #tpu.memory_space<vmem>>, %arg5: memref<1x2x128xf32, #tpu.memory_space<vmem>>, %arg6: memref<10x10x128xf32, #tpu.memory_space<vmem>>, %arg7: memref<64x128xf32, #tpu.memory_space<vmem>>) attributes {dimension_semantics = [#tpu.dimension_semantics<parallel>], iteration_bounds = array<i64: 2>, scalar_prefetch = 0 : i64, scratch_operands = 2 : i64, tpu.core_type = #tpu.core_type<tc>, window_params = [{transform_indices = @transform_0, window_bounds = array<i64: 1, 8, 8, 128>}, {pipeline_mode = #tpu.pipeline_mode<synchronous>, transform_indices = @transform_1, window_bounds = array<i64: 8, 128>}, {pipeline_mode = #tpu.pipeline_mode<synchronous>, transform_indices = @transform_2, window_bounds = array<i64: 9, 128, 128>}, {transform_indices = @transform_3, window_bounds = array<i64: 1, 8, 8, 128>}, {transform_indices = @transform_4, window_bounds = array<i64: 1, 2, 128>}]} {
    %c0 = arith.constant 0 : index
    %c0_0 = arith.constant 0 : index
    %c0_1 = arith.constant 0 : index
    %c0_2 = arith.constant 0 : index
    %0 = vector.load %arg1[%c0, %c0_0, %c0_1, %c0_2] : memref<1x8x8x128xbf16, #tpu.memory_space<vmem>>, vector<1x8x8x128xbf16>
    %1 = vector.shape_cast %0 : vector<1x8x8x128xbf16> to vector<8x8x128xbf16>
    %2 = arith.extf %1 : vector<8x8x128xbf16> to vector<8x8x128xf32>
    %c0_3 = arith.constant 0 : index
    %c0_4 = arith.constant 0 : index
    %3 = vector.load %arg2[%c0_3, %c0_4] : memref<8x128xf32, #tpu.memory_space<vmem>>, vector<1x128xf32>
    %4 = vector.shape_cast %3 : vector<1x128xf32> to vector<1x1x128xf32>
    %5 = vector.broadcast %4 : vector<1x1x128xf32> to vector<8x8x128xf32>
    %6 = arith.mulf %2, %5 : vector<8x8x128xf32>
    %c1 = arith.constant 1 : index
    %c0_5 = arith.constant 0 : index
    %7 = vector.load %arg2[%c1, %c0_5] : memref<8x128xf32, #tpu.memory_space<vmem>>, vector<1x128xf32>
    %8 = vector.shape_cast %7 : vector<1x128xf32> to vector<1x1x128xf32>
    %9 = vector.broadcast %8 : vector<1x1x128xf32> to vector<8x8x128xf32>
    %10 = arith.addf %6, %9 : vector<8x8x128xf32>
    %cst = arith.constant 0.000000e+00 : f32
    %11 = vector.broadcast %cst : f32 to vector<8x8x128xf32>
    %12 = arith.maximumf %10, %11 : vector<8x8x128xf32>
    %cst_6 = arith.constant 0.000000e+00 : f32
    %13 = vector.broadcast %cst_6 : f32 to vector<10x10x128xf32>
    %c0_7 = arith.constant 0 : index
    %c0_8 = arith.constant 0 : index
    %c0_9 = arith.constant 0 : index
    %14 = vector.load %arg6[%c0_7, %c0_8, %c0_9] : memref<10x10x128xf32, #tpu.memory_space<vmem>>, vector<10x10x128xf32>
    tpu.vector_store %arg6[%c0_7, %c0_8, %c0_9], %13 {strides = array<i32>} : memref<10x10x128xf32, #tpu.memory_space<vmem>>, vector<10x10x128xf32>,
    %c1_10 = arith.constant 1 : index
    %c1_11 = arith.constant 1 : index
    %c0_12 = arith.constant 0 : index
    %15 = vector.load %arg6[%c1_10, %c1_11, %c0_12] : memref<10x10x128xf32, #tpu.memory_space<vmem>>, vector<8x8x128xf32>
    tpu.vector_store %arg6[%c1_10, %c1_11, %c0_12], %12 {strides = array<i32>} : memref<10x10x128xf32, #tpu.memory_space<vmem>>, vector<8x8x128xf32>,
    %cst_13 = arith.constant 0.000000e+00 : f32
    %16 = vector.broadcast %cst_13 : f32 to vector<64x128xf32>
    %c0_14 = arith.constant 0 : index
    %c0_15 = arith.constant 0 : index
    %17 = vector.load %arg7[%c0_14, %c0_15] : memref<64x128xf32, #tpu.memory_space<vmem>>, vector<64x128xf32>
    tpu.vector_store %arg7[%c0_14, %c0_15], %16 {strides = array<i32>} : memref<64x128xf32, #tpu.memory_space<vmem>>, vector<64x128xf32>,
    %c0_16 = arith.constant 0 : index
    %c0_17 = arith.constant 0 : index
    %c0_18 = arith.constant 0 : index
    %18 = vector.load %arg6[%c0_16, %c0_17, %c0_18] : memref<10x10x128xf32, #tpu.memory_space<vmem>>, vector<8x8x128xf32>
    %19 = arith.truncf %18 : vector<8x8x128xf32> to vector<8x8x128xbf16>
    %c0_19 = arith.constant 0 : index
    %c0_20 = arith.constant 0 : index
    %20 = vector.load %arg7[%c0_19, %c0_20] : memref<64x128xf32, #tpu.memory_space<vmem>>, vector<64x128xf32>
    %21 = vector.shape_cast %19 : vector<8x8x128xbf16> to vector<64x128xbf16>
    %c0_21 = arith.constant 0 : index
    %c0_22 = arith.constant 0 : index
    %c0_23 = arith.constant 0 : index
    %22 = vector.load %arg3[%c0_21, %c0_22, %c0_23] : memref<9x128x128xbf16, #tpu.memory_space<vmem>>, vector<1x128x128xbf16>
    %23 = vector.shape_cast %22 : vector<1x128x128xbf16> to vector<128x128xbf16>
    %cst_24 = arith.constant dense<0.000000e+00> : vector<64x128xf32>
    %24 = tpu.matmul %21, %23, %cst_24 {dimension_numbers = #tpu.dot_dimension_numbers<[1], [0], [0], [1], [0, 0, 1, 1], [], []>} : vector<64x128xbf16>, vector<128x128xbf16>, vector<64x128xf32> -> vector<64x128xf32>
    %25 = arith.addf %20, %24 : vector<64x128xf32>
    %c0_25 = arith.constant 0 : index
    %c0_26 = arith.constant 0 : index
    %26 = vector.load %arg7[%c0_25, %c0_26] : memref<64x128xf32, #tpu.memory_space<vmem>>, vector<64x128xf32>
    tpu.vector_store %arg7[%c0_25, %c0_26], %25 {strides = array<i32>} : memref<64x128xf32, #tpu.memory_space<vmem>>, vector<64x128xf32>,
    %c0_27 = arith.constant 0 : index
    %c1_28 = arith.constant 1 : index
    %c0_29 = arith.constant 0 : index
    %27 = vector.load %arg6[%c0_27, %c1_28, %c0_29] : memref<10x10x128xf32, #tpu.memory_space<vmem>>, vector<8x8x128xf32>
    %28 = arith.truncf %27 : vector<8x8x128xf32> to vector<8x8x128xbf16>
    %c0_30 = arith.constant 0 : index
    %c0_31 = arith.constant 0 : index
    %29 = vector.load %arg7[%c0_30, %c0_31] : memref<64x128xf32, #tpu.memory_space<vmem>>, vector<64x128xf32>
    %30 = vector.shape_cast %28 : vector<8x8x128xbf16> to vector<64x128xbf16>
    %c1_32 = arith.constant 1 : index
    %c0_33 = arith.constant 0 : index
    %c0_34 = arith.constant 0 : index
    %31 = vector.load %arg3[%c1_32, %c0_33, %c0_34] : memref<9x128x128xbf16, #tpu.memory_space<vmem>>, vector<1x128x128xbf16>
    %32 = vector.shape_cast %31 : vector<1x128x128xbf16> to vector<128x128xbf16>
    %cst_35 = arith.constant dense<0.000000e+00> : vector<64x128xf32>
    %33 = tpu.matmul %30, %32, %cst_35 {dimension_numbers = #tpu.dot_dimension_numbers<[1], [0], [0], [1], [0, 0, 1, 1], [], []>} : vector<64x128xbf16>, vector<128x128xbf16>, vector<64x128xf32> -> vector<64x128xf32>
    %34 = arith.addf %29, %33 : vector<64x128xf32>
    %c0_36 = arith.constant 0 : index
    %c0_37 = arith.constant 0 : index
    %35 = vector.load %arg7[%c0_36, %c0_37] : memref<64x128xf32, #tpu.memory_space<vmem>>, vector<64x128xf32>
    tpu.vector_store %arg7[%c0_36, %c0_37], %34 {strides = array<i32>} : memref<64x128xf32, #tpu.memory_space<vmem>>, vector<64x128xf32>,
    %c0_38 = arith.constant 0 : index
    %c2 = arith.constant 2 : index
    %c0_39 = arith.constant 0 : index
    %36 = vector.load %arg6[%c0_38, %c2, %c0_39] : memref<10x10x128xf32, #tpu.memory_space<vmem>>, vector<8x8x128xf32>
    %37 = arith.truncf %36 : vector<8x8x128xf32> to vector<8x8x128xbf16>
    %c0_40 = arith.constant 0 : index
    %c0_41 = arith.constant 0 : index
    %38 = vector.load %arg7[%c0_40, %c0_41] : memref<64x128xf32, #tpu.memory_space<vmem>>, vector<64x128xf32>
    %39 = vector.shape_cast %37 : vector<8x8x128xbf16> to vector<64x128xbf16>
    %c2_42 = arith.constant 2 : index
    %c0_43 = arith.constant 0 : index
    %c0_44 = arith.constant 0 : index
    %40 = vector.load %arg3[%c2_42, %c0_43, %c0_44] : memref<9x128x128xbf16, #tpu.memory_space<vmem>>, vector<1x128x128xbf16>
    %41 = vector.shape_cast %40 : vector<1x128x128xbf16> to vector<128x128xbf16>
    %cst_45 = arith.constant dense<0.000000e+00> : vector<64x128xf32>
    %42 = tpu.matmul %39, %41, %cst_45 {dimension_numbers = #tpu.dot_dimension_numbers<[1], [0], [0], [1], [0, 0, 1, 1], [], []>} : vector<64x128xbf16>, vector<128x128xbf16>, vector<64x128xf32> -> vector<64x128xf32>
    %43 = arith.addf %38, %42 : vector<64x128xf32>
    %c0_46 = arith.constant 0 : index
    %c0_47 = arith.constant 0 : index
    %44 = vector.load %arg7[%c0_46, %c0_47] : memref<64x128xf32, #tpu.memory_space<vmem>>, vector<64x128xf32>
    tpu.vector_store %arg7[%c0_46, %c0_47], %43 {strides = array<i32>} : memref<64x128xf32, #tpu.memory_space<vmem>>, vector<64x128xf32>,
    %c1_48 = arith.constant 1 : index
    %c0_49 = arith.constant 0 : index
    %c0_50 = arith.constant 0 : index
    %45 = vector.load %arg6[%c1_48, %c0_49, %c0_50] : memref<10x10x128xf32, #tpu.memory_space<vmem>>, vector<8x8x128xf32>
    %46 = arith.truncf %45 : vector<8x8x128xf32> to vector<8x8x128xbf16>
    %c0_51 = arith.constant 0 : index
    %c0_52 = arith.constant 0 : index
    %47 = vector.load %arg7[%c0_51, %c0_52] : memref<64x128xf32, #tpu.memory_space<vmem>>, vector<64x128xf32>
    %48 = vector.shape_cast %46 : vector<8x8x128xbf16> to vector<64x128xbf16>
    %c3 = arith.constant 3 : index
    %c0_53 = arith.constant 0 : index
    %c0_54 = arith.constant 0 : index
    %49 = vector.load %arg3[%c3, %c0_53, %c0_54] : memref<9x128x128xbf16, #tpu.memory_space<vmem>>, vector<1x128x128xbf16>
    %50 = vector.shape_cast %49 : vector<1x128x128xbf16> to vector<128x128xbf16>
    %cst_55 = arith.constant dense<0.000000e+00> : vector<64x128xf32>
    %51 = tpu.matmul %48, %50, %cst_55 {dimension_numbers = #tpu.dot_dimension_numbers<[1], [0], [0], [1], [0, 0, 1, 1], [], []>} : vector<64x128xbf16>, vector<128x128xbf16>, vector<64x128xf32> -> vector<64x128xf32>
    %52 = arith.addf %47, %51 : vector<64x128xf32>
    %c0_56 = arith.constant 0 : index
    %c0_57 = arith.constant 0 : index
    %53 = vector.load %arg7[%c0_56, %c0_57] : memref<64x128xf32, #tpu.memory_space<vmem>>, vector<64x128xf32>
    tpu.vector_store %arg7[%c0_56, %c0_57], %52 {strides = array<i32>} : memref<64x128xf32, #tpu.memory_space<vmem>>, vector<64x128xf32>,
    %c1_58 = arith.constant 1 : index
    %c1_59 = arith.constant 1 : index
    %c0_60 = arith.constant 0 : index
    %54 = vector.load %arg6[%c1_58, %c1_59, %c0_60] : memref<10x10x128xf32, #tpu.memory_space<vmem>>, vector<8x8x128xf32>
    %55 = arith.truncf %54 : vector<8x8x128xf32> to vector<8x8x128xbf16>
    %c0_61 = arith.constant 0 : index
    %c0_62 = arith.constant 0 : index
    %56 = vector.load %arg7[%c0_61, %c0_62] : memref<64x128xf32, #tpu.memory_space<vmem>>, vector<64x128xf32>
    %57 = vector.shape_cast %55 : vector<8x8x128xbf16> to vector<64x128xbf16>
    %c4 = arith.constant 4 : index
    %c0_63 = arith.constant 0 : index
    %c0_64 = arith.constant 0 : index
    %58 = vector.load %arg3[%c4, %c0_63, %c0_64] : memref<9x128x128xbf16, #tpu.memory_space<vmem>>, vector<1x128x128xbf16>
    %59 = vector.shape_cast %58 : vector<1x128x128xbf16> to vector<128x128xbf16>
    %cst_65 = arith.constant dense<0.000000e+00> : vector<64x128xf32>
    %60 = tpu.matmul %57, %59, %cst_65 {dimension_numbers = #tpu.dot_dimension_numbers<[1], [0], [0], [1], [0, 0, 1, 1], [], []>} : vector<64x128xbf16>, vector<128x128xbf16>, vector<64x128xf32> -> vector<64x128xf32>
    %61 = arith.addf %56, %60 : vector<64x128xf32>
    %c0_66 = arith.constant 0 : index
    %c0_67 = arith.constant 0 : index
    %62 = vector.load %arg7[%c0_66, %c0_67] : memref<64x128xf32, #tpu.memory_space<vmem>>, vector<64x128xf32>
    tpu.vector_store %arg7[%c0_66, %c0_67], %61 {strides = array<i32>} : memref<64x128xf32, #tpu.memory_space<vmem>>, vector<64x128xf32>,
    %c1_68 = arith.constant 1 : index
    %c2_69 = arith.constant 2 : index
    %c0_70 = arith.constant 0 : index
    %63 = vector.load %arg6[%c1_68, %c2_69, %c0_70] : memref<10x10x128xf32, #tpu.memory_space<vmem>>, vector<8x8x128xf32>
    %64 = arith.truncf %63 : vector<8x8x128xf32> to vector<8x8x128xbf16>
    %c0_71 = arith.constant 0 : index
    %c0_72 = arith.constant 0 : index
    %65 = vector.load %arg7[%c0_71, %c0_72] : memref<64x128xf32, #tpu.memory_space<vmem>>, vector<64x128xf32>
    %66 = vector.shape_cast %64 : vector<8x8x128xbf16> to vector<64x128xbf16>
    %c5 = arith.constant 5 : index
    %c0_73 = arith.constant 0 : index
    %c0_74 = arith.constant 0 : index
    %67 = vector.load %arg3[%c5, %c0_73, %c0_74] : memref<9x128x128xbf16, #tpu.memory_space<vmem>>, vector<1x128x128xbf16>
    %68 = vector.shape_cast %67 : vector<1x128x128xbf16> to vector<128x128xbf16>
    %cst_75 = arith.constant dense<0.000000e+00> : vector<64x128xf32>
    %69 = tpu.matmul %66, %68, %cst_75 {dimension_numbers = #tpu.dot_dimension_numbers<[1], [0], [0], [1], [0, 0, 1, 1], [], []>} : vector<64x128xbf16>, vector<128x128xbf16>, vector<64x128xf32> -> vector<64x128xf32>
    %70 = arith.addf %65, %69 : vector<64x128xf32>
    %c0_76 = arith.constant 0 : index
    %c0_77 = arith.constant 0 : index
    %71 = vector.load %arg7[%c0_76, %c0_77] : memref<64x128xf32, #tpu.memory_space<vmem>>, vector<64x128xf32>
    tpu.vector_store %arg7[%c0_76, %c0_77], %70 {strides = array<i32>} : memref<64x128xf32, #tpu.memory_space<vmem>>, vector<64x128xf32>,
    %c2_78 = arith.constant 2 : index
    %c0_79 = arith.constant 0 : index
    %c0_80 = arith.constant 0 : index
    %72 = vector.load %arg6[%c2_78, %c0_79, %c0_80] : memref<10x10x128xf32, #tpu.memory_space<vmem>>, vector<8x8x128xf32>
    %73 = arith.truncf %72 : vector<8x8x128xf32> to vector<8x8x128xbf16>
    %c0_81 = arith.constant 0 : index
    %c0_82 = arith.constant 0 : index
    %74 = vector.load %arg7[%c0_81, %c0_82] : memref<64x128xf32, #tpu.memory_space<vmem>>, vector<64x128xf32>
    %75 = vector.shape_cast %73 : vector<8x8x128xbf16> to vector<64x128xbf16>
    %c6 = arith.constant 6 : index
    %c0_83 = arith.constant 0 : index
    %c0_84 = arith.constant 0 : index
    %76 = vector.load %arg3[%c6, %c0_83, %c0_84] : memref<9x128x128xbf16, #tpu.memory_space<vmem>>, vector<1x128x128xbf16>
    %77 = vector.shape_cast %76 : vector<1x128x128xbf16> to vector<128x128xbf16>
    %cst_85 = arith.constant dense<0.000000e+00> : vector<64x128xf32>
    %78 = tpu.matmul %75, %77, %cst_85 {dimension_numbers = #tpu.dot_dimension_numbers<[1], [0], [0], [1], [0, 0, 1, 1], [], []>} : vector<64x128xbf16>, vector<128x128xbf16>, vector<64x128xf32> -> vector<64x128xf32>
    %79 = arith.addf %74, %78 : vector<64x128xf32>
    %c0_86 = arith.constant 0 : index
    %c0_87 = arith.constant 0 : index
    %80 = vector.load %arg7[%c0_86, %c0_87] : memref<64x128xf32, #tpu.memory_space<vmem>>, vector<64x128xf32>
    tpu.vector_store %arg7[%c0_86, %c0_87], %79 {strides = array<i32>} : memref<64x128xf32, #tpu.memory_space<vmem>>, vector<64x128xf32>,
    %c2_88 = arith.constant 2 : index
    %c1_89 = arith.constant 1 : index
    %c0_90 = arith.constant 0 : index
    %81 = vector.load %arg6[%c2_88, %c1_89, %c0_90] : memref<10x10x128xf32, #tpu.memory_space<vmem>>, vector<8x8x128xf32>
    %82 = arith.truncf %81 : vector<8x8x128xf32> to vector<8x8x128xbf16>
    %c0_91 = arith.constant 0 : index
    %c0_92 = arith.constant 0 : index
    %83 = vector.load %arg7[%c0_91, %c0_92] : memref<64x128xf32, #tpu.memory_space<vmem>>, vector<64x128xf32>
    %84 = vector.shape_cast %82 : vector<8x8x128xbf16> to vector<64x128xbf16>
    %c7 = arith.constant 7 : index
    %c0_93 = arith.constant 0 : index
    %c0_94 = arith.constant 0 : index
    %85 = vector.load %arg3[%c7, %c0_93, %c0_94] : memref<9x128x128xbf16, #tpu.memory_space<vmem>>, vector<1x128x128xbf16>
    %86 = vector.shape_cast %85 : vector<1x128x128xbf16> to vector<128x128xbf16>
    %cst_95 = arith.constant dense<0.000000e+00> : vector<64x128xf32>
    %87 = tpu.matmul %84, %86, %cst_95 {dimension_numbers = #tpu.dot_dimension_numbers<[1], [0], [0], [1], [0, 0, 1, 1], [], []>} : vector<64x128xbf16>, vector<128x128xbf16>, vector<64x128xf32> -> vector<64x128xf32>
    %88 = arith.addf %83, %87 : vector<64x128xf32>
    %c0_96 = arith.constant 0 : index
    %c0_97 = arith.constant 0 : index
    %89 = vector.load %arg7[%c0_96, %c0_97] : memref<64x128xf32, #tpu.memory_space<vmem>>, vector<64x128xf32>
    tpu.vector_store %arg7[%c0_96, %c0_97], %88 {strides = array<i32>} : memref<64x128xf32, #tpu.memory_space<vmem>>, vector<64x128xf32>,
    %c2_98 = arith.constant 2 : index
    %c2_99 = arith.constant 2 : index
    %c0_100 = arith.constant 0 : index
    %90 = vector.load %arg6[%c2_98, %c2_99, %c0_100] : memref<10x10x128xf32, #tpu.memory_space<vmem>>, vector<8x8x128xf32>
    %91 = arith.truncf %90 : vector<8x8x128xf32> to vector<8x8x128xbf16>
    %c0_101 = arith.constant 0 : index
    %c0_102 = arith.constant 0 : index
    %92 = vector.load %arg7[%c0_101, %c0_102] : memref<64x128xf32, #tpu.memory_space<vmem>>, vector<64x128xf32>
    %93 = vector.shape_cast %91 : vector<8x8x128xbf16> to vector<64x128xbf16>
    %c8 = arith.constant 8 : index
    %c0_103 = arith.constant 0 : index
    %c0_104 = arith.constant 0 : index
    %94 = vector.load %arg3[%c8, %c0_103, %c0_104] : memref<9x128x128xbf16, #tpu.memory_space<vmem>>, vector<1x128x128xbf16>
    %95 = vector.shape_cast %94 : vector<1x128x128xbf16> to vector<128x128xbf16>
    %cst_105 = arith.constant dense<0.000000e+00> : vector<64x128xf32>
    %96 = tpu.matmul %93, %95, %cst_105 {dimension_numbers = #tpu.dot_dimension_numbers<[1], [0], [0], [1], [0, 0, 1, 1], [], []>} : vector<64x128xbf16>, vector<128x128xbf16>, vector<64x128xf32> -> vector<64x128xf32>
    %97 = arith.addf %92, %96 : vector<64x128xf32>
    %c0_106 = arith.constant 0 : index
    %c0_107 = arith.constant 0 : index
    %98 = vector.load %arg7[%c0_106, %c0_107] : memref<64x128xf32, #tpu.memory_space<vmem>>, vector<64x128xf32>
    tpu.vector_store %arg7[%c0_106, %c0_107], %97 {strides = array<i32>} : memref<64x128xf32, #tpu.memory_space<vmem>>, vector<64x128xf32>,
    %c0_108 = arith.constant 0 : index
    %c0_109 = arith.constant 0 : index
    %99 = vector.load %arg7[%c0_108, %c0_109] : memref<64x128xf32, #tpu.memory_space<vmem>>, vector<64x128xf32>
    %100 = vector.shape_cast %99 : vector<64x128xf32> to vector<8x8x128xf32>
    %101 = arith.truncf %100 : vector<8x8x128xf32> to vector<8x8x128xbf16>
    %c0_110 = arith.constant 0 : index
    %c0_111 = arith.constant 0 : index
    %c0_112 = arith.constant 0 : index
    %c0_113 = arith.constant 0 : index
    %102 = vector.load %arg4[%c0_110, %c0_111, %c0_112, %c0_113] : memref<1x8x8x128xbf16, #tpu.memory_space<vmem>>, vector<1x8x8x128xbf16>
    %103 = vector.shape_cast %102 : vector<1x8x8x128xbf16> to vector<8x8x128xbf16>
    %104 = vector.shape_cast %101 : vector<8x8x128xbf16> to vector<1x8x8x128xbf16>
    tpu.vector_store %arg4[%c0_110, %c0_111, %c0_112, %c0_113], %104 {strides = array<i32>} : memref<1x8x8x128xbf16, #tpu.memory_space<vmem>>, vector<1x8x8x128xbf16>,
    %cst_114 = arith.constant dense<0.000000e+00> : vector<128xf32>
    %105 = vector.multi_reduction <add>, %99, %cst_114 [0] : vector<64x128xf32> to vector<128xf32>
    %106 = vector.shape_cast %105 : vector<128xf32> to vector<1x128xf32>
    %107 = arith.mulf %99, %99 : vector<64x128xf32>
    %cst_115 = arith.constant dense<0.000000e+00> : vector<128xf32>
    %108 = vector.multi_reduction <add>, %107, %cst_115 [0] : vector<64x128xf32> to vector<128xf32>
    %109 = vector.shape_cast %108 : vector<128xf32> to vector<1x128xf32>
    %110 = tpu.concatenate %106, %109 in 0 : vector<1x128xf32>, vector<1x128xf32> -> vector<2x128xf32>
    %c0_116 = arith.constant 0 : index
    %c0_117 = arith.constant 0 : index
    %c0_118 = arith.constant 0 : index
    %111 = vector.load %arg5[%c0_116, %c0_117, %c0_118] : memref<1x2x128xf32, #tpu.memory_space<vmem>>, vector<1x2x128xf32>
    %112 = vector.shape_cast %111 : vector<1x2x128xf32> to vector<2x128xf32>
    %113 = vector.shape_cast %110 : vector<2x128xf32> to vector<1x2x128xf32>
    tpu.vector_store %arg5[%c0_116, %c0_117, %c0_118], %113 {strides = array<i32>} : memref<1x2x128xf32, #tpu.memory_space<vmem>>, vector<1x2x128xf32>,
    return
  }
  func.func @transform_0(%arg0: i32) -> (i32, i32, i32, i32) {
    %c0_i32 = arith.constant 0 : i32
    %c0_i32_0 = arith.constant 0 : i32
    %c0_i32_1 = arith.constant 0 : i32
    %c0_i32_2 = arith.constant 0 : i32
    return %arg0, %c0_i32, %c0_i32_0, %c0_i32_1 : i32, i32, i32, i32
  }
  func.func @transform_1(%arg0: i32) -> (i32, i32) {
    %c0_i32 = arith.constant 0 : i32
    %c0_i32_0 = arith.constant 0 : i32
    %c0_i32_1 = arith.constant 0 : i32
    return %c0_i32, %c0_i32_0 : i32, i32
  }
  func.func @transform_2(%arg0: i32) -> (i32, i32, i32) {
    %c0_i32 = arith.constant 0 : i32
    %c0_i32_0 = arith.constant 0 : i32
    %c0_i32_1 = arith.constant 0 : i32
    %c0_i32_2 = arith.constant 0 : i32
    return %c0_i32, %c0_i32_0, %c0_i32_1 : i32, i32, i32
  }
  func.func @transform_3(%arg0: i32) -> (i32, i32, i32, i32) {
    %c0_i32 = arith.constant 0 : i32
    %c0_i32_0 = arith.constant 0 : i32
    %c0_i32_1 = arith.constant 0 : i32
    %c0_i32_2 = arith.constant 0 : i32
    return %arg0, %c0_i32, %c0_i32_0, %c0_i32_1 : i32, i32, i32, i32
  }
  func.func @transform_4(%arg0: i32) -> (i32, i32, i32) {
    %c0_i32 = arith.constant 0 : i32
    %c0_i32_0 = arith.constant 0 : i32
    %c0_i32_1 = arith.constant 0 : i32
    return %arg0, %c0_i32, %c0_i32_0 : i32, i32, i32
  }
}

module attributes {stable_mosaic.version = 11 : i64} {
  func.func @kernel(%arg0: i32, %arg1: memref<1x8x8x128xbf16, #tpu.memory_space<vmem>>, %arg2: memref<8x128xf32, #tpu.memory_space<vmem>>, %arg3: memref<1x9x9x128xbf16, #tpu.memory_space<vmem>>, %arg4: memref<128x128xbf16, #tpu.memory_space<vmem>>, %arg5: memref<1x8x8x128xf32, #tpu.memory_space<vmem>>) attributes {dimension_semantics = [#tpu.dimension_semantics<parallel>], iteration_bounds = array<i64: 2>, scalar_prefetch = 0 : i64, scratch_operands = 0 : i64, tpu.core_type = #tpu.core_type<tc>, window_params = [{transform_indices = @transform_0, window_bounds = array<i64: 1, 8, 8, 128>}, {pipeline_mode = #tpu.pipeline_mode<synchronous>, transform_indices = @transform_1, window_bounds = array<i64: 8, 128>}, {transform_indices = @transform_2, window_bounds = array<i64: 1, 9, 9, 128>}, {pipeline_mode = #tpu.pipeline_mode<synchronous>, transform_indices = @transform_3, window_bounds = array<i64: 128, 128>}, {transform_indices = @transform_4, window_bounds = array<i64: 1, 8, 8, 128>}]} {
    %c0 = arith.constant 0 : index
    %c0_0 = arith.constant 0 : index
    %c0_1 = arith.constant 0 : index
    %c0_2 = arith.constant 0 : index
    %0 = vector.load %arg1[%c0, %c0_0, %c0_1, %c0_2] : memref<1x8x8x128xbf16, #tpu.memory_space<vmem>>, vector<1x8x8x128xbf16>
    %1 = vector.shape_cast %0 : vector<1x8x8x128xbf16> to vector<8x8x128xbf16>
    %2 = arith.extf %1 : vector<8x8x128xbf16> to vector<8x8x128xf32>
    %c0_3 = arith.constant 0 : index
    %c0_4 = arith.constant 0 : index
    %3 = vector.load %arg2[%c0_3, %c0_4] : memref<8x128xf32, #tpu.memory_space<vmem>>, vector<1x128xf32>
    %4 = vector.shape_cast %3 : vector<1x128xf32> to vector<1x1x128xf32>
    %5 = vector.broadcast %4 : vector<1x1x128xf32> to vector<8x8x128xf32>
    %6 = arith.mulf %2, %5 : vector<8x8x128xf32>
    %c1 = arith.constant 1 : index
    %c0_5 = arith.constant 0 : index
    %7 = vector.load %arg2[%c1, %c0_5] : memref<8x128xf32, #tpu.memory_space<vmem>>, vector<1x128xf32>
    %8 = vector.shape_cast %7 : vector<1x128xf32> to vector<1x1x128xf32>
    %9 = vector.broadcast %8 : vector<1x1x128xf32> to vector<8x8x128xf32>
    %10 = arith.addf %6, %9 : vector<8x8x128xf32>
    %c0_6 = arith.constant 0 : index
    %c0_7 = arith.constant 0 : index
    %c0_8 = arith.constant 0 : index
    %c0_9 = arith.constant 0 : index
    %11 = vector.load %arg3[%c0_6, %c0_7, %c0_8, %c0_9] : memref<1x9x9x128xbf16, #tpu.memory_space<vmem>>, vector<1x8x8x128xbf16>
    %12 = vector.shape_cast %11 : vector<1x8x8x128xbf16> to vector<8x8x128xbf16>
    %13 = vector.shape_cast %12 : vector<8x8x128xbf16> to vector<64x128xbf16>
    %c0_10 = arith.constant 0 : index
    %c0_11 = arith.constant 0 : index
    %14 = vector.load %arg4[%c0_10, %c0_11] : memref<128x128xbf16, #tpu.memory_space<vmem>>, vector<128x128xbf16>
    %cst = arith.constant dense<0.000000e+00> : vector<64x128xf32>
    %15 = tpu.matmul %13, %14, %cst {dimension_numbers = #tpu.dot_dimension_numbers<[1], [0], [0], [1], [0, 0, 1, 1], [], []>} : vector<64x128xbf16>, vector<128x128xbf16>, vector<64x128xf32> -> vector<64x128xf32>
    %c2 = arith.constant 2 : index
    %c0_12 = arith.constant 0 : index
    %16 = vector.load %arg2[%c2, %c0_12] : memref<8x128xf32, #tpu.memory_space<vmem>>, vector<1x128xf32>
    %17 = vector.broadcast %16 : vector<1x128xf32> to vector<64x128xf32>
    %18 = arith.addf %15, %17 : vector<64x128xf32>
    %19 = vector.shape_cast %18 : vector<64x128xf32> to vector<8x8x128xf32>
    %20 = arith.addf %10, %19 : vector<8x8x128xf32>
    %cst_13 = arith.constant 0.000000e+00 : f32
    %21 = vector.broadcast %cst_13 : f32 to vector<8x8x128xf32>
    %22 = arith.maximumf %20, %21 : vector<8x8x128xf32>
    %c0_14 = arith.constant 0 : index
    %c0_15 = arith.constant 0 : index
    %c0_16 = arith.constant 0 : index
    %c0_17 = arith.constant 0 : index
    %23 = vector.load %arg5[%c0_14, %c0_15, %c0_16, %c0_17] : memref<1x8x8x128xf32, #tpu.memory_space<vmem>>, vector<1x8x8x128xf32>
    %24 = vector.shape_cast %23 : vector<1x8x8x128xf32> to vector<8x8x128xf32>
    %25 = vector.shape_cast %22 : vector<8x8x128xf32> to vector<1x8x8x128xf32>
    tpu.vector_store %arg5[%c0_14, %c0_15, %c0_16, %c0_17], %25 {strides = array<i32>} : memref<1x8x8x128xf32, #tpu.memory_space<vmem>>, vector<1x8x8x128xf32>,
    return
  }
  func.func @transform_0(%arg0: i32) -> (i32, i32, i32, i32) {
    %c0_i32 = arith.constant 0 : i32
    %c0_i32_0 = arith.constant 0 : i32
    %c0_i32_1 = arith.constant 0 : i32
    %c0_i32_2 = arith.constant 0 : i32
    return %arg0, %c0_i32, %c0_i32_0, %c0_i32_1 : i32, i32, i32, i32
  }
  func.func @transform_1(%arg0: i32) -> (i32, i32) {
    %c0_i32 = arith.constant 0 : i32
    %c0_i32_0 = arith.constant 0 : i32
    %c0_i32_1 = arith.constant 0 : i32
    return %c0_i32, %c0_i32_0 : i32, i32
  }
  func.func @transform_2(%arg0: i32) -> (i32, i32, i32, i32) {
    %c3_i32 = arith.constant 3 : i32
    %c0_i32 = arith.constant 0 : i32
    %c0_i32_0 = arith.constant 0 : i32
    %c0_i32_1 = arith.constant 0 : i32
    return %arg0, %c3_i32, %c0_i32, %c0_i32_0 : i32, i32, i32, i32
  }
  func.func @transform_3(%arg0: i32) -> (i32, i32) {
    %c0_i32 = arith.constant 0 : i32
    %c0_i32_0 = arith.constant 0 : i32
    %c0_i32_1 = arith.constant 0 : i32
    return %c0_i32, %c0_i32_0 : i32, i32
  }
  func.func @transform_4(%arg0: i32) -> (i32, i32, i32, i32) {
    %c0_i32 = arith.constant 0 : i32
    %c0_i32_0 = arith.constant 0 : i32
    %c0_i32_1 = arith.constant 0 : i32
    %c0_i32_2 = arith.constant 0 : i32
    return %arg0, %c0_i32, %c0_i32_0, %c0_i32_1 : i32, i32, i32, i32
  }
}

</mosaic_0001>

<bundles_post_ra>
// kernel: residual_forward.5
= control target key start
LH: loop header
LB: loop body
LE: loop exit
PB: predicated region body
PF: predicated region fallthrough
CT: control target
= control target key end

     0   :  { %s688_s15 = smov 0   ;;  %s752_s0 = inlined_call_operand.vmem [shape: bf16[2,8,8,128], index: 0, kind: input, shape index: {}]   ;;  %s753_s1 = inlined_call_operand.vmem [shape: f32[8,128], index: 1, kind: input, shape index: {}]   ;;  %s754_s2 = inlined_call_operand.vmem [shape: bf16[2,36,9,128], index: 2, kind: input, shape index: {}]   ;;  %s755_s3 = inlined_call_operand.vmem [shape: bf16[128,128], index: 3, kind: input, shape index: {}]   ;;  %s756_s4 = inlined_call_operand.vmem [shape: f32[2,8,8,128], index: 4, kind: output, shape index: {}]  }
   0x1 LB: > { %s527_s16 = sadd.s32 4294967295, %s661_s15   ;;  %p531_p0 = scmp.ge.s32.totalorder %s661_s15, 1  ;;  %s661_s15 = sphi %s688_s15, %s14_s15  }
   0x2   : > { %p173_p1 = scmp.lt.s32.totalorder %s661_s15, 3 }
   0x4   : > { %p174_p2 = pnand %p531_p0, %p173_p1 }
   0x5   : > { %v643_v0 = vld [vmem:[%s755_s3] sm:$0xff] (!%p174_p2)   ;;  %p205_p3 = scmp.lt.s32.totalorder (!%p174_p2), %s527_s16, 1  ;;  %v644_v1 = vld [vmem:[%s755_s3 + $0x8] sm:$0xff] (!%p174_p2)   ;;  %v645_v2 = vld [vmem:[%s755_s3 + $0x10] sm:$0xff] (!%p174_p2)  }
   0x6   : > { %177 = sbr.rel (%p174_p2) target bundleno = 261 (0x105), region = 36  ;;  %595 = vmatprep.subr.bf16.mxu0 (!%p174_p2), %v643_v0  ;;  %619 = vmatprep.subr.bf16.mxu1 (!%p174_p2), %v643_v0  ;;  %v646_v3 = vld [vmem:[%s755_s3 + $0x18] sm:$0xff] (!%p174_p2)   ;;  %v647_v6 = vld [vmem:[%s755_s3 + $0x20] sm:$0xff] (!%p174_p2)   ;;  %v648_v7 = vld [vmem:[%s755_s3 + $0x28] sm:$0xff] (!%p174_p2)  }
   0x7   : > { %596 = vmatpush3.bf16.msra.mxu0 (!%p174_p2), %v643_v0  ;;  %627 = vmatpush3.bf16.msra.mxu1 (!%p174_p2), %v643_v0  ;;  %v649_v8 = vld [vmem:[%s755_s3 + $0x30] sm:$0xff] (!%p174_p2)   ;;  %v650_v9 = vld [vmem:[%s755_s3 + $0x38] sm:$0xff] (!%p174_p2)   ;;  %v537_v18 = vld [vmem:[%s753_s1] ss:$0 sm:$0xff] (!%p174_p2) }
   0x8   : > { %597 = vmatprep.subr.bf16.mxu0 (!%p174_p2), %v644_v1  ;;  %620 = vmatprep.subr.bf16.mxu1 (!%p174_p2), %v644_v1  ;;  %v538_v27 = vld [vmem:[%s753_s1 + $0x1] ss:$0 sm:$0xff] (!%p174_p2)  ;;  %v547_v32 = vld [vmem:[%s753_s1 + $0x2] ss:$0 sm:$0xff] (!%p174_p2) }
   0xb   : > { %598 = vmatpush3.bf16.msra.mxu0 (!%p174_p2), %v644_v1  ;;  %628 = vmatpush3.bf16.msra.mxu1 (!%p174_p2), %v644_v1 }
   0xc   : > { %599 = vmatprep.subr.bf16.mxu0 (!%p174_p2), %v645_v2  ;;  %621 = vmatprep.subr.bf16.mxu1 (!%p174_p2), %v645_v2 }
   0xd   : > { %s758_s16 = smov (!%p205_p3, %s527_s16), 1 }
   0xe   : > { %s534_s23 = smul.u32 288, %s758_s16  ;;  %s562_s11 = sshll.u32 %s758_s16, 5 }
   0xf   : > { %600 = vmatpush3.bf16.msra.mxu0 %v645_v2  ;;  %629 = vmatpush3.bf16.msra.mxu1 %v645_v2  ;;  %s209_s14 = scalar_lea.vmem %s752_s0, %s562_s11 }
  0x10   : > { %s711_s26 = scalar_lea.vmem %s754_s2, %s534_s23  ;;  %601 = vmatprep.subr.bf16.mxu0 %v646_v3  ;;  %622 = vmatprep.subr.bf16.mxu1 %v646_v3  ;;  %v580_v12 = vld [vmem:[%s209_s14 + $0x8] sm:$0xff]   ;;  %v582_v13 = vld [vmem:[%s209_s14 + $0x18] sm:$0xff]   ;;  %v565_v14 = vld [vmem:[%s209_s14] sm:$0xff]   ;;  %s563_s23 = sshll.u32 %s758_s16, 6 }
  0x11   : > { %v651_v4 = vld [vmem:[%s711_s26 + $0xd8] ss:$8 sps:$4 sm:$0xff]   ;;  %v653_v10 = vld [vmem:[%s711_s26 + $0xe8] ss:$8 sps:$4 sm:$0xff]   ;;  %v570_v16 = vunpack.c.l.bf16 %v580_v12  ;;  %v578_v17 = vunpack.c.l.bf16 %v582_v13  ;;  %v566_v19 = vunpack.c.l.bf16 %v565_v14  ;;  %v571_v21 = vunpack.c.h.bf16 %v580_v12  ;;  %s220_s25 = scalar_lea.vmem %s756_s4, %s563_s23 }
  0x12   : > { %v652_v5 = vld [vmem:[%s711_s26 + $0xf8] ss:$8 sps:$4 sm:$0xff]   ;;  %611 = vmatprep.mubr.bf16.mxu0 %v651_v4  ;;  %v654_v11 = vld [vmem:[%s711_s26 + $0x108] ss:$8 sps:$4 sm:$0xff]   ;;  %v579_v22 = vunpack.c.h.bf16 %v582_v13  ;;  %v567_v23 = vunpack.c.h.bf16 %v565_v14 }
  0x13   : > { %615 = vmatprep.mubr.bf16.mxu1 %v652_v5  ;;  %602 = vmatpush3.bf16.msra.mxu0 %v646_v3  ;;  %v581_v15 = vld [vmem:[%s209_s14 + $0x10] sm:$0xff]   ;;  %v245_v25 = vmul.f32 %v570_v16, %v537_v18  ;;  %v249_v26 = vmul.f32 %v578_v17, %v537_v18  ;;  %v243_v28 = vmul.f32 %v566_v19, %v537_v18 }
  0x14   : > { %630 = vmatpush3.bf16.msra.mxu1 %v646_v3  ;;  %603 = vmatprep.subr.bf16.mxu0 %v647_v6  ;;  %v574_v20 = vunpack.c.l.bf16 %v581_v15  ;;  %v575_v24 = vunpack.c.h.bf16 %v581_v15  ;;  %v246_v30 = vmul.f32 %v571_v21, %v537_v18  ;;  %v250_v31 = vmul.f32 %v579_v22, %v537_v18 }
  0x15   : > { %623 = vmatprep.subr.bf16.mxu1 %v647_v6  ;;  %v244_v33 = vmul.f32 %v567_v23, %v537_v18  ;;  %v258_v35 = vadd.f32 %v538_v27, %v245_v25  ;;  %v262_v36 = vadd.f32 %v538_v27, %v249_v26  ;;  %v256_v39 = vadd.f32 %v538_v27, %v243_v28 }
  0x16   : > { %v247_v29 = vmul.f32 %v574_v20, %v537_v18  ;;  %v248_v34 = vmul.f32 %v575_v24, %v537_v18  ;;  %v259_v45 = vadd.f32 %v538_v27, %v246_v30  ;;  %v263_v46 = vadd.f32 %v538_v27, %v250_v31 }
  0x17   : > { %604 = vmatpush3.bf16.msra.mxu0 %v647_v6  ;;  %v257_v51 = vadd.f32 %v538_v27, %v244_v33 }
  0x18   : > { %631 = vmatpush3.bf16.msra.mxu1 %v647_v6  ;;  %605 = vmatprep.subr.bf16.mxu0 %v648_v7  ;;  %v260_v40 = vadd.f32 %v538_v27, %v247_v29  ;;  %v261_v52 = vadd.f32 %v538_v27, %v248_v34 }
  0x19   : > { %624 = vmatprep.subr.bf16.mxu1 %v648_v7 }
  0x1b   : > { %606 = vmatpush3.bf16.msra.mxu0 %v648_v7 }
  0x1c   : > { %632 = vmatpush3.bf16.msra.mxu1 %v648_v7  ;;  %607 = vmatprep.subr.bf16.mxu0 %v649_v8 }
  0x1d   : > { %625 = vmatprep.subr.bf16.mxu1 %v649_v8 }
  0x1f   : > { %608 = vmatpush3.bf16.msra.mxu0 %v649_v8 }
  0x20   : > { %633 = vmatpush3.bf16.msra.mxu1 %v649_v8  ;;  %609 = vmatprep.subr.bf16.mxu0 %v650_v9 }
  0x21   : > { %626 = vmatprep.subr.bf16.mxu1 %v650_v9 }
  0x23   : > { %610 = vmatpush3.bf16.msra.mxu0 %v650_v9 }
  0x24   : > { %634 = vmatpush3.bf16.msra.mxu1 %v650_v9 }
  0x26   : > { %612 = vmatmul.mubr.bf16.vlgmr.msra.gmra.mrb[0].mxu0 %v653_v10 }
  0x27   : > { %616 = vmatmul.mubr.bf16.vlgmr.msra.gmra.mrb[0].mxu1 %v654_v11 }
  0xf9   : > { %v613_v37 = vpop.f32.mrb[0].mxu0 }
  0xfa   : > { %v617_v38 = vpop.f32.mrb[0].mxu1  ;;  %v408_v41 = vadd.f32 %v613_v37, %v547_v32  ;;  %v399_v43 = vpop.f32.mrb[1].mxu0 }
  0xfb   : > { %v424_v42 = vadd.f32 %v617_v38, %v547_v32  ;;  %v415_v44 = vpop.f32.mrb[1].mxu1  ;;  %v400_v47 = vadd.f32 %v547_v32, %v399_v43  ;;  %v614_v49 = vpop.f32.mrb[2].mxu0 }
  0xfc   : > { %v416_v48 = vadd.f32 %v547_v32, %v415_v44  ;;  %v618_v50 = vpop.f32.mrb[2].mxu1  ;;  %v432_v53 = vadd.f32 %v408_v41, %v258_v35  ;;  %v411_v55 = vadd.f32 %v614_v49, %v547_v32  ;;  %v402_v57 = vpop.f32.mrb[3].mxu0 }
  0xfd   : > { %v436_v54 = vadd.f32 %v424_v42, %v262_v36  ;;  %v427_v56 = vadd.f32 %v618_v50, %v547_v32  ;;  %v418_v58 = vpop.f32.mrb[3].mxu1  ;;  %v430_v59 = vadd.f32 %v400_v47, %v256_v39  ;;  %v403_v61 = vadd.f32 %v547_v32, %v402_v57 }
  0xfe   : > { %v434_v60 = vadd.f32 %v416_v48, %v260_v40  ;;  %v419_v62 = vadd.f32 %v547_v32, %v418_v58  ;;  %v440_v63 = vmax.f32 %v432_v53, 0.0  ;;  %v433_v1 = vadd.f32 %v411_v55, %v259_v45 }
  0xff   : > { %v444_v0 = vmax.f32 %v436_v54, 0.0  ;;  %v437_v2 = vadd.f32 %v427_v56, %v263_v46  ;;  %v438_v3 = vmax.f32 %v430_v59, 0.0  ;;  %v431_v5 = vadd.f32 %v403_v61, %v257_v51 }
 0x100   : > { %v442_v4 = vmax.f32 %v434_v60, 0.0  ;;  %v435_v6 = vadd.f32 %v419_v62, %v261_v52  ;;  %448 = vst [vmem:[%s220_s25 + $0x10] sm:$0xff] %v440_v63  ;;  %v441_v7 = vmax.f32 %v433_v1, 0.0 }
 0x101   : > { %452 = vst [vmem:[%s220_s25 + $0x30] sm:$0xff] %v444_v0  ;;  %v445_v8 = vmax.f32 %v437_v2, 0.0  ;;  %446 = vst [vmem:[%s220_s25] sm:$0xff] %v438_v3  ;;  %v439_v9 = vmax.f32 %v431_v5, 0.0 }
 0x102   : > { %450 = vst [vmem:[%s220_s25 + $0x20] sm:$0xff] %v442_v4  ;;  %v443_v10 = vmax.f32 %v435_v6, 0.0  ;;  %449 = vst [vmem:[%s220_s25 + $0x18] sm:$0xff] %v441_v7 }
 0x103   : > { %453 = vst [vmem:[%s220_s25 + $0x38] sm:$0xff] %v445_v8  ;;  %447 = vst [vmem:[%s220_s25 + $0x8] sm:$0xff] %v439_v9 }
 0x104   : > { %451 = vst [vmem:[%s220_s25 + $0x28] sm:$0xff] %v443_v10 }
 0x105 PF: > { %s14_s15 = sadd.s32 1, %s661_s15  }
 0x106   : > { %p11_p4 = scmp.ge.s32.totalorder %s14_s15, 4  }
 0x108   :  { %13 = sbr.rel (!%p11_p4) target bundleno = 1 (0x1), region = 69 }

// kernel: residual_forward.4
= control target key start
LH: loop header
LB: loop body
LE: loop exit
PB: predicated region body
PF: predicated region fallthrough
CT: control target
= control target key end

     0   :  { %s3039_s15 = smov 0   ;;  %s3496_s0 = inlined_call_operand.vmem [shape: bf16[2,8,8,128], index: 0, kind: input, shape index: {}]   ;;  %s3497_s1 = inlined_call_operand.vmem [shape: f32[8,128], index: 1, kind: input, shape index: {}]   ;;  %s3498_s2 = inlined_call_operand.vmem [shape: bf16[9,128,128], index: 2, kind: input, shape index: {}]   ;;  %s3499_s3 = inlined_call_operand.vmem [shape: bf16[2,8,8,128], index: 3, kind: output, shape index: {0}]   ;;  %s3500_s4 = inlined_call_operand.vmem [shape: f32[2,2,128], index: 4, kind: output, shape index: {1}]  }
   0x1 LB: > { %s2190_s16 = sadd.s32 4294967295, %s3011_s15   ;;  %p2194_p0 = scmp.ge.s32.totalorder %s3011_s15, 1  ;;  %s3011_s15 = sphi %s3039_s15, %s15_s15  }
   0x2   : > { %p165_p1 = scmp.lt.s32.totalorder %s3011_s15, 3 }
   0x4   : > { %p166_p2 = pnand %p2194_p0, %p165_p1 }
   0x5   : > { %v2933_v0 = vld [vmem:[%s3498_s2] sm:$0xff] (!%p166_p2)   ;;  %v2935_v2 = vld [vmem:[%s3498_s2 + $0x8] sm:$0xff] (!%p166_p2)   ;;  %p3058_p3 = scmp.lt.s32.totalorder (!%p166_p2), %s2190_s16, 1  ;;  %v3013_v3 = vmov (!%p166_p2), 0.0   ;;  %v2937_v5 = vld [vmem:[%s3498_s2 + $0x10] sm:$0xff] (!%p166_p2)   ;;  %vm2101_vm0 = vcmask (!%p166_p2), 1040384  }
   0x6   : > { %169 = sbr.rel (%p166_p2) target bundleno = 414 (0x19e), region = 32  ;;  %v2934_v1 = vld [vmem:[%s3498_s2 + $0x100] sm:$0xff] (!%p166_p2)   ;;  %2628 = vmatprep.subr.bf16.mxu1 (!%p166_p2), %v2933_v0  ;;  %260 = vst [vmem:[#allocation2] sm:$0xff] (!%p166_p2), %v3013_v3  ;;  %262 = vst [vmem:[#allocation2 + $0x10] sm:$0xff] (!%p166_p2), %v3013_v3  ;;  %v2936_v4 = vld [vmem:[%s3498_s2 + $0x108] sm:$0xff] (!%p166_p2)  }
   0x7   : > { %263 = vst [vmem:[#allocation2 + $0x18] sm:$0x3] (!%p166_p2), %v3013_v3  ;;  %261 = vst [vmem:[#allocation2 + $0x8] sm:$0x3] (!%p166_p2), %v3013_v3  ;;  %2724 = vmatprep.subr.bf16.mxu0 (!%p166_p2), %v2934_v1  ;;  %2629 = vmatpush3.bf16.msra.mxu1 (!%p166_p2), %v2933_v0  ;;  %v2938_v6 = vld [vmem:[%s3498_s2 + $0x110] sm:$0xff] (!%p166_p2)   ;;  %v2939_v7 = vld [vmem:[%s3498_s2 + $0x18] sm:$0xff] (!%p166_p2)  }
   0x8   : > { %264 = vst [vmem:[#allocation2 + $0x20] sm:$0xff] (!%p166_p2), %v3013_v3  ;;  %265 = vst [vmem:[#allocation2 + $0x28] sm:$0x3] (!%p166_p2), %v3013_v3  ;;  %2725 = vmatpush3.bf16.msra.mxu0 (!%p166_p2), %v2934_v1  ;;  %2630 = vmatprep.subr.bf16.mxu1 (!%p166_p2), %v2935_v2  ;;  %v2940_v8 = vld [vmem:[%s3498_s2 + $0x118] sm:$0xff] (!%p166_p2)   ;;  %v2941_v9 = vld [vmem:[%s3498_s2 + $0x20] sm:$0xff] (!%p166_p2)  }
   0x9   : > { %266 = vst [vmem:[#allocation2 + $0x30] sm:$0xff] (!%p166_p2), %v3013_v3  ;;  %267 = vst [vmem:[#allocation2 + $0x38] sm:$0x3] (!%p166_p2), %v3013_v3  ;;  %2726 = vmatprep.subr.bf16.mxu0 (!%p166_p2), %v2936_v4  ;;  %v2942_v10 = vld [vmem:[%s3498_s2 + $0x120] sm:$0xff] (!%p166_p2)   ;;  %v2943_v11 = vld [vmem:[%s3498_s2 + $0x28] sm:$0xff] (!%p166_p2)  }
   0xa   : > { %268 = vst [vmem:[#allocation2 + $0x40] sm:$0xff] (!%p166_p2), %v3013_v3  ;;  %269 = vst [vmem:[#allocation2 + $0x48] sm:$0x3] (!%p166_p2), %v3013_v3  ;;  %v3124_v13 = vld [vmem:[%s3497_s1] ss:$0 sm:$0xff] (!%p166_p2)  ;;  %v2944_v14 = vld [vmem:[%s3498_s2 + $0x128] sm:$0xff] (!%p166_p2)  }
   0xb   : > { %270 = vst [vmem:[#allocation2 + $0x50] sm:$0xff] (!%p166_p2), %v3013_v3  ;;  %271 = vst [vmem:[#allocation2 + $0x58] sm:$0x3] (!%p166_p2), %v3013_v3  ;;  %2631 = vmatpush3.bf16.msra.mxu1 (!%p166_p2), %v2935_v2  ;;  %v3132_v17 = vld [vmem:[%s3497_s1 + $0x1] ss:$0 sm:$0xff] (!%p166_p2)  ;;  %v2945_v21 = vld [vmem:[%s3498_s2 + $0x30] sm:$0xff] (!%p166_p2)  }
   0xc   : > { %272 = vst [vmem:[#allocation2 + $0x60] sm:$0xff] (!%p166_p2), %v3013_v3  ;;  %273 = vst [vmem:[#allocation2 + $0x68] sm:$0x3] (!%p166_p2), %v3013_v3  ;;  %2727 = vmatpush3.bf16.msra.mxu0 (!%p166_p2), %v2936_v4  ;;  %2632 = vmatprep.subr.bf16.mxu1 (!%p166_p2), %v2937_v5  ;;  %v2946_v24 = vld [vmem:[%s3498_s2 + $0x130] sm:$0xff] (!%p166_p2)   ;;  %v2947_v29 = vld [vmem:[%s3498_s2 + $0x38] sm:$0xff] (!%p166_p2)  }
   0xd   : > { %274 = vst [vmem:[#allocation2 + $0x70] sm:$0xff] %v3013_v3  ;;  %275 = vst [vmem:[#allocation2 + $0x78] sm:$0x3] %v3013_v3  ;;  %s3503_s16 = smov (!%p3058_p3, %s2190_s16), 1  ;;  %2728 = vmatprep.subr.bf16.mxu0 %v2938_v6  ;;  %v2948_v34 = vld [vmem:[%s3498_s2 + $0x138] sm:$0xff]   ;;  %v2949_v38 = vld [vmem:[%s3498_s2 + $0x40] sm:$0xff]  }
   0xe   : > { %276 = vst [vmem:[#allocation2 + $0x80] sm:$0xff] %v3013_v3  ;;  %277 = vst [vmem:[#allocation2 + $0x88] sm:$0x3] %v3013_v3  ;;  %s2440_s8 = sshll.u32 %s3503_s16, 5  ;;  %v2950_v39 = vld [vmem:[%s3498_s2 + $0x140] sm:$0xff]   ;;  %v2952_v52 = vld [vmem:[%s3498_s2 + $0x148] sm:$0xff]  }
   0xf   : > { %278 = vst [vmem:[#allocation2 + $0x90] sm:$0xff] %v3013_v3  ;;  %279 = vst [vmem:[#allocation2 + $0x98] sm:$0x3] %v3013_v3  ;;  %2633 = vmatpush3.bf16.msra.mxu1 %v2937_v5  ;;  %s3115_s17 = scalar_lea.vmem %s3496_s0, %s2440_s8  ;;  %v2951_v60 = vld [vmem:[%s3498_s2 + $0x48] sm:$0xff]   ;;  %v2954_v1 = vld [vmem:[%s3498_s2 + $0x150] sm:$0xff]   ;;  %s204_s7 = scalar_lea.vmem %s3499_s3, %s2440_s8 }
  0x10   : > { %2729 = vmatpush3.bf16.msra.mxu0 %v2938_v6  ;;  %2634 = vmatprep.subr.bf16.mxu1 %v2939_v7  ;;  %v2479_v12 = vld [vmem:[%s3115_s17] sm:$0xff]   ;;  %v2514_v20 = vld [vmem:[%s3115_s17 + $0x8] sm:$0xff]   ;;  %v2515_v40 = vld [vmem:[%s3115_s17 + $0x10] sm:$0xff]   ;;  %s2199_s8 = sshll.u32 %s3503_s16, 1 }
  0x11   : > { %2730 = vmatprep.subr.bf16.mxu0 %v2940_v8  ;;  %v2480_v15 = vunpack.c.l.bf16 %v2479_v12  ;;  %v2481_v16 = vunpack.c.h.bf16 %v2479_v12  ;;  %v2484_v22 = vunpack.c.l.bf16 %v2514_v20  ;;  %v2485_v23 = vunpack.c.h.bf16 %v2514_v20  ;;  %v2516_v44 = vld [vmem:[%s3115_s17 + $0x18] sm:$0xff]   ;;  %s208_s11 = scalar_lea.vmem %s3500_s4, %s2199_s8 }
  0x12   : > { %v2488_v41 = vunpack.c.l.bf16 %v2515_v40  ;;  %v2489_v42 = vunpack.c.h.bf16 %v2515_v40  ;;  %v2492_v49 = vunpack.c.l.bf16 %v2516_v44  ;;  %v2493_v50 = vunpack.c.h.bf16 %v2516_v44  ;;  %v2965_v40 = vld [vmem:[%s3498_s2 + $0x80] sm:$0xff]   ;;  %v2967_v44 = vld [vmem:[%s3498_s2 + $0x88] sm:$0xff]  }
  0x13   : > { %2635 = vmatpush3.bf16.msra.mxu1 %v2939_v7  ;;  %v231_v18 = vmul.f32 %v2480_v15, %v3124_v13  ;;  %v232_v19 = vmul.f32 %v2481_v16, %v3124_v13  ;;  %v233_v27 = vmul.f32 %v2484_v22, %v3124_v13  ;;  %v234_v28 = vmul.f32 %v2485_v23, %v3124_v13  ;;  %v2958_v15 = vld [vmem:[%s3498_s2 + $0x160] sm:$0xff]  }
  0x14   : > { %2731 = vmatpush3.bf16.msra.mxu0 %v2940_v8  ;;  %2636 = vmatprep.subr.bf16.mxu1 %v2941_v9  ;;  %v235_v47 = vmul.f32 %v2488_v41, %v3124_v13  ;;  %v236_v48 = vmul.f32 %v2489_v42, %v3124_v13  ;;  %v237_v56 = vmul.f32 %v2492_v49, %v3124_v13  ;;  %v490_v16 = vld [vmem:[#allocation2 + $0x1] sm:$0xff] }
  0x15   : > { %2732 = vmatprep.subr.bf16.mxu0 %v2942_v10  ;;  %v244_v25 = vadd.f32 %v3132_v17, %v231_v18  ;;  %v245_v26 = vadd.f32 %v3132_v17, %v232_v19  ;;  %v246_v32 = vadd.f32 %v3132_v17, %v233_v27  ;;  %v247_v33 = vadd.f32 %v3132_v17, %v234_v28  ;;  %v2957_v23 = vld [vmem:[%s3498_s2 + $0x60] sm:$0xff]   ;;  %v2962_v27 = vld [vmem:[%s3498_s2 + $0x170] sm:$0xff]   ;;  %v2968_v41 = vld [vmem:[%s3498_s2 + $0x188] sm:$0xff]  }
  0x16   : > { %v248_v54 = vadd.f32 %v3132_v17, %v235_v47  ;;  %v249_v55 = vadd.f32 %v3132_v17, %v236_v48  ;;  %v238_v57 = vmul.f32 %v2493_v50, %v3124_v13  ;;  %v250_v0 = vadd.f32 %v3132_v17, %v237_v56  ;;  %v2961_v28 = vld [vmem:[%s3498_s2 + $0x70] sm:$0xff]   ;;  %v684_v50 = vld [vmem:[#allocation2 + $0x2] sm:$0xff] }
  0x17   : > { %2637 = vmatpush3.bf16.msra.mxu1 %v2941_v9  ;;  %v3150_v30 = vmax.f32 %v244_v25, 0.0  ;;  %v3152_v31 = vmax.f32 %v245_v26, 0.0  ;;  %v3163_v36 = vmax.f32 %v246_v32, 0.0  ;;  %v3165_v37 = vmax.f32 %v247_v33, 0.0  ;;  %v2960_v25 = vld [vmem:[%s3498_s2 + $0x168] sm:$0xff]   ;;  %v2966_v32 = vld [vmem:[%s3498_s2 + $0x180] sm:$0xff]  }
  0x18   : > { %2733 = vmatpush3.bf16.msra.mxu0 %v2942_v10  ;;  %2638 = vmatprep.subr.bf16.mxu1 %v2943_v11  ;;  %v3205_v61 = vmax.f32 %v248_v54, 0.0  ;;  %v3209_v63 = vmax.f32 %v249_v55, 0.0  ;;  %v251_v2 = vadd.f32 %v3132_v17, %v238_v57  ;;  %v3223_v6 = vmax.f32 %v250_v0, 0.0  ;;  %v2953_v10 = vld [vmem:[%s3498_s2 + $0x50] sm:$0xff]   ;;  %v2959_v26 = vld [vmem:[%s3498_s2 + $0x68] sm:$0xff]   ;;  %v2971_v55 = vld [vmem:[%s3498_s2 + $0x98] sm:$0xff]  }
  0x19   : > { %2734 = vmatprep.subr.bf16.mxu0 %v2944_v14  ;;  %281 = vst [vmem:[#allocation2 + $0x11] sm:$0xff] %v3150_v30  ;;  %282 = vst [vmem:[#allocation2 + $0x21] sm:$0xff] %v3152_v31  ;;  %v2458_v35 = vpack.c.bf16 %v3152_v31, %v3150_v30  ;;  %v2459_v43 = vpack.c.bf16 %v3165_v37, %v3163_v36  ;;  %v2446_v22 = vpack.c.bf16 %v3150_v30, %v490_v16  ;;  %v2963_v30 = vld [vmem:[%s3498_s2 + $0x78] sm:$0xff]   ;;  %v2974_v56 = vld [vmem:[%s3498_s2 + $0x1a0] sm:$0xff]  }
  0x1a   : > { %283 = vst [vmem:[#allocation2 + $0x31] sm:$0xff] %v3163_v36  ;;  %284 = vst [vmem:[#allocation2 + $0x41] sm:$0xff] %v3165_v37  ;;  %v2460_v5 = vpack.c.bf16 %v3209_v63, %v3205_v61  ;;  %v3229_v9 = vmax.f32 %v251_v2, 0.0  ;;  %v3319_v47 = vpack.c.bf16 %v3205_v61, %v3165_v37  ;;  %v2973_v57 = vld [vmem:[%s3498_s2 + $0xa0] sm:$0xff]   ;;  %v2980_v0 = vld [vmem:[%s3498_s2 + $0x1b8] sm:$0xff]  }
  0x1b   : > { %2639 = vmatpush3.bf16.msra.mxu1 %v2943_v11  ;;  %2740 = vmatprep.mubr.bf16.mxu0 %v2458_v35  ;;  %285 = vst [vmem:[#allocation2 + $0x51] sm:$0xff] %v3205_v61  ;;  %286 = vst [vmem:[#allocation2 + $0x61] sm:$0xff] %v3209_v63  ;;  %v2956_v11 = vld [vmem:[%s3498_s2 + $0x158] sm:$0xff]   ;;  %v2978_v61 = vld [vmem:[%s3498_s2 + $0x1b0] sm:$0xff]  }
  0x1c   : > { %2735 = vmatpush3.bf16.msra.mxu0 %v2944_v14  ;;  %2640 = vmatprep.subr.bf16.mxu1 %v2945_v21  ;;  %287 = vst [vmem:[#allocation2 + $0x71] sm:$0xff] %v3223_v6  ;;  %288 = vst [vmem:[#allocation2 + $0x81] sm:$0xff] %v3229_v9  ;;  %v2461_v12 = vpack.c.bf16 %v3229_v9, %v3223_v6  ;;  %v2955_v14 = vld [vmem:[%s3498_s2 + $0x58] sm:$0xff]   ;;  %v2982_v2 = vld [vmem:[%s3498_s2 + $0x1c0] sm:$0xff]  }
  0x1d   : > { %2736 = vmatprep.subr.bf16.mxu0 %v2946_v24 }
  0x1f   : > { %2641 = vmatpush3.bf16.msra.mxu1 %v2945_v21 }
  0x20   : > { %2737 = vmatpush3.bf16.msra.mxu0 %v2946_v24  ;;  %2642 = vmatprep.subr.bf16.mxu1 %v2947_v29  ;;  %v3179_v45 = vld [vmem:[#allocation2 + $0x10] sm:$0xff]  ;;  %v3181_v46 = vld [vmem:[#allocation2 + $0x20] sm:$0xff] }
  0x21   : > { %2738 = vmatprep.subr.bf16.mxu0 %v2948_v34  ;;  %v2442_v51 = vpack.c.bf16 %v3179_v45, %v3013_v3  ;;  %v2454_v53 = vpack.c.bf16 %v3181_v46, %v3179_v45  ;;  %v3196_v58 = vld [vmem:[#allocation2 + $0x30] sm:$0xff]  ;;  %v3207_v62 = vld [vmem:[#allocation2 + $0x40] sm:$0xff] }
  0x22   : > { %v3200_v59 = vpack.c.bf16 %v3196_v58, %v3181_v46  ;;  %v2455_v4 = vpack.c.bf16 %v3207_v62, %v3196_v58  ;;  %v3225_v7 = vld [vmem:[#allocation2 + $0x12] sm:$0xff]  ;;  %v3227_v8 = vld [vmem:[#allocation2 + $0x22] sm:$0xff] }
  0x23   : > { %2643 = vmatpush3.bf16.msra.mxu1 %v2947_v29  ;;  %2644 = vmatprep.mubr.bf16.mxu1 %v2442_v51  ;;  %v2462_v13 = vpack.c.bf16 %v3227_v8, %v3225_v7  ;;  %v3249_v17 = vld [vmem:[#allocation2 + $0x50] sm:$0xff]  ;;  %v3251_v18 = vld [vmem:[#allocation2 + $0x60] sm:$0xff]  ;;  %v2964_v29 = vld [vmem:[%s3498_s2 + $0x178] sm:$0xff]   ;;  %v2450_v54 = vpack.c.bf16 %v3225_v7, %v684_v50 }
  0x24   : > { %2739 = vmatpush3.bf16.msra.mxu0 %v2948_v34  ;;  %2652 = vmatprep.subr.bf16.mxu1 %v2949_v38  ;;  %v3255_v19 = vpack.c.bf16 %v3249_v17, %v3207_v62  ;;  %v2456_v20 = vpack.c.bf16 %v3251_v18, %v3249_v17  ;;  %v3259_v21 = vld [vmem:[#allocation2 + $0x70] sm:$0xff]  ;;  %v3294_v34 = vld [vmem:[#allocation2 + $0x42] sm:$0xff]  ;;  %v2972_v51 = vld [vmem:[%s3498_s2 + $0x198] sm:$0xff]  }
  0x25   : > { %2748 = vmatprep.subr.bf16.mxu0 %v2950_v39  ;;  %v3267_v24 = vpack.c.bf16 %v3259_v21, %v3251_v18  ;;  %v3292_v33 = vld [vmem:[#allocation2 + $0x32] sm:$0xff]  ;;  %v3323_v49 = vld [vmem:[#allocation2 + $0x82] sm:$0xff] }
  0x26   : > { %2645 = vmatmul.mubr.bf16.vlgmr.msra.gmra.mrb[0].mxu1 %v3200_v59  ;;  %v3296_v35 = vld [vmem:[#allocation2 + $0x52] sm:$0xff]  ;;  %v3383_v7 = vpack.c.bf16 %v3292_v33, %v3227_v8  ;;  %v3001_v58 = vld [vmem:[%s3498_s2 + $0x220] sm:$0xff]   ;;  %v3002_v62 = vld [vmem:[%s3498_s2 + $0x228] sm:$0xff]  }
  0x27   : > { %2741 = vmatmul.mubr.bf16.vlgmr.msra.gmra.mrb[0].mxu0 %v2459_v43  ;;  %2653 = vmatpush3.bf16.msra.mxu1 %v2949_v38  ;;  %v3298_v38 = vld [vmem:[#allocation2 + $0x62] sm:$0xff]  ;;  %v3312_v43 = vpack.c.bf16 %v3163_v36, %v3152_v31  ;;  %v3321_v48 = vld [vmem:[#allocation2 + $0x72] sm:$0xff] }
  0x28   : > { %2749 = vmatpush3.bf16.msra.mxu0 %v2950_v39  ;;  %2654 = vmatprep.subr.bf16.mxu1 %v2951_v60  ;;  %v2463_v39 = vpack.c.bf16 %v3294_v34, %v3292_v33  ;;  %v2464_v42 = vpack.c.bf16 %v3298_v38, %v3296_v35  ;;  %v2970_v31 = vld [vmem:[%s3498_s2 + $0x190] sm:$0xff]   ;;  %v2465_v37 = vpack.c.bf16 %v3323_v49, %v3321_v48 }
  0x29   : > { %2750 = vmatprep.subr.bf16.mxu0 %v2952_v52  ;;  %2744 = vmatprep.mubr.bf16.mxu0 %v2460_v5  ;;  %v2969_v36 = vld [vmem:[%s3498_s2 + $0x90] sm:$0xff]   ;;  %v2981_v5 = vld [vmem:[%s3498_s2 + $0xc0] sm:$0xff]   ;;  %v3411_v16 = vpack.c.bf16 %v3321_v48, %v3298_v38 }
  0x2a   : > { %2648 = vmatprep.mubr.bf16.mxu1 %v3255_v19  ;;  %v2986_v8 = vld [vmem:[%s3498_s2 + $0x1d0] sm:$0xff]  }
  0x2b   : > { %2655 = vmatpush3.bf16.msra.mxu1 %v2951_v60  ;;  %v2976_v60 = vld [vmem:[%s3498_s2 + $0x1a8] sm:$0xff]   ;;  %v2994_v45 = vld [vmem:[%s3498_s2 + $0x1f0] sm:$0xff]  }
  0x2c   : > { %2751 = vmatpush3.bf16.msra.mxu0 %v2952_v52  ;;  %2656 = vmatprep.subr.bf16.mxu1 %v2953_v10  ;;  %v3340_v52 = vpack.c.bf16 %v3223_v6, %v3209_v63  ;;  %v2977_v63 = vld [vmem:[%s3498_s2 + $0xb0] sm:$0xff]   ;;  %v2984_v6 = vld [vmem:[%s3498_s2 + $0x1c8] sm:$0xff]  }
  0x2d   : > { %2752 = vmatprep.subr.bf16.mxu0 %v2954_v1  ;;  %v2993_v46 = vld [vmem:[%s3498_s2 + $0xf0] sm:$0xff]  }
  0x2e   : > { %2649 = vmatmul.mubr.bf16.gmra.mrb[4].mxu1 %v3267_v24  ;;  %v1856_v17 = vld [vmem:[#allocation2 + $0x92] sm:$0xff] }
  0x2f   : > { %2745 = vmatmul.mubr.bf16.gmra.mrb[4].mxu0 %v2461_v12  ;;  %2657 = vmatpush3.bf16.msra.mxu1 %v2953_v10  ;;  %v3388_v10 = vpack.c.bf16 %v3296_v35, %v3294_v34  ;;  %v3393_v12 = vld [vmem:[#allocation2 + $0x80] sm:$0xff]  ;;  %v2477_v18 = vpack.c.bf16 %v1856_v17, %v3323_v49 }
  0x30   : > { %2753 = vmatpush3.bf16.msra.mxu0 %v2954_v1  ;;  %2764 = vmatprep.mubr.bf16.mxu0 %v2462_v13  ;;  %v2979_v1 = vld [vmem:[%s3498_s2 + $0xb8] sm:$0xff]   ;;  %v2469_v13 = vpack.c.bf16 %v3013_v3, %v3393_v12  ;;  %v2457_v33 = vpack.c.bf16 %v3393_v12, %v3259_v21 }
  0x31   : > { %2754 = vmatprep.subr.bf16.mxu0 %v2956_v11  ;;  %2658 = vmatprep.subr.bf16.mxu1 %v2955_v14  ;;  %v2987_v3 = vld [vmem:[%s3498_s2 + $0xd8] sm:$0xff]  }
  0x32   : > { %2668 = vmatprep.mubr.bf16.mxu1 %v2446_v22  ;;  %v2989_v22 = vld [vmem:[%s3498_s2 + $0xe0] sm:$0xff]  }
  0x33   : > { %2659 = vmatpush3.bf16.msra.mxu1 %v2955_v14  ;;  %v2985_v14 = vld [vmem:[%s3498_s2 + $0xd0] sm:$0xff]  }
  0x34   : > { %2755 = vmatpush3.bf16.msra.mxu0 %v2956_v11  ;;  %2660 = vmatprep.subr.bf16.mxu1 %v2957_v23  ;;  %v2983_v11 = vld [vmem:[%s3498_s2 + $0xc8] sm:$0xff]  }
  0x35   : > { %2756 = vmatprep.subr.bf16.mxu0 %v2958_v15 }
  0x37   : > { %2661 = vmatpush3.bf16.msra.mxu1 %v2957_v23  ;;  %v2992_v23 = vld [vmem:[%s3498_s2 + $0x1e8] sm:$0xff]  }
  0x38   : > { %2757 = vmatpush3.bf16.msra.mxu0 %v2958_v15  ;;  %2662 = vmatprep.subr.bf16.mxu1 %v2959_v26  ;;  %v2988_v15 = vld [vmem:[%s3498_s2 + $0x1d8] sm:$0xff]  }
  0x39   : > { %2758 = vmatprep.subr.bf16.mxu0 %v2960_v25 }
  0x3b   : > { %2663 = vmatpush3.bf16.msra.mxu1 %v2959_v26  ;;  %v2997_v26 = vld [vmem:[%s3498_s2 + $0x200] sm:$0xff]  }
  0x3c   : > { %2759 = vmatpush3.bf16.msra.mxu0 %v2960_v25  ;;  %2664 = vmatprep.subr.bf16.mxu1 %v2961_v28  ;;  %v2995_v25 = vld [vmem:[%s3498_s2 + $0xf8] sm:$0xff]  }
  0x3d   : > { %2760 = vmatprep.subr.bf16.mxu0 %v2962_v27 }
  0x3f   : > { %2665 = vmatpush3.bf16.msra.mxu1 %v2961_v28  ;;  %v1662_v28 = vld [vmem:[#allocation2 + $0x91] sm:$0xff] }
  0x40   : > { %2761 = vmatpush3.bf16.msra.mxu0 %v2962_v27  ;;  %2666 = vmatprep.subr.bf16.mxu1 %v2963_v30  ;;  %v2998_v27 = vld [vmem:[%s3498_s2 + $0x208] sm:$0xff]  }
  0x41   : > { %2762 = vmatprep.subr.bf16.mxu0 %v2964_v29 }
  0x43   : > { %2667 = vmatpush3.bf16.msra.mxu1 %v2963_v30  ;;  %v2473_v30 = vpack.c.bf16 %v1662_v28, %v3229_v9  ;;  %v3004_v9 = vld [vmem:[%s3498_s2 + $0x238] sm:$0xff]  }
  0x44   : > { %2763 = vmatpush3.bf16.msra.mxu0 %v2964_v29  ;;  %2676 = vmatprep.subr.bf16.mxu1 %v2965_v40  ;;  %v2999_v29 = vld [vmem:[%s3498_s2 + $0x210] sm:$0xff]  }
  0x45   : > { %2772 = vmatprep.subr.bf16.mxu0 %v2966_v32 }
  0x46   : > { %2669 = vmatmul.mubr.bf16.vlgmr.msra.gmra.mrb[0].mxu1 %v3312_v43 }
  0x47   : > { %2765 = vmatmul.mubr.bf16.vlgmr.msra.gmra.mrb[0].mxu0 %v2463_v39  ;;  %2677 = vmatpush3.bf16.msra.mxu1 %v2965_v40 }
  0x48   : > { %2773 = vmatpush3.bf16.msra.mxu0 %v2966_v32  ;;  %2768 = vmatprep.mubr.bf16.mxu0 %v2464_v42  ;;  %v3000_v32 = vld [vmem:[%s3498_s2 + $0x218] sm:$0xff]  }
  0x49   : > { %2774 = vmatprep.subr.bf16.mxu0 %v2968_v41  ;;  %2672 = vmatprep.mubr.bf16.mxu1 %v3319_v47 }
  0x4a   : > { %2678 = vmatprep.subr.bf16.mxu1 %v2967_v44 }
  0x4b   : > { %2679 = vmatpush3.bf16.msra.mxu1 %v2967_v44 }
  0x4c   : > { %2775 = vmatpush3.bf16.msra.mxu0 %v2968_v41  ;;  %2680 = vmatprep.subr.bf16.mxu1 %v2969_v36 }
  0x4d   : > { %2776 = vmatprep.subr.bf16.mxu0 %v2970_v31 }
  0x4e   : > { %2673 = vmatmul.mubr.bf16.gmra.mrb[4].mxu1 %v3340_v52 }
  0x4f   : > { %2769 = vmatmul.mubr.bf16.gmra.mrb[4].mxu0 %v2465_v37  ;;  %2681 = vmatpush3.bf16.msra.mxu1 %v2969_v36 }
  0x50   : > { %2777 = vmatpush3.bf16.msra.mxu0 %v2970_v31  ;;  %2788 = vmatprep.mubr.bf16.mxu0 %v3200_v59  ;;  %v2975_v59 = vld [vmem:[%s3498_s2 + $0xa8] sm:$0xff]  }
  0x51   : > { %2778 = vmatprep.subr.bf16.mxu0 %v2972_v51  ;;  %2692 = vmatprep.mubr.bf16.mxu1 %v2450_v54 }
  0x52   : > { %2682 = vmatprep.subr.bf16.mxu1 %v2971_v55 }
  0x53   : > { %2683 = vmatpush3.bf16.msra.mxu1 %v2971_v55 }
  0x54   : > { %2779 = vmatpush3.bf16.msra.mxu0 %v2972_v51  ;;  %2684 = vmatprep.subr.bf16.mxu1 %v2973_v57 }
  0x55   : > { %2780 = vmatprep.subr.bf16.mxu0 %v2974_v56 }
  0x57   : > { %2685 = vmatpush3.bf16.msra.mxu1 %v2973_v57 }
  0x58   : > { %2781 = vmatpush3.bf16.msra.mxu0 %v2974_v56  ;;  %2686 = vmatprep.subr.bf16.mxu1 %v2975_v59 }
  0x59   : > { %2782 = vmatprep.subr.bf16.mxu0 %v2976_v60 }
  0x5b   : > { %2687 = vmatpush3.bf16.msra.mxu1 %v2975_v59 }
  0x5c   : > { %2783 = vmatpush3.bf16.msra.mxu0 %v2976_v60  ;;  %2688 = vmatprep.subr.bf16.mxu1 %v2977_v63 }
  0x5d   : > { %2784 = vmatprep.subr.bf16.mxu0 %v2978_v61 }
  0x5f   : > { %2689 = vmatpush3.bf16.msra.mxu1 %v2977_v63 }
  0x60   : > { %2785 = vmatpush3.bf16.msra.mxu0 %v2978_v61  ;;  %2690 = vmatprep.subr.bf16.mxu1 %v2979_v1 }
  0x61   : > { %2786 = vmatprep.subr.bf16.mxu0 %v2980_v0 }
  0x63   : > { %2691 = vmatpush3.bf16.msra.mxu1 %v2979_v1 }
  0x64   : > { %2787 = vmatpush3.bf16.msra.mxu0 %v2980_v0  ;;  %2700 = vmatprep.subr.bf16.mxu1 %v2981_v5 }
  0x65   : > { %2796 = vmatprep.subr.bf16.mxu0 %v2982_v2 }
  0x66   : > { %2693 = vmatmul.mubr.bf16.vlgmr.msra.gmra.mrb[0].mxu1 %v3383_v7 }
  0x67   : > { %2789 = vmatmul.mubr.bf16.vlgmr.msra.gmra.mrb[0].mxu0 %v3255_v19  ;;  %2701 = vmatpush3.bf16.msra.mxu1 %v2981_v5  ;;  %v2990_v19 = vld [vmem:[%s3498_s2 + $0x1e0] sm:$0xff]  }
  0x68   : > { %2797 = vmatpush3.bf16.msra.mxu0 %v2982_v2  ;;  %2792 = vmatprep.mubr.bf16.mxu0 %v3267_v24  ;;  %v2991_v24 = vld [vmem:[%s3498_s2 + $0xe8] sm:$0xff]  }
  0x69   : > { %2798 = vmatprep.subr.bf16.mxu0 %v2984_v6  ;;  %2696 = vmatprep.mubr.bf16.mxu1 %v3388_v10 }
  0x6a   : > { %2702 = vmatprep.subr.bf16.mxu1 %v2983_v11 }
  0x6b   : > { %2703 = vmatpush3.bf16.msra.mxu1 %v2983_v11 }
  0x6c   : > { %2799 = vmatpush3.bf16.msra.mxu0 %v2984_v6  ;;  %2704 = vmatprep.subr.bf16.mxu1 %v2985_v14 }
  0x6d   : > { %2800 = vmatprep.subr.bf16.mxu0 %v2986_v8 }
  0x6e   : > { %2697 = vmatmul.mubr.bf16.gmra.mrb[4].mxu1 %v3411_v16 }
  0x6f   : > { %2793 = vmatmul.mubr.bf16.gmra.mrb[4].mxu0 %v2469_v13  ;;  %2705 = vmatpush3.bf16.msra.mxu1 %v2985_v14 }
  0x70   : > { %2801 = vmatpush3.bf16.msra.mxu0 %v2986_v8  ;;  %2812 = vmatprep.mubr.bf16.mxu0 %v3312_v43 }
  0x71   : > { %2802 = vmatprep.subr.bf16.mxu0 %v2988_v15  ;;  %2716 = vmatprep.mubr.bf16.mxu1 %v2454_v53  ;;  %v2996_v53 = vld [vmem:[%s3498_s2 + $0x1f8] sm:$0xff]  }
  0x72   : > { %2706 = vmatprep.subr.bf16.mxu1 %v2987_v3 }
  0x73   : > { %2707 = vmatpush3.bf16.msra.mxu1 %v2987_v3 }
  0x74   : > { %2803 = vmatpush3.bf16.msra.mxu0 %v2988_v15  ;;  %2708 = vmatprep.subr.bf16.mxu1 %v2989_v22 }
  0x75   : > { %2804 = vmatprep.subr.bf16.mxu0 %v2990_v19 }
  0x77   : > { %2709 = vmatpush3.bf16.msra.mxu1 %v2989_v22 }
  0x78   : > { %2805 = vmatpush3.bf16.msra.mxu0 %v2990_v19  ;;  %2710 = vmatprep.subr.bf16.mxu1 %v2991_v24 }
  0x79   : > { %2806 = vmatprep.subr.bf16.mxu0 %v2992_v23 }
  0x7b   : > { %2711 = vmatpush3.bf16.msra.mxu1 %v2991_v24 }
  0x7c   : > { %2807 = vmatpush3.bf16.msra.mxu0 %v2992_v23  ;;  %2712 = vmatprep.subr.bf16.mxu1 %v2993_v46 }
  0x7d   : > { %2808 = vmatprep.subr.bf16.mxu0 %v2994_v45 }
  0x7f   : > { %2713 = vmatpush3.bf16.msra.mxu1 %v2993_v46 }
  0x80   : > { %2809 = vmatpush3.bf16.msra.mxu0 %v2994_v45  ;;  %2714 = vmatprep.subr.bf16.mxu1 %v2995_v25 }
  0x81   : > { %2810 = vmatprep.subr.bf16.mxu0 %v2996_v53 }
  0x83   : > { %2715 = vmatpush3.bf16.msra.mxu1 %v2995_v25 }
  0x84   : > { %2811 = vmatpush3.bf16.msra.mxu0 %v2996_v53  ;;  %2844 = vmatprep.subr.bf16.mxu1 %v2997_v26 }
  0x85   : > { %2820 = vmatprep.subr.bf16.mxu0 %v2997_v26 }
  0x86   : > { %2717 = vmatmul.mubr.bf16.vlgmr.msra.gmra.mrb[0].mxu1 %v2455_v4  ;;  %v3003_v4 = vld [vmem:[%s3498_s2 + $0x230] sm:$0xff]  }
  0x87   : > { %2813 = vmatmul.mubr.bf16.vlgmr.msra.gmra.mrb[0].mxu0 %v3319_v47  ;;  %2852 = vmatpush3.bf16.msra.mxu1 %v2997_v26 }
  0x88   : > { %2821 = vmatpush3.bf16.msra.mxu0 %v2997_v26  ;;  %2816 = vmatprep.mubr.bf16.mxu0 %v3340_v52 }
  0x89   : > { %2822 = vmatprep.subr.bf16.mxu0 %v2998_v27  ;;  %2720 = vmatprep.mubr.bf16.mxu1 %v2456_v20 }
  0x8a   : > { %2845 = vmatprep.subr.bf16.mxu1 %v2998_v27 }
  0x8b   : > { %2853 = vmatpush3.bf16.msra.mxu1 %v2998_v27 }
  0x8c   : > { %2823 = vmatpush3.bf16.msra.mxu0 %v2998_v27  ;;  %2846 = vmatprep.subr.bf16.mxu1 %v2999_v29 }
  0x8d   : > { %2824 = vmatprep.subr.bf16.mxu0 %v2999_v29 }
  0x8e   : > { %2721 = vmatmul.mubr.bf16.gmra.mrb[4].mxu1 %v2457_v33 }
  0x8f   : > { %2817 = vmatmul.mubr.bf16.gmra.mrb[4].mxu0 %v2473_v30  ;;  %2854 = vmatpush3.bf16.msra.mxu1 %v2999_v29 }
  0x90   : > { %2825 = vmatpush3.bf16.msra.mxu0 %v2999_v29  ;;  %2836 = vmatprep.mubr.bf16.mxu0 %v3383_v7 }
  0x91   : > { %2826 = vmatprep.subr.bf16.mxu0 %v3000_v32  ;;  %2840 = vmatprep.mubr.bf16.mxu1 %v3411_v16 }
  0x92   : > { %2847 = vmatprep.subr.bf16.mxu1 %v3000_v32 }
  0x93   : > { %2855 = vmatpush3.bf16.msra.mxu1 %v3000_v32 }
  0x94   : > { %2827 = vmatpush3.bf16.msra.mxu0 %v3000_v32  ;;  %2848 = vmatprep.subr.bf16.mxu1 %v3001_v58 }
  0x95   : > { %2828 = vmatprep.subr.bf16.mxu0 %v3001_v58 }
  0x97   : > { %2856 = vmatpush3.bf16.msra.mxu1 %v3001_v58 }
  0x98   : > { %2829 = vmatpush3.bf16.msra.mxu0 %v3001_v58  ;;  %2849 = vmatprep.subr.bf16.mxu1 %v3002_v62 }
  0x99   : > { %2830 = vmatprep.subr.bf16.mxu0 %v3002_v62 }
  0x9b   : > { %2857 = vmatpush3.bf16.msra.mxu1 %v3002_v62 }
  0x9c   : > { %2831 = vmatpush3.bf16.msra.mxu0 %v3002_v62  ;;  %2850 = vmatprep.subr.bf16.mxu1 %v3003_v4 }
  0x9d   : > { %2832 = vmatprep.subr.bf16.mxu0 %v3003_v4 }
  0x9f   : > { %2858 = vmatpush3.bf16.msra.mxu1 %v3003_v4 }
  0xa0   : > { %2833 = vmatpush3.bf16.msra.mxu0 %v3003_v4  ;;  %2851 = vmatprep.subr.bf16.mxu1 %v3004_v9 }
  0xa1   : > { %2834 = vmatprep.subr.bf16.mxu0 %v3004_v9 }
  0xa3   : > { %2859 = vmatpush3.bf16.msra.mxu1 %v3004_v9 }
  0xa4   : > { %2835 = vmatpush3.bf16.msra.mxu0 %v3004_v9 }
  0xa6   : > { %2841 = vmatmul.mubr.bf16.vlgmr.msra.gmra.mrb[8].mxu1 %v2477_v18 }
  0xa7   : > { %2837 = vmatmul.mubr.bf16.vlgmr.msra.gmra.mrb[0].mxu0 %v3388_v10 }
 0x159   : > { %v2718_v20 = vpop.f32.mrb[0].mxu1 }
 0x15a   : > { %v1025_v21 = vpop.f32.mrb[1].mxu1 }
 0x15b   : > { %v2719_v34 = vpop.f32.mrb[2].mxu1 }
 0x15c   : > { %v1028_v35 = vpop.f32.mrb[3].mxu1 }
 0x161   : > { %v2722_v41 = vpop.f32.mrb[4].mxu1 }
 0x162   : > { %v2818_v38 = vpop.f32.mrb[4].mxu0  ;;  %v1041_v44 = vpop.f32.mrb[5].mxu1 }
 0x163   : > { %v1818_v39 = vpop.f32.mrb[5].mxu0  ;;  %v2864_v43 = vadd.f32 %v2818_v38, %v2722_v41  ;;  %v2723_v48 = vpop.f32.mrb[6].mxu1 }
 0x164   : > { %v2819_v40 = vpop.f32.mrb[6].mxu0  ;;  %v2866_v47 = vadd.f32 %v1818_v39, %v1041_v44  ;;  %v1044_v49 = vpop.f32.mrb[7].mxu1 }
 0x165   : > { %v1821_v42 = vpop.f32.mrb[7].mxu0  ;;  %v2868_v31 = vadd.f32 %v2819_v40, %v2723_v48 }
 0x166   : > { %v2870_v36 = vadd.f32 %v1821_v42, %v1044_v49 }
 0x179   : > { %v2842_v55 = vpop.f32.mrb[8].mxu1 }
 0x17a   : > { %v2838_v37 = vpop.f32.mrb[0].mxu0  ;;  %v2865_v60 = vadd.f32 %v2864_v43, %v2842_v55  ;;  %v2012_v59 = vpop.f32.mrb[9].mxu1 }
 0x17b   : > { %v2860_v50 = vadd.f32 %v2838_v37, %v2718_v20  ;;  %v1996_v51 = vpop.f32.mrb[1].mxu0  ;;  %v2867_v63 = vadd.f32 %v2866_v47, %v2012_v59  ;;  %v2843_v1 = vpop.f32.mrb[10].mxu1 }
 0x17c   : > { %v2861_v52 = vadd.f32 %v1996_v51, %v1025_v21  ;;  %v2839_v54 = vpop.f32.mrb[2].mxu0  ;;  %v2869_v2 = vadd.f32 %v2868_v31, %v2843_v1  ;;  %v2015_v7 = vpop.f32.mrb[11].mxu1  ;;  %v2086_v27 = vmul.f32 %v2865_v60, %v2865_v60 }
 0x17d   : > { %v2862_v56 = vadd.f32 %v2839_v54, %v2719_v34  ;;  %v1999_v57 = vpop.f32.mrb[3].mxu0  ;;  %v2871_v12 = vadd.f32 %v2870_v36, %v2015_v7  ;;  %v2082_v14 = vmul.f32 %v2860_v50, %v2860_v50  ;;  %v2084_v24 = vmul.f32 %v2867_v63, %v2867_v63 }
 0x17e   : > { %v2863_v61 = vadd.f32 %v1999_v57, %v1028_v35  ;;  %v2080_v10 = vmul.f32 %v2861_v52, %v2861_v52  ;;  %v2512_v8 = vpack.c.bf16 %v2869_v2, %v2865_v60  ;;  %v2087_v30 = vmul.f32 %v2869_v2, %v2869_v2 }
 0x17f   : > { %v2502_v0 = vpack.c.bf16 %v2862_v56, %v2860_v50  ;;  %v2507_v16 = vpack.c.bf16 %v2871_v12, %v2867_v63  ;;  %v2083_v19 = vmul.f32 %v2862_v56, %v2862_v56  ;;  %v2085_v53 = vmul.f32 %v2871_v12, %v2871_v12 }
 0x180   : > { %v2497_v5 = vpack.c.bf16 %v2863_v61, %v2861_v52  ;;  %v2067_v6 = vadd.f32 %v2863_v61, %v2861_v52  ;;  %v2081_v11 = vmul.f32 %v2863_v61, %v2863_v61  ;;  %2519 = vst [vmem:[%s204_s7 + $0x18] sm:$0xff] %v2512_v8  }
 0x181   : > { %2517 = vst [vmem:[%s204_s7 + $0x8] sm:$0xff] %v2502_v0   ;;  %2518 = vst [vmem:[%s204_s7 + $0x10] sm:$0xff] %v2507_v16  }
 0x182   : > { %2498 = vst [vmem:[%s204_s7] sm:$0xff] %v2497_v5   ;;  %v2068_v13 = vadd.f32 %v2860_v50, %v2067_v6  ;;  %v2088_v15 = vadd.f32 %v2081_v11, %v2080_v10 }
 0x184   : > { %v2069_v3 = vadd.f32 %v2862_v56, %v2068_v13  ;;  %v2089_v22 = vadd.f32 %v2088_v15, %v2082_v14 }
 0x186   : > { %v2070_v23 = vadd.f32 %v2867_v63, %v2069_v3  ;;  %v2090_v45 = vadd.f32 %v2089_v22, %v2083_v19 }
 0x188   : > { %v2071_v46 = vadd.f32 %v2871_v12, %v2070_v23  ;;  %v2091_v25 = vadd.f32 %v2090_v45, %v2084_v24 }
 0x18a   : > { %v2072_v26 = vadd.f32 %v2865_v60, %v2071_v46  ;;  %v2092_v28 = vadd.f32 %v2091_v25, %v2085_v53 }
 0x18c   : > { %v2073_v29 = vadd.f32 %v2869_v2, %v2072_v26  ;;  %v2093_v32 = vadd.f32 %v2092_v28, %v2086_v27 }
 0x18e   : > { %v2074_v33 = vrot.slane %v2073_v29, 4  ;;  %v2094_v58 = vadd.f32 %v2093_v32, %v2087_v30 }
 0x190   : > { %v2075_v62 = vadd.f32 %v2074_v33, %v2073_v29  ;;  %v2095_v4 = vrot.slane %v2094_v58, 4 }
 0x192   : > { %v2076_v9 = vrot.slane %v2075_v62, 2  ;;  %v2096_v17 = vadd.f32 %v2095_v4, %v2094_v58 }
 0x194   : > { %v2077_v18 = vadd.f32 %v2076_v9, %v2075_v62  ;;  %v2097_v20 = vrot.slane %v2096_v17, 2 }
 0x196   : > { %v2078_v21 = vrot.slane %v2077_v18, 1  ;;  %v2098_v34 = vadd.f32 %v2097_v20, %v2096_v17 }
 0x198   : > { %v2099_v35 = vrot.slane %v2098_v34, 1  ;;  %v2079_v38 = vadd.f32 %v2078_v21, %v2077_v18 }
 0x19a   : > { %v2100_v39 = vadd.f32 %v2099_v35, %v2098_v34 }
 0x19c   : > { %v2102_v40 = vsel %vm2101_vm0, %v2079_v38, %v2100_v39 }
 0x19d   : > { %2103 = vst [vmem:[%s208_s11] sm:$0x3] %v2102_v40 }
 0x19e PF: > { %s15_s15 = sadd.s32 1, %s3011_s15  }
 0x19f   : > { %p12_p4 = scmp.ge.s32.totalorder %s15_s15, 4  }
 0x1a1   :  { %14 = sbr.rel (!%p12_p4) target bundleno = 1 (0x1), region = 84 }

// kernel: residual_forward.3
= control target key start
LH: loop header
LB: loop body
LE: loop exit
PB: predicated region body
PF: predicated region fallthrough
CT: control target
= control target key end

     0   :  { %s3235_s12 = smov 0   ;;  %s3604_s0 = inlined_call_operand.vmem [shape: bf16[2,36,9,128], index: 0, kind: input, shape index: {}]   ;;  %s3605_s1 = inlined_call_operand.vmem [shape: bf16[9,128,128], index: 1, kind: input, shape index: {}]   ;;  %s3606_s2 = inlined_call_operand.vmem [shape: bf16[2,8,8,128], index: 2, kind: output, shape index: {0}]   ;;  %s3607_s3 = inlined_call_operand.vmem [shape: f32[2,2,128], index: 3, kind: output, shape index: {1}]  }
   0x1 LB: > { %s2355_s13 = sadd.s32 4294967295, %s3213_s12   ;;  %p2359_p0 = scmp.ge.s32.totalorder %s3213_s12, 1  ;;  %s3213_s12 = sphi %s3235_s12, %s14_s12  }
   0x2   : > { %p140_p1 = scmp.lt.s32.totalorder %s3213_s12, 3 }
   0x4   : > { %p141_p2 = pnand %p2359_p0, %p140_p1 }
   0x5   : > { %v3111_v0 = vld [vmem:[%s3605_s1] sm:$0xff] (!%p141_p2)   ;;  %p168_p3 = scmp.lt.s32.totalorder (!%p141_p2), %s2355_s13, 1  ;;  %v3113_v2 = vld [vmem:[%s3605_s1 + $0x8] sm:$0xff] (!%p141_p2)   ;;  %v3115_v4 = vld [vmem:[%s3605_s1 + $0x10] sm:$0xff] (!%p141_p2)   ;;  %vm587_vm0 = vsmask.f32 (!%p141_p2), 3328 }
   0x6   : > { %144 = sbr.rel (%p141_p2) target bundleno = 414 (0x19e), region = 28  ;;  %v3112_v1 = vld [vmem:[%s3605_s1 + $0x100] sm:$0xff] (!%p141_p2)   ;;  %2806 = vmatprep.subr.bf16.mxu1 (!%p141_p2), %v3111_v0  ;;  %v3114_v3 = vld [vmem:[%s3605_s1 + $0x108] sm:$0xff] (!%p141_p2)   ;;  %v3116_v5 = vld [vmem:[%s3605_s1 + $0x110] sm:$0xff] (!%p141_p2)   ;;  %vm588_vm1 = vsmask.f32 (!%p141_p2), 7440 }
   0x7   : > { %2902 = vmatprep.subr.bf16.mxu0 (!%p141_p2), %v3112_v1  ;;  %2807 = vmatpush3.bf16.msra.mxu1 (!%p141_p2), %v3111_v0  ;;  %v3117_v6 = vld [vmem:[%s3605_s1 + $0x18] sm:$0xff] (!%p141_p2)   ;;  %v3119_v8 = vld [vmem:[%s3605_s1 + $0x20] sm:$0xff] (!%p141_p2)   ;;  %v3121_v10 = vld [vmem:[%s3605_s1 + $0x28] sm:$0xff] (!%p141_p2)   ;;  %vm2266_vm3 = vcmask (!%p141_p2), 1040384  }
   0x8   : > { %2903 = vmatpush3.bf16.msra.mxu0 (!%p141_p2), %v3112_v1  ;;  %2808 = vmatprep.subr.bf16.mxu1 (!%p141_p2), %v3113_v2  ;;  %v3118_v7 = vld [vmem:[%s3605_s1 + $0x118] sm:$0xff] (!%p141_p2)   ;;  %v3120_v9 = vld [vmem:[%s3605_s1 + $0x120] sm:$0xff] (!%p141_p2)   ;;  %v3122_v12 = vld [vmem:[%s3605_s1 + $0x128] sm:$0xff] (!%p141_p2)  }
   0x9   : > { %2904 = vmatprep.subr.bf16.mxu0 (!%p141_p2), %v3114_v3  ;;  %v3123_v14 = vld [vmem:[%s3605_s1 + $0x30] sm:$0xff] (!%p141_p2)   ;;  %v3125_v16 = vld [vmem:[%s3605_s1 + $0x38] sm:$0xff] (!%p141_p2)   ;;  %v3128_v18 = vld [vmem:[%s3605_s1 + $0x40] sm:$0xff] (!%p141_p2)  }
   0xa   : > { %v3124_v15 = vld [vmem:[%s3605_s1 + $0x130] sm:$0xff] (!%p141_p2)   ;;  %v3126_v17 = vld [vmem:[%s3605_s1 + $0x138] sm:$0xff] (!%p141_p2)   ;;  %v3130_v19 = vld [vmem:[%s3605_s1 + $0x140] sm:$0xff] (!%p141_p2)  }
   0xb   : > { %2809 = vmatpush3.bf16.msra.mxu1 (!%p141_p2), %v3113_v2  ;;  %v3133_v22 = vld [vmem:[%s3605_s1 + $0x48] sm:$0xff] (!%p141_p2)   ;;  %v3135_v26 = vld [vmem:[%s3605_s1 + $0x50] sm:$0xff] (!%p141_p2)   ;;  %v3137_v28 = vld [vmem:[%s3605_s1 + $0x58] sm:$0xff] (!%p141_p2)  }
   0xc   : > { %2905 = vmatpush3.bf16.msra.mxu0 (!%p141_p2), %v3114_v3  ;;  %2810 = vmatprep.subr.bf16.mxu1 (!%p141_p2), %v3115_v4  ;;  %v3134_v23 = vld [vmem:[%s3605_s1 + $0x148] sm:$0xff] (!%p141_p2)   ;;  %v3136_v27 = vld [vmem:[%s3605_s1 + $0x150] sm:$0xff] (!%p141_p2)   ;;  %v3138_v31 = vld [vmem:[%s3605_s1 + $0x158] sm:$0xff] (!%p141_p2)  }
   0xd   : > { %s3611_s13 = smov (!%p168_p3, %s2355_s13), 1  ;;  %2906 = vmatprep.subr.bf16.mxu0 %v3116_v5  ;;  %v3139_v38 = vld [vmem:[%s3605_s1 + $0x60] sm:$0xff]   ;;  %v3141_v47 = vld [vmem:[%s3605_s1 + $0x68] sm:$0xff]   ;;  %vm3350_vm2 = vmor %vm587_vm0, %vm588_vm1 }
   0xe   : > { %s3102_s30 = smul.u32 288, %s3611_s13  ;;  %v3140_v43 = vld [vmem:[%s3605_s1 + $0x160] sm:$0xff]   ;;  %v3142_v50 = vld [vmem:[%s3605_s1 + $0x168] sm:$0xff]   ;;  %v3144_v2 = vld [vmem:[%s3605_s1 + $0x70] sm:$0xff]   ;;  %s2674_s16 = sshll.u32 %s3611_s13, 5 }
   0xf   : > { %2811 = vmatpush3.bf16.msra.mxu1 %v3115_v4  ;;  %s177_s19 = scalar_lea.vmem %s3606_s2, %s2674_s16  ;;  %s2363_s20 = sshll.u32 %s3611_s13, 1 }
  0x10   : > { %2907 = vmatpush3.bf16.msra.mxu0 %v3116_v5  ;;  %2812 = vmatprep.subr.bf16.mxu1 %v3117_v6  ;;  %s3279_s10 = scalar_lea.vmem %s3604_s0, %s3102_s30  ;;  %s181_s23 = scalar_lea.vmem %s3607_s3, %s2363_s20 }
  0x11   : > { %2908 = vmatprep.subr.bf16.mxu0 %v3118_v7  ;;  %v3127_v11 = vld [vmem:[%s3279_s10] ss:$8 sps:$4 sm:$0xff]   ;;  %v3131_v20 = vld [vmem:[%s3279_s10 + $0x10] ss:$8 sps:$4 sm:$0xff]   ;;  %v2513_v34 = vld [vmem:[%s3279_s10 + $0x94] sm:$0x1] }
  0x12   : > { %2822 = vmatprep.mubr.bf16.mxu1 %v3127_v11  ;;  %v3129_v13 = vld [vmem:[%s3279_s10 + $0xd8] ss:$8 sps:$4 sm:$0xff]   ;;  %v3132_v21 = vld [vmem:[%s3279_s10 + $0xe8] ss:$8 sps:$4 sm:$0xff]   ;;  %v2515_v39 = vld [vmem:[%s3279_s10 + $0x9c] sm:$0x1] }
  0x13   : > { %2813 = vmatpush3.bf16.msra.mxu1 %v3117_v6  ;;  %2918 = vmatprep.mubr.bf16.mxu0 %v3129_v13  ;;  %v3143_v24 = vld [vmem:[%s3279_s10 + $0x20] ss:$8 sps:$4 sm:$0xff]   ;;  %v3147_v29 = vld [vmem:[%s3279_s10 + $0x30] ss:$8 sps:$4 sm:$0xff]   ;;  %v1272_v40 = vshll.u32 %v2513_v34, 16  ;;  %v1286_v46 = vshll.u32 %v2515_v39, 16 }
  0x14   : > { %2909 = vmatpush3.bf16.msra.mxu0 %v3118_v7  ;;  %2814 = vmatprep.subr.bf16.mxu1 %v3119_v8  ;;  %v3145_v25 = vld [vmem:[%s3279_s10 + $0xf8] ss:$8 sps:$4 sm:$0xff]   ;;  %v3148_v30 = vld [vmem:[%s3279_s10 + $0x108] ss:$8 sps:$4 sm:$0xff]   ;;  %v2517_v57 = vld [vmem:[%s3279_s10 + $0xa4] sm:$0x1] }
  0x15   : > { %2910 = vmatprep.subr.bf16.mxu0 %v3120_v9  ;;  %v3151_v32 = vld [vmem:[%s3279_s10 + $0x48] ss:$8 sps:$4 sm:$0xff]   ;;  %v2514_v35 = vld [vmem:[%s3279_s10 + $0x98] sm:$0xf]  ;;  %v1274_v52 = vrot.slane %v1272_v40, 5  ;;  %v1288_v55 = vrot.slane %v1286_v46, 5 }
  0x16   : > { %v2512_v33 = vld [vmem:[%s3279_s10 + $0x90] sm:$0xf]  ;;  %v1277_v41 = vshrl.u32 %v2514_v35, 16  ;;  %v1280_v42 = vshll.u32 %v2514_v35, 16  ;;  %v2516_v56 = vld [vmem:[%s3279_s10 + $0xa0] sm:$0xf] }
  0x17   : > { %2815 = vmatpush3.bf16.msra.mxu1 %v3119_v8  ;;  %v1263_v36 = vshrl.u32 %v2512_v33, 16  ;;  %v1266_v37 = vshll.u32 %v2512_v33, 16  ;;  %v2518_v59 = vld [vmem:[%s3279_s10 + $0xa8] sm:$0xf]  ;;  %v2519_v60 = vld [vmem:[%s3279_s10 + $0xac] sm:$0x1] }
  0x18   : > { %2911 = vmatpush3.bf16.msra.mxu0 %v3120_v9  ;;  %2816 = vmatprep.subr.bf16.mxu1 %v3121_v10  ;;  %v1279_v48 = vrot.slane %v1277_v41, 4  ;;  %v1282_v49 = vrot.slane %v1280_v42, 5  ;;  %v1291_v61 = vshrl.u32 %v2516_v56, 16  ;;  %v1294_v63 = vshll.u32 %v2516_v56, 16  ;;  %v3146_v6 = vld [vmem:[%s3605_s1 + $0x170] sm:$0xff]  }
  0x19   : > { %2912 = vmatprep.subr.bf16.mxu0 %v3122_v12  ;;  %v1265_v44 = vrot.slane %v1263_v36, 4  ;;  %v1268_v45 = vrot.slane %v1266_v37, 5  ;;  %v1300_v0 = vshll.u32 %v2517_v57, 16  ;;  %v1305_v1 = vshrl.u32 %v2518_v59, 16  ;;  %v3165_v37 = vld [vmem:[%s3279_s10 + $0x68] ss:$8 sps:$4 sm:$0xff]  }
  0x1a   : > { %v1283_v54 = vor.u32 %v1282_v49, %v1279_v48  ;;  %v1293_v4 = vrot.slane %v1291_v61, 4  ;;  %v1308_v5 = vshll.u32 %v2518_v59, 16  ;;  %v1296_v8 = vrot.slane %v1294_v63, 5  ;;  %v3168_v48 = vld [vmem:[%s3279_s10 + $0x78] ss:$8 sps:$4 sm:$0xff]  }
  0x1b   : > { %2817 = vmatpush3.bf16.msra.mxu1 %v3121_v10  ;;  %v1269_v51 = vor.u32 %v1268_v45, %v1265_v44  ;;  %v1307_v9 = vrot.slane %v1305_v1, 4  ;;  %v1314_v10 = vshll.u32 %v2519_v60, 16  ;;  %v2524_v49 = vld [vmem:[%s3279_s10 + $0xc0] sm:$0xf]  ;;  %v3159_v59 = vld [vmem:[%s3605_s1 + $0x98] sm:$0xff]  }
  0x1c   : > { %2913 = vmatpush3.bf16.msra.mxu0 %v3122_v12  ;;  %2818 = vmatprep.subr.bf16.mxu1 %v3123_v14  ;;  %v1284_v62 = vrot.slane %v1283_v54, 4  ;;  %v1302_v12 = vrot.slane %v1300_v0, 5  ;;  %v1310_v13 = vrot.slane %v1308_v5, 5  ;;  %v1347_v56 = vshrl.u32 %v2524_v49, 16 }
  0x1d   : > { %2914 = vmatprep.subr.bf16.mxu0 %v3124_v15  ;;  %v1270_v58 = vrot.slane %v1269_v51, 4  ;;  %v2526_v51 = vld [vmem:[%s3279_s10 + $0xc8] sm:$0xf]  ;;  %v1350_v57 = vshll.u32 %v2524_v49, 16 }
  0x1e   : > { %v1289_v7 = vsel %vm3350_vm2, %v1284_v62, %v1288_v55  ;;  %v2527_v55 = vld [vmem:[%s3279_s10 + $0xcc] sm:$0x1]  ;;  %v1361_v61 = vshrl.u32 %v2526_v51, 16  ;;  %v1364_v62 = vshll.u32 %v2526_v51, 16  ;;  %v1349_v1 = vrot.slane %v1347_v56, 4 }
  0x1f   : > { %2819 = vmatpush3.bf16.msra.mxu1 %v3123_v14  ;;  %v1275_v3 = vsel %vm3350_vm2, %v1270_v58, %v1274_v52  ;;  %v3149_v14 = vld [vmem:[%s3605_s1 + $0x78] sm:$0xff]   ;;  %v3158_v52 = vld [vmem:[%s3605_s1 + $0x190] sm:$0xff]   ;;  %v1370_v63 = vshll.u32 %v2527_v55, 16 }
  0x20   : > { %2915 = vmatpush3.bf16.msra.mxu0 %v3124_v15  ;;  %2820 = vmatprep.subr.bf16.mxu1 %v3125_v16  ;;  %v2544_v11 = vcombine.low %v1275_v3, %v1289_v7  ;;  %v1297_v15 = vor.u32 %v1296_v8, %v1293_v4  ;;  %v3160_v4 = vld [vmem:[%s3605_s1 + $0x198] sm:$0xff]   ;;  %v1366_v7 = vrot.slane %v1364_v62, 5 }
  0x21   : > { %2916 = vmatprep.subr.bf16.mxu0 %v3126_v17  ;;  %v1372_v8 = vrot.slane %v1370_v63, 5 }
  0x23   : > { %2821 = vmatpush3.bf16.msra.mxu1 %v3125_v16  ;;  %v1311_v16 = vor.u32 %v1310_v13, %v1307_v9  ;;  %v3161_v13 = vld [vmem:[%s3605_s1 + $0xa0] sm:$0xff]  }
  0x24   : > { %2917 = vmatpush3.bf16.msra.mxu0 %v3126_v17  ;;  %2830 = vmatprep.subr.bf16.mxu1 %v3128_v18  ;;  %v1298_v17 = vrot.slane %v1297_v15, 4 }
  0x25   : > { %2926 = vmatprep.subr.bf16.mxu0 %v3130_v19 }
  0x26   : > { %2823 = vmatmul.mubr.bf16.vlgmr.msra.gmra.mrb[0].mxu1 %v3131_v20  ;;  %v1312_v20 = vrot.slane %v1311_v16, 4  ;;  %v565_v16 = vld [vmem:[%s3279_s10 + $0x8] sm:$0xf] }
  0x27   : > { %2831 = vmatpush3.bf16.msra.mxu1 %v3128_v18  ;;  %2919 = vmatmul.mubr.bf16.vlgmr.msra.gmra.mrb[0].mxu0 %v3132_v21  ;;  %v1316_v18 = vrot.slane %v1314_v10, 5  ;;  %v3152_v21 = vld [vmem:[%s3605_s1 + $0x80] sm:$0xff]  }
  0x28   : > { %2927 = vmatpush3.bf16.msra.mxu0 %v3130_v19  ;;  %2832 = vmatprep.subr.bf16.mxu1 %v3133_v22  ;;  %v3150_v19 = vld [vmem:[%s3605_s1 + $0x178] sm:$0xff]  }
  0x29   : > { %2928 = vmatprep.subr.bf16.mxu0 %v3134_v23  ;;  %2826 = vmatprep.mubr.bf16.mxu1 %v3143_v24  ;;  %v3153_v24 = vld [vmem:[%s3605_s1 + $0x180] sm:$0xff]  }
  0x2a   : > { %2922 = vmatprep.mubr.bf16.mxu0 %v3145_v25  ;;  %v3154_v25 = vld [vmem:[%s3279_s10 + $0x58] ss:$8 sps:$4 sm:$0xff]  }
  0x2b   : > { %2833 = vmatpush3.bf16.msra.mxu1 %v3133_v22  ;;  %v1303_v22 = vsel %vm3350_vm2, %v1298_v17, %v1302_v12  ;;  %v564_v12 = vld [vmem:[%s3279_s10 + $0x4] sm:$0x1]  ;;  %v566_v17 = vld [vmem:[%s3279_s10 + $0xc] sm:$0x1] }
  0x2c   : > { %2929 = vmatpush3.bf16.msra.mxu0 %v3134_v23  ;;  %2834 = vmatprep.subr.bf16.mxu1 %v3135_v26  ;;  %v1317_v23 = vsel %vm3350_vm2, %v1312_v20, %v1316_v18 }
  0x2d   : > { %2930 = vmatprep.subr.bf16.mxu0 %v3136_v27 }
  0x2e   : > { %2827 = vmatmul.mubr.bf16.gmra.mrb[4].mxu1 %v3147_v29  ;;  %v3156_v29 = vld [vmem:[%s3605_s1 + $0x188] sm:$0xff]  }
  0x2f   : > { %2835 = vmatpush3.bf16.msra.mxu1 %v3135_v26  ;;  %2923 = vmatmul.mubr.bf16.gmra.mrb[4].mxu0 %v3148_v30  ;;  %v3155_v26 = vld [vmem:[%s3605_s1 + $0x88] sm:$0xff]   ;;  %v2521_v30 = vld [vmem:[%s3279_s10 + $0xb4] sm:$0x1] }
  0x30   : > { %2931 = vmatpush3.bf16.msra.mxu0 %v3136_v27  ;;  %2836 = vmatprep.subr.bf16.mxu1 %v3137_v28  ;;  %v2520_v27 = vld [vmem:[%s3279_s10 + $0xb0] sm:$0xf]  ;;  %v1328_v35 = vshll.u32 %v2521_v30, 16 }
  0x31   : > { %2932 = vmatprep.subr.bf16.mxu0 %v3138_v31  ;;  %2846 = vmatprep.mubr.bf16.mxu1 %v3151_v32  ;;  %v2523_v32 = vld [vmem:[%s3279_s10 + $0xbc] sm:$0x1]  ;;  %v1319_v33 = vshrl.u32 %v2520_v27, 16  ;;  %v1322_v34 = vshll.u32 %v2520_v27, 16  ;;  %v614_v27 = vshll.u32 %v566_v17, 16 }
  0x32   : > { %2942 = vmatprep.mubr.bf16.mxu0 %v2544_v11  ;;  %v1342_v39 = vshll.u32 %v2523_v32, 16  ;;  %v1330_v44 = vrot.slane %v1328_v35, 5  ;;  %v563_v11 = vld [vmem:[%s3279_s10] sm:$0xf]  ;;  %v3163_v32 = vld [vmem:[%s3605_s1 + $0xa8] sm:$0xff]  }
  0x33   : > { %2837 = vmatpush3.bf16.msra.mxu1 %v3137_v28  ;;  %v2545_v28 = vcombine.low %v1303_v22, %v1317_v23  ;;  %v1321_v40 = vrot.slane %v1319_v33, 4  ;;  %v1324_v41 = vrot.slane %v1322_v34, 5  ;;  %v591_v18 = vshrl.u32 %v563_v11, 16  ;;  %v574_v17 = vld [vmem:[%s3279_s10 + $0x2c] sm:$0x1] }
  0x34   : > { %2933 = vmatpush3.bf16.msra.mxu0 %v3138_v31  ;;  %2838 = vmatprep.subr.bf16.mxu1 %v3139_v38  ;;  %v2522_v31 = vld [vmem:[%s3279_s10 + $0xb8] sm:$0xf]  ;;  %v1344_v46 = vrot.slane %v1342_v39, 5  ;;  %v605_v22 = vshrl.u32 %v565_v16, 16  ;;  %v608_v23 = vshll.u32 %v565_v16, 16 }
  0x35   : > { %2934 = vmatprep.subr.bf16.mxu0 %v3140_v43  ;;  %v1333_v36 = vshrl.u32 %v2522_v31, 16  ;;  %v573_v16 = vld [vmem:[%s3279_s10 + $0x28] sm:$0xf] }
  0x36   : > { %v607_v30 = vrot.slane %v605_v22, 4  ;;  %v661_v22 = vshrl.u32 %v573_v16, 16 }
  0x37   : > { %2839 = vmatpush3.bf16.msra.mxu1 %v3139_v38  ;;  %v1336_v38 = vshll.u32 %v2522_v31, 16  ;;  %v1335_v42 = vrot.slane %v1333_v36, 4  ;;  %v610_v31 = vrot.slane %v608_v23, 5  ;;  %v616_v36 = vrot.slane %v614_v27, 5 }
  0x38   : > { %2935 = vmatpush3.bf16.msra.mxu0 %v3140_v43  ;;  %2840 = vmatprep.subr.bf16.mxu1 %v3141_v47  ;;  %v3157_v43 = vld [vmem:[%s3605_s1 + $0x90] sm:$0xff]   ;;  %v664_v23 = vshll.u32 %v573_v16, 16  ;;  %v2629_v16 = vld [vmem:[%s3279_s10 + $0xc] sm:$0x1] }
  0x39   : > { %2936 = vmatprep.subr.bf16.mxu0 %v3142_v50  ;;  %v1338_v45 = vrot.slane %v1336_v38, 5  ;;  %v3164_v38 = vld [vmem:[%s3605_s1 + $0x1a8] sm:$0xff]  }
  0x3b   : > { %2841 = vmatpush3.bf16.msra.mxu1 %v3141_v47  ;;  %v1325_v47 = vor.u32 %v1324_v41, %v1321_v40  ;;  %v1339_v54 = vor.u32 %v1338_v45, %v1335_v42  ;;  %v611_v40 = vor.u32 %v610_v31, %v607_v30  ;;  %v567_v41 = vld [vmem:[%s3279_s10 + $0x10] sm:$0xf]  ;;  %v666_v31 = vrot.slane %v664_v23, 5 }
  0x3c   : > { %2937 = vmatpush3.bf16.msra.mxu0 %v3142_v50  ;;  %2842 = vmatprep.subr.bf16.mxu1 %v3144_v2  ;;  %v2525_v50 = vld [vmem:[%s3279_s10 + $0xc4] sm:$0x1]  ;;  %v619_v45 = vshrl.u32 %v567_v41, 16  ;;  %v575_v30 = vld [vmem:[%s3279_s10 + $0x30] sm:$0xf] }
  0x3d   : > { %2938 = vmatprep.subr.bf16.mxu0 %v3146_v6  ;;  %v1356_v58 = vshll.u32 %v2525_v50, 16  ;;  %v1326_v60 = vrot.slane %v1325_v47, 4  ;;  %v1340_v0 = vrot.slane %v1339_v54, 4  ;;  %v570_v47 = vld [vmem:[%s3279_s10 + $0x1c] sm:$0x1] }
  0x3f   : > { %2843 = vmatpush3.bf16.msra.mxu1 %v3144_v2  ;;  %v1352_v2 = vrot.slane %v1350_v57, 5  ;;  %v1358_v3 = vrot.slane %v1356_v58, 5  ;;  %v1331_v5 = vsel %vm3350_vm2, %v1326_v60, %v1330_v44  ;;  %v1345_v9 = vsel %vm3350_vm2, %v1340_v0, %v1344_v46  ;;  %v569_v44 = vld [vmem:[%s3279_s10 + $0x18] sm:$0xf]  ;;  %v3167_v60 = vld [vmem:[%s3605_s1 + $0x1b0] sm:$0xff]  }
  0x40   : > { %2939 = vmatpush3.bf16.msra.mxu0 %v3146_v6  ;;  %2844 = vmatprep.subr.bf16.mxu1 %v3149_v14  ;;  %v1363_v6 = vrot.slane %v1361_v61, 4  ;;  %v612_v46 = vrot.slane %v611_v40, 4  ;;  %v633_v50 = vshrl.u32 %v569_v44, 16  ;;  %v636_v54 = vshll.u32 %v569_v44, 16 }
  0x41   : > { %2940 = vmatprep.subr.bf16.mxu0 %v3150_v19  ;;  %v1353_v10 = vor.u32 %v1352_v2, %v1349_v1  ;;  %v642_v58 = vshll.u32 %v570_v47, 16 }
  0x42   : > { %v1367_v15 = vor.u32 %v1366_v7, %v1363_v6  ;;  %v617_v55 = vsel %vm3350_vm2, %v612_v46, %v616_v36  ;;  %v635_v57 = vrot.slane %v633_v50, 4  ;;  %v638_v63 = vrot.slane %v636_v54, 5  ;;  %v3170_v6 = vld [vmem:[%s3605_s1 + $0x1b8] sm:$0xff]   ;;  %v3171_v7 = vld [vmem:[%s3605_s1 + $0xc0] sm:$0xff]  }
  0x43   : > { %2845 = vmatpush3.bf16.msra.mxu1 %v3149_v14  ;;  %v2546_v14 = vcombine.low %v1331_v5, %v1345_v9  ;;  %v1354_v20 = vrot.slane %v1353_v10, 4  ;;  %v3173_v10 = vld [vmem:[%s3605_s1 + $0x1c0] sm:$0xff]   ;;  %v3179_v50 = vld [vmem:[%s3605_s1 + $0xd8] sm:$0xff]  }
  0x44   : > { %2941 = vmatpush3.bf16.msra.mxu0 %v3150_v19  ;;  %2854 = vmatprep.subr.bf16.mxu1 %v3152_v21  ;;  %v594_v19 = vshll.u32 %v563_v11, 16  ;;  %v639_v1 = vor.u32 %v638_v63, %v635_v57  ;;  %v3174_v11 = vld [vmem:[%s3279_s10 + $0x18] ss:$8 sps:$4 sm:$0xff]  }
  0x45   : > { %2950 = vmatprep.subr.bf16.mxu0 %v3153_v24 }
  0x46   : > { %2847 = vmatmul.mubr.bf16.vlgmr.msra.gmra.mrb[0].mxu1 %v3154_v25  ;;  %v593_v25 = vrot.slane %v591_v18, 4  ;;  %v640_v5 = vrot.slane %v639_v1, 4  ;;  %v3176_v18 = vld [vmem:[%s3605_s1 + $0x1c8] sm:$0xff]   ;;  %v3181_v1 = vld [vmem:[%s3605_s1 + $0xe0] sm:$0xff]  }
  0x47   : > { %2855 = vmatpush3.bf16.msra.mxu1 %v3152_v21  ;;  %2943 = vmatmul.mubr.bf16.vlgmr.msra.gmra.mrb[0].mxu0 %v2545_v28  ;;  %v600_v21 = vshll.u32 %v564_v12, 16  ;;  %v3162_v28 = vld [vmem:[%s3605_s1 + $0x1a0] sm:$0xff]  }
  0x48   : > { %2951 = vmatpush3.bf16.msra.mxu0 %v3153_v24  ;;  %2856 = vmatprep.subr.bf16.mxu1 %v3155_v26  ;;  %v1368_v24 = vrot.slane %v1367_v15, 4  ;;  %v571_v12 = vld [vmem:[%s3279_s10 + $0x20] sm:$0xf]  ;;  %v572_v15 = vld [vmem:[%s3279_s10 + $0x24] sm:$0x1] }
  0x49   : > { %2952 = vmatprep.subr.bf16.mxu0 %v3156_v29  ;;  %2850 = vmatprep.mubr.bf16.mxu1 %v3165_v37  ;;  %v602_v35 = vrot.slane %v600_v21, 5  ;;  %v3172_v37 = vld [vmem:[%s3279_s10 + $0x8] ss:$8 sps:$4 sm:$0xff]   ;;  %v656_v21 = vshll.u32 %v572_v15, 16 }
  0x4a   : > { %2946 = vmatprep.mubr.bf16.mxu0 %v2546_v14  ;;  %v1373_v33 = vsel %vm3350_vm2, %v1368_v24, %v1372_v8  ;;  %v3175_v14 = vld [vmem:[%s3605_s1 + $0xc8] sm:$0xff]   ;;  %v670_v24 = vshll.u32 %v574_v17, 16  ;;  %v2630_v17 = vld [vmem:[%s3279_s10 + $0x10] sm:$0xf] }
  0x4b   : > { %2857 = vmatpush3.bf16.msra.mxu1 %v3155_v26  ;;  %v596_v26 = vrot.slane %v594_v19, 5  ;;  %v647_v19 = vshrl.u32 %v571_v12, 16  ;;  %v2628_v15 = vld [vmem:[%s3279_s10 + $0x8] sm:$0xf]  ;;  %v1952_v23 = vshll.u32 %v2630_v17, 16 }
  0x4c   : > { %2953 = vmatpush3.bf16.msra.mxu0 %v3156_v29  ;;  %2858 = vmatprep.subr.bf16.mxu1 %v3157_v43  ;;  %v1359_v29 = vsel %vm3350_vm2, %v1354_v20, %v1358_v3  ;;  %v644_v3 = vrot.slane %v642_v58, 5  ;;  %v650_v20 = vshll.u32 %v571_v12, 16  ;;  %v3187_v58 = vld [vmem:[%s3279_s10 + $0x38] ss:$8 sps:$4 sm:$0xff]  }
  0x4d   : > { %2954 = vmatprep.subr.bf16.mxu0 %v3158_v52  ;;  %v597_v34 = vor.u32 %v596_v26, %v593_v25  ;;  %v2547_v39 = vcombine.low %v1359_v29, %v1373_v33  ;;  %v3185_v25 = vld [vmem:[%s3279_s10 + $0x28] ss:$8 sps:$4 sm:$0xff]   ;;  %v649_v26 = vrot.slane %v647_v19, 4  ;;  %v663_v29 = vrot.slane %v661_v22, 4  ;;  %v576_v33 = vld [vmem:[%s3279_s10 + $0x34] sm:$0x1] }
  0x4e   : > { %2851 = vmatmul.mubr.bf16.gmra.mrb[4].mxu1 %v3168_v48  ;;  %v622_v48 = vshll.u32 %v567_v41, 16  ;;  %v645_v9 = vsel %vm3350_vm2, %v640_v5, %v644_v3  ;;  %v652_v27 = vrot.slane %v650_v20, 5  ;;  %v684_v40 = vshll.u32 %v576_v33, 16  ;;  %v3178_v41 = vld [vmem:[%s3605_s1 + $0x1d0] sm:$0xff]   ;;  %v3182_v5 = vld [vmem:[%s3605_s1 + $0x1e0] sm:$0xff]   ;;  %v3189_v12 = vld [vmem:[%s3605_s1 + $0xf8] sm:$0xff]  }
  0x4f   : > { %2859 = vmatpush3.bf16.msra.mxu1 %v3157_v43  ;;  %v598_v42 = vrot.slane %v597_v34, 4  ;;  %v568_v43 = vld [vmem:[%s3279_s10 + $0x14] sm:$0x1]  ;;  %2947 = vmatmul.mubr.bf16.gmra.mrb[4].mxu0 %v2547_v39  ;;  %v577_v34 = vld [vmem:[%s3279_s10 + $0x38] sm:$0xf]  ;;  %v678_v39 = vshll.u32 %v575_v30, 16 }
  0x50   : > { %2955 = vmatpush3.bf16.msra.mxu0 %v3158_v52  ;;  %2860 = vmatprep.subr.bf16.mxu1 %v3159_v59  ;;  %v628_v49 = vshll.u32 %v568_v43, 16  ;;  %v621_v52 = vrot.slane %v619_v45, 4  ;;  %v624_v56 = vrot.slane %v622_v48, 5  ;;  %v653_v36 = vor.u32 %v652_v27, %v649_v26  ;;  %v2639_v33 = vld [vmem:[%s3279_s10 + $0x34] sm:$0x1] }
  0x51   : > { %2956 = vmatprep.subr.bf16.mxu0 %v3160_v4  ;;  %v603_v51 = vsel %vm3350_vm2, %v598_v42, %v602_v35  ;;  %2966 = vmatprep.mubr.bf16.mxu0 %v3172_v37  ;;  %v3177_v35 = vld [vmem:[%s3605_s1 + $0xd0] sm:$0xff]   ;;  %v578_v37 = vld [vmem:[%s3279_s10 + $0x3c] sm:$0x1]  ;;  %v667_v42 = vor.u32 %v666_v31, %v663_v29  ;;  %v689_v43 = vshrl.u32 %v577_v34, 16  ;;  %v692_v44 = vshll.u32 %v577_v34, 16 }
  0x52   : > { %v2428_v61 = vcombine.low %v603_v51, %v617_v55  ;;  %v630_v62 = vrot.slane %v628_v49, 5  ;;  %v625_v0 = vor.u32 %v624_v56, %v621_v52  ;;  %v698_v45 = vshll.u32 %v578_v37, 16  ;;  %v2638_v29 = vld [vmem:[%s3279_s10 + $0x30] sm:$0xf]  ;;  %v3194_v34 = vld [vmem:[%s3279_s10 + $0x60] ss:$8 sps:$4 sm:$0xff]  }
  0x53   : > { %2861 = vmatpush3.bf16.msra.mxu1 %v3159_v59  ;;  %v3166_v59 = vld [vmem:[%s3605_s1 + $0xb0] sm:$0xff]   ;;  %v654_v46 = vrot.slane %v653_v36, 4  ;;  %v680_v48 = vrot.slane %v678_v39, 5  ;;  %v686_v49 = vrot.slane %v684_v40, 5  ;;  %v668_v51 = vrot.slane %v667_v42, 4  ;;  %v3196_v39 = vld [vmem:[%s3605_s1 + $0x208] sm:$0xff]  }
  0x54   : > { %2957 = vmatpush3.bf16.msra.mxu0 %v3160_v4  ;;  %2862 = vmatprep.subr.bf16.mxu1 %v3161_v13  ;;  %v626_v2 = vrot.slane %v625_v0, 4  ;;  %v3169_v4 = vld [vmem:[%s3605_s1 + $0xb8] sm:$0xff]   ;;  %v691_v52 = vrot.slane %v689_v43, 4  ;;  %v694_v54 = vrot.slane %v692_v44, 5  ;;  %v700_v55 = vrot.slane %v698_v45, 5 }
  0x55   : > { %2958 = vmatprep.subr.bf16.mxu0 %v3162_v28  ;;  %2870 = vmatprep.mubr.bf16.mxu1 %v2428_v61  ;;  %v3180_v61 = vld [vmem:[%s3605_s1 + $0x1d8] sm:$0xff]   ;;  %v1935_v19 = vshrl.u32 %v2628_v15, 16  ;;  %v1938_v20 = vshll.u32 %v2628_v15, 16  ;;  %v1949_v22 = vshrl.u32 %v2630_v17, 16  ;;  %v2008_v42 = vshll.u32 %v2638_v29, 16  ;;  %v3203_v15 = vld [vmem:[%s3605_s1 + $0x220] sm:$0xff]  }
  0x56   : > { %v631_v8 = vsel %vm3350_vm2, %v626_v2, %v630_v62  ;;  %v2014_v43 = vshll.u32 %v2639_v33, 16  ;;  %v3197_v44 = vld [vmem:[%s3279_s10 + $0xb0] ss:$8 sps:$4 sm:$0xff]  }
  0x57   : > { %2863 = vmatpush3.bf16.msra.mxu1 %v3161_v13  ;;  %v2429_v13 = vcombine.low %v631_v8, %v645_v9  ;;  %v3183_v8 = vld [vmem:[%s3605_s1 + $0xe8] sm:$0xff]   ;;  %v1937_v26 = vrot.slane %v1935_v19, 4  ;;  %v1940_v27 = vrot.slane %v1938_v20, 5  ;;  %v1951_v31 = vrot.slane %v1949_v22, 4 }
  0x58   : > { %2959 = vmatpush3.bf16.msra.mxu0 %v3162_v28  ;;  %2864 = vmatprep.subr.bf16.mxu1 %v3163_v32  ;;  %v658_v28 = vrot.slane %v656_v21, 5  ;;  %v3184_v9 = vld [vmem:[%s3605_s1 + $0x1e8] sm:$0xff]   ;;  %v1944_v21 = vshll.u32 %v2629_v16, 16 }
  0x59   : > { %2960 = vmatprep.subr.bf16.mxu0 %v3164_v38  ;;  %v3204_v20 = vld [vmem:[%s3605_s1 + $0x228] sm:$0xff]  }
  0x5a   : > { %v659_v56 = vsel %vm3350_vm2, %v654_v46, %v658_v28  ;;  %v2637_v28 = vld [vmem:[%s3279_s10 + $0x2c] sm:$0x1]  ;;  %v1946_v45 = vrot.slane %v1944_v21, 5  ;;  %v2641_v21 = vld [vmem:[%s3279_s10 + $0x3c] sm:$0x1] }
  0x5b   : > { %2865 = vmatpush3.bf16.msra.mxu1 %v3163_v32  ;;  %v672_v32 = vrot.slane %v670_v24, 5 }
  0x5c   : > { %2961 = vmatpush3.bf16.msra.mxu0 %v3164_v38  ;;  %2866 = vmatprep.subr.bf16.mxu1 %v3166_v59  ;;  %v675_v38 = vshrl.u32 %v575_v30, 16  ;;  %v3193_v30 = vld [vmem:[%s3279_s10 + $0xa0] ss:$8 sps:$4 sm:$0xff]  }
  0x5d   : > { %2962 = vmatprep.subr.bf16.mxu0 %v3167_v60 }
  0x5e   : > { %v677_v47 = vrot.slane %v675_v38, 4  ;;  %v2000_v38 = vshll.u32 %v2637_v28, 16 }
  0x5f   : > { %2867 = vmatpush3.bf16.msra.mxu1 %v3166_v59  ;;  %v673_v59 = vsel %vm3350_vm2, %v668_v51, %v672_v32  ;;  %v1954_v32 = vrot.slane %v1952_v23, 5 }
  0x60   : > { %2963 = vmatpush3.bf16.msra.mxu0 %v3167_v60  ;;  %2868 = vmatprep.subr.bf16.mxu1 %v3169_v4  ;;  %v681_v57 = vor.u32 %v680_v48, %v677_v47  ;;  %v695_v60 = vor.u32 %v694_v54, %v691_v52  ;;  %v2430_v62 = vcombine.low %v659_v56, %v673_v59  ;;  %v2010_v54 = vrot.slane %v2008_v42, 5 }
  0x61   : > { %2964 = vmatprep.subr.bf16.mxu0 %v3170_v6  ;;  %v1955_v40 = vor.u32 %v1954_v32, %v1951_v31  ;;  %v2002_v56 = vrot.slane %v2000_v38, 5  ;;  %v2016_v59 = vrot.slane %v2014_v43, 5  ;;  %v2633_v31 = vld [vmem:[%s3279_s10 + $0x1c] sm:$0x1]  ;;  %v2635_v32 = vld [vmem:[%s3279_s10 + $0x24] sm:$0x1] }
  0x62   : > { %v682_v63 = vrot.slane %v681_v57, 4  ;;  %v696_v0 = vrot.slane %v695_v60, 4  ;;  %v3201_v57 = vld [vmem:[%s3605_s1 + $0x210] sm:$0xff]  }
  0x63   : > { %2869 = vmatpush3.bf16.msra.mxu1 %v3169_v4  ;;  %v3192_v4 = vld [vmem:[%s3279_s10 + $0x50] ss:$8 sps:$4 sm:$0xff]   ;;  %v1956_v51 = vrot.slane %v1955_v40, 4 }
  0x64   : > { %2965 = vmatpush3.bf16.msra.mxu0 %v3170_v6  ;;  %2878 = vmatprep.subr.bf16.mxu1 %v3171_v7  ;;  %v687_v2 = vsel %vm3350_vm2, %v682_v63, %v686_v49  ;;  %v701_v3 = vsel %vm3350_vm2, %v696_v0, %v700_v55  ;;  %v3198_v49 = vld [vmem:[%s3279_s10 + $0x70] ss:$8 sps:$4 sm:$0xff]  }
  0x65   : > { %2974 = vmatprep.subr.bf16.mxu0 %v3173_v10  ;;  %v2431_v6 = vcombine.low %v687_v2, %v701_v3  ;;  %v3202_v3 = vld [vmem:[%s3605_s1 + $0x218] sm:$0xff]  }
  0x66   : > { %2871 = vmatmul.mubr.bf16.vlgmr.msra.gmra.mrb[0].mxu1 %v2429_v13  ;;  %v3190_v13 = vld [vmem:[%s3605_s1 + $0x1f8] sm:$0xff]  }
  0x67   : > { %2879 = vmatpush3.bf16.msra.mxu1 %v3171_v7  ;;  %2967 = vmatmul.mubr.bf16.vlgmr.msra.gmra.mrb[0].mxu0 %v3174_v11  ;;  %v3191_v7 = vld [vmem:[%s3279_s10 + $0x90] ss:$8 sps:$4 sm:$0xff]  }
  0x68   : > { %2975 = vmatpush3.bf16.msra.mxu0 %v3173_v10  ;;  %2880 = vmatprep.subr.bf16.mxu1 %v3175_v14  ;;  %v3186_v10 = vld [vmem:[%s3605_s1 + $0xf0] sm:$0xff]  }
  0x69   : > { %2976 = vmatprep.subr.bf16.mxu0 %v3176_v18  ;;  %2970 = vmatprep.mubr.bf16.mxu0 %v3185_v25  ;;  %v3188_v11 = vld [vmem:[%s3605_s1 + $0x1f0] sm:$0xff]   ;;  %v2636_v25 = vld [vmem:[%s3279_s10 + $0x28] sm:$0xf] }
  0x6a   : > { %2874 = vmatprep.mubr.bf16.mxu1 %v2430_v62  ;;  %v1991_v36 = vshrl.u32 %v2636_v25, 16  ;;  %v1994_v37 = vshll.u32 %v2636_v25, 16 }
  0x6b   : > { %2881 = vmatpush3.bf16.msra.mxu1 %v3175_v14  ;;  %v3195_v14 = vld [vmem:[%s3605_s1 + $0x200] sm:$0xff]  }
  0x6c   : > { %2977 = vmatpush3.bf16.msra.mxu0 %v3176_v18  ;;  %2882 = vmatprep.subr.bf16.mxu1 %v3177_v35  ;;  %v2631_v18 = vld [vmem:[%s3279_s10 + $0x14] sm:$0x1]  ;;  %v1993_v47 = vrot.slane %v1991_v36, 4  ;;  %v1996_v48 = vrot.slane %v1994_v37, 5 }
  0x6d   : > { %2978 = vmatprep.subr.bf16.mxu0 %v3178_v41  ;;  %v1958_v24 = vshll.u32 %v2631_v18, 16  ;;  %v3205_v37 = vld [vmem:[%s3605_s1 + $0x230] sm:$0xff]  }
  0x6e   : > { %2875 = vmatmul.mubr.bf16.gmra.mrb[4].mxu1 %v2431_v6  ;;  %v1997_v55 = vor.u32 %v1996_v48, %v1993_v47  ;;  %v2642_v6 = vld [vmem:[%s3279_s10 + $0x40] sm:$0xf] }
  0x6f   : > { %2883 = vmatpush3.bf16.msra.mxu1 %v3177_v35  ;;  %2971 = vmatmul.mubr.bf16.gmra.mrb[4].mxu0 %v3187_v58  ;;  %v1941_v35 = vor.u32 %v1940_v27, %v1937_v26  ;;  %v1960_v46 = vrot.slane %v1958_v24, 5 }
  0x70   : > { %2979 = vmatpush3.bf16.msra.mxu0 %v3178_v41  ;;  %2884 = vmatprep.subr.bf16.mxu1 %v3179_v50  ;;  %v2005_v41 = vshrl.u32 %v2638_v29, 16  ;;  %v1998_v60 = vrot.slane %v1997_v55, 4 }
  0x71   : > { %2980 = vmatprep.subr.bf16.mxu0 %v3180_v61  ;;  %2990 = vmatprep.mubr.bf16.mxu0 %v3192_v4  ;;  %v1961_v63 = vsel %vm3350_vm2, %v1956_v51, %v1960_v46  ;;  %v3206_v46 = vld [vmem:[%s3605_s1 + $0x238] sm:$0xff]  }
  0x72   : > { %2894 = vmatprep.mubr.bf16.mxu1 %v3191_v7  ;;  %v2007_v52 = vrot.slane %v2005_v41, 4  ;;  %v2003_v2 = vsel %vm3350_vm2, %v1998_v60, %v2002_v56  ;;  %v1986_v41 = vshll.u32 %v2635_v32, 16 }
  0x73   : > { %2885 = vmatpush3.bf16.msra.mxu1 %v3179_v50  ;;  %v1942_v50 = vrot.slane %v1941_v35, 4 }
  0x74   : > { %2981 = vmatpush3.bf16.msra.mxu0 %v3180_v61  ;;  %2886 = vmatprep.subr.bf16.mxu1 %v3181_v1  ;;  %v2011_v58 = vor.u32 %v2010_v54, %v2007_v52  ;;  %v3199_v61 = vld [vmem:[%s3279_s10 + $0xc0] ss:$8 sps:$4 sm:$0xff]  }
  0x75   : > { %2982 = vmatprep.subr.bf16.mxu0 %v3182_v5  ;;  %v1947_v62 = vsel %vm3350_vm2, %v1942_v50, %v1946_v45  ;;  %v1988_v50 = vrot.slane %v1986_v41, 5 }
  0x76   : > { %v2012_v0 = vrot.slane %v2011_v58, 4  ;;  %v2660_v7 = vcombine.low %v1947_v62, %v1961_v63 }
  0x77   : > { %2887 = vmatpush3.bf16.msra.mxu1 %v3181_v1  ;;  %v3200_v1 = vld [vmem:[%s3279_s10 + $0x80] ss:$8 sps:$4 sm:$0xff]  }
  0x78   : > { %2983 = vmatpush3.bf16.msra.mxu0 %v3182_v5  ;;  %2888 = vmatprep.subr.bf16.mxu1 %v3183_v8  ;;  %v2017_v4 = vsel %vm3350_vm2, %v2012_v0, %v2016_v59  ;;  %v2640_v5 = vld [vmem:[%s3279_s10 + $0x38] sm:$0xf] }
  0x79   : > { %2984 = vmatprep.subr.bf16.mxu0 %v3184_v9 }
  0x7b   : > { %2889 = vmatpush3.bf16.msra.mxu1 %v3183_v8  ;;  %v2632_v8 = vld [vmem:[%s3279_s10 + $0x18] sm:$0xf] }
  0x7c   : > { %2985 = vmatpush3.bf16.msra.mxu0 %v3184_v9  ;;  %2890 = vmatprep.subr.bf16.mxu1 %v3186_v10  ;;  %v2634_v9 = vld [vmem:[%s3279_s10 + $0x20] sm:$0xf]  ;;  %v1963_v16 = vshrl.u32 %v2632_v8, 16  ;;  %v1966_v17 = vshll.u32 %v2632_v8, 16 }
  0x7d   : > { %2986 = vmatprep.subr.bf16.mxu0 %v3188_v11  ;;  %v1977_v18 = vshrl.u32 %v2634_v9, 16  ;;  %v1980_v19 = vshll.u32 %v2634_v9, 16 }
  0x7e   : > { %v1965_v26 = vrot.slane %v1963_v16, 4  ;;  %v1968_v27 = vrot.slane %v1966_v17, 5 }
  0x7f   : > { %2891 = vmatpush3.bf16.msra.mxu1 %v3186_v10  ;;  %v2662_v10 = vcombine.low %v2003_v2, %v2017_v4  ;;  %v1979_v28 = vrot.slane %v1977_v18, 4  ;;  %v1982_v29 = vrot.slane %v1980_v19, 5 }
  0x80   : > { %2987 = vmatpush3.bf16.msra.mxu0 %v3188_v11  ;;  %2892 = vmatprep.subr.bf16.mxu1 %v3189_v12  ;;  %v2019_v11 = vshrl.u32 %v2640_v5, 16  ;;  %v1969_v38 = vor.u32 %v1968_v27, %v1965_v26 }
  0x81   : > { %2988 = vmatprep.subr.bf16.mxu0 %v3190_v13  ;;  %v1983_v40 = vor.u32 %v1982_v29, %v1979_v28 }
  0x82   : > { %v2021_v22 = vrot.slane %v2019_v11, 4  ;;  %v1970_v47 = vrot.slane %v1969_v38, 4 }
  0x83   : > { %2893 = vmatpush3.bf16.msra.mxu1 %v3189_v12  ;;  %v2022_v12 = vshll.u32 %v2640_v5, 16 }
  0x84   : > { %2989 = vmatpush3.bf16.msra.mxu0 %v3190_v13  ;;  %3022 = vmatprep.subr.bf16.mxu1 %v3195_v14  ;;  %v2033_v13 = vshrl.u32 %v2642_v6, 16 }
  0x85   : > { %2998 = vmatprep.subr.bf16.mxu0 %v3195_v14  ;;  %v2024_v23 = vrot.slane %v2022_v12, 5 }
  0x86   : > { %2895 = vmatmul.mubr.bf16.vlgmr.msra.gmra.mrb[0].mxu1 %v3193_v30  ;;  %v2035_v24 = vrot.slane %v2033_v13, 4  ;;  %v2643_v30 = vld [vmem:[%s3279_s10 + $0x44] sm:$0x1] }
  0x87   : > { %2991 = vmatmul.mubr.bf16.vlgmr.msra.gmra.mrb[0].mxu0 %v3194_v34  ;;  %3030 = vmatpush3.bf16.msra.mxu1 %v3195_v14  ;;  %v2025_v33 = vor.u32 %v2024_v23, %v2021_v22  ;;  %v2028_v34 = vshll.u32 %v2641_v21, 16  ;;  %v2042_v36 = vshll.u32 %v2643_v30, 16 }
  0x88   : > { %2999 = vmatpush3.bf16.msra.mxu0 %v3195_v14  ;;  %3023 = vmatprep.subr.bf16.mxu1 %v3196_v39  ;;  %v2036_v14 = vshll.u32 %v2642_v6, 16 }
  0x89   : > { %3000 = vmatprep.subr.bf16.mxu0 %v3196_v39  ;;  %2898 = vmatprep.mubr.bf16.mxu1 %v3197_v44  ;;  %v2026_v42 = vrot.slane %v2025_v33, 4  ;;  %v2030_v43 = vrot.slane %v2028_v34, 5  ;;  %v2044_v45 = vrot.slane %v2042_v36, 5 }
  0x8a   : > { %2994 = vmatprep.mubr.bf16.mxu0 %v3198_v49  ;;  %v2038_v25 = vrot.slane %v2036_v14, 5  ;;  %v1984_v49 = vrot.slane %v1983_v40, 4 }
  0x8b   : > { %3031 = vmatpush3.bf16.msra.mxu1 %v3196_v39  ;;  %v2031_v51 = vsel %vm3350_vm2, %v2026_v42, %v2030_v43 }
  0x8c   : > { %3001 = vmatpush3.bf16.msra.mxu0 %v3196_v39  ;;  %3024 = vmatprep.subr.bf16.mxu1 %v3201_v57  ;;  %v2039_v35 = vor.u32 %v2038_v25, %v2035_v24  ;;  %v1972_v39 = vshll.u32 %v2633_v31, 16  ;;  %v1989_v55 = vsel %vm3350_vm2, %v1984_v49, %v1988_v50 }
  0x8d   : > { %3002 = vmatprep.subr.bf16.mxu0 %v3201_v57 }
  0x8e   : > { %2899 = vmatmul.mubr.bf16.gmra.mrb[4].mxu1 %v3199_v61  ;;  %v2040_v44 = vrot.slane %v2039_v35, 4  ;;  %v1974_v48 = vrot.slane %v1972_v39, 5 }
  0x8f   : > { %2995 = vmatmul.mubr.bf16.gmra.mrb[4].mxu0 %v3200_v1  ;;  %3032 = vmatpush3.bf16.msra.mxu1 %v3201_v57 }
  0x90   : > { %3003 = vmatpush3.bf16.msra.mxu0 %v3201_v57  ;;  %3025 = vmatprep.subr.bf16.mxu1 %v3202_v3  ;;  %v2045_v52 = vsel %vm3350_vm2, %v2040_v44, %v2044_v45  ;;  %v1975_v54 = vsel %vm3350_vm2, %v1970_v47, %v1974_v48 }
  0x91   : > { %3004 = vmatprep.subr.bf16.mxu0 %v3202_v3  ;;  %3014 = vmatprep.mubr.bf16.mxu0 %v2660_v7  ;;  %v2663_v56 = vcombine.low %v2031_v51, %v2045_v52  ;;  %v2661_v57 = vcombine.low %v1975_v54, %v1989_v55 }
  0x92   : > { %3018 = vmatprep.mubr.bf16.mxu1 %v2662_v10 }
  0x93   : > { %3033 = vmatpush3.bf16.msra.mxu1 %v3202_v3 }
  0x94   : > { %3005 = vmatpush3.bf16.msra.mxu0 %v3202_v3  ;;  %3026 = vmatprep.subr.bf16.mxu1 %v3203_v15 }
  0x95   : > { %3006 = vmatprep.subr.bf16.mxu0 %v3203_v15 }
  0x97   : > { %3034 = vmatpush3.bf16.msra.mxu1 %v3203_v15 }
  0x98   : > { %3007 = vmatpush3.bf16.msra.mxu0 %v3203_v15  ;;  %3027 = vmatprep.subr.bf16.mxu1 %v3204_v20 }
  0x99   : > { %3008 = vmatprep.subr.bf16.mxu0 %v3204_v20 }
  0x9b   : > { %3035 = vmatpush3.bf16.msra.mxu1 %v3204_v20 }
  0x9c   : > { %3009 = vmatpush3.bf16.msra.mxu0 %v3204_v20  ;;  %3028 = vmatprep.subr.bf16.mxu1 %v3205_v37 }
  0x9d   : > { %3010 = vmatprep.subr.bf16.mxu0 %v3205_v37 }
  0x9f   : > { %3036 = vmatpush3.bf16.msra.mxu1 %v3205_v37 }
  0xa0   : > { %3011 = vmatpush3.bf16.msra.mxu0 %v3205_v37  ;;  %3029 = vmatprep.subr.bf16.mxu1 %v3206_v46 }
  0xa1   : > { %3012 = vmatprep.subr.bf16.mxu0 %v3206_v46 }
  0xa3   : > { %3037 = vmatpush3.bf16.msra.mxu1 %v3206_v46 }
  0xa4   : > { %3013 = vmatpush3.bf16.msra.mxu0 %v3206_v46 }
  0xa6   : > { %3019 = vmatmul.mubr.bf16.vlgmr.msra.gmra.mrb[8].mxu1 %v2663_v56 }
  0xa7   : > { %3015 = vmatmul.mubr.bf16.vlgmr.msra.gmra.mrb[0].mxu0 %v2661_v57 }
 0x159   : > { %v2896_v58 = vpop.f32.mrb[0].mxu1 }
 0x15a   : > { %v1004_v59 = vpop.f32.mrb[1].mxu1 }
 0x15b   : > { %v2897_v60 = vpop.f32.mrb[2].mxu1 }
 0x15c   : > { %v1007_v61 = vpop.f32.mrb[3].mxu1 }
 0x161   : > { %v2900_v62 = vpop.f32.mrb[4].mxu1 }
 0x162   : > { %v2996_v63 = vpop.f32.mrb[4].mxu0  ;;  %v1020_v0 = vpop.f32.mrb[5].mxu1 }
 0x163   : > { %v3042_v1 = vadd.f32 %v2996_v63, %v2900_v62  ;;  %v1879_v2 = vpop.f32.mrb[5].mxu0  ;;  %v2901_v3 = vpop.f32.mrb[6].mxu1 }
 0x164   : > { %v3044_v53 = vadd.f32 %v1879_v2, %v1020_v0  ;;  %v2997_v4 = vpop.f32.mrb[6].mxu0  ;;  %v1023_v5 = vpop.f32.mrb[7].mxu1 }
 0x165   : > { %v3046_v6 = vadd.f32 %v2997_v4, %v2901_v3  ;;  %v1882_v7 = vpop.f32.mrb[7].mxu0 }
 0x166   : > { %v3048_v8 = vadd.f32 %v1882_v7, %v1023_v5 }
 0x179   : > { %v3020_v9 = vpop.f32.mrb[8].mxu1 }
 0x17a   : > { %v3016_v10 = vpop.f32.mrb[0].mxu0  ;;  %v3043_v11 = vadd.f32 %v3042_v1, %v3020_v9  ;;  %v2177_v12 = vpop.f32.mrb[9].mxu1 }
 0x17b   : > { %v3038_v13 = vadd.f32 %v3016_v10, %v2896_v58  ;;  %v2161_v14 = vpop.f32.mrb[1].mxu0  ;;  %v3045_v15 = vadd.f32 %v3044_v53, %v2177_v12  ;;  %v3021_v16 = vpop.f32.mrb[10].mxu1 }
 0x17c   : > { %v3039_v17 = vadd.f32 %v2161_v14, %v1004_v59  ;;  %v3017_v18 = vpop.f32.mrb[2].mxu0  ;;  %v3047_v19 = vadd.f32 %v3046_v6, %v3021_v16  ;;  %v2180_v20 = vpop.f32.mrb[11].mxu1  ;;  %v2251_v44 = vmul.f32 %v3043_v11, %v3043_v11 }
 0x17d   : > { %v3040_v21 = vadd.f32 %v3017_v18, %v2897_v60  ;;  %v2164_v22 = vpop.f32.mrb[3].mxu0  ;;  %v3049_v23 = vadd.f32 %v3048_v8, %v2180_v20  ;;  %v2247_v32 = vmul.f32 %v3038_v13, %v3038_v13  ;;  %v2249_v38 = vmul.f32 %v3045_v15, %v3045_v15 }
 0x17e   : > { %v2693_v24 = vpack.c.bf16 %v3047_v19, %v3043_v11  ;;  %v3041_v25 = vadd.f32 %v2164_v22, %v1007_v61  ;;  %v2245_v28 = vmul.f32 %v3039_v17, %v3039_v17  ;;  %v2252_v47 = vmul.f32 %v3047_v19, %v3047_v19 }
 0x17f   : > { %v2683_v26 = vpack.c.bf16 %v3040_v21, %v3038_v13  ;;  %v2688_v27 = vpack.c.bf16 %v3049_v23, %v3045_v15  ;;  %v2248_v35 = vmul.f32 %v3040_v21, %v3040_v21  ;;  %v2250_v42 = vmul.f32 %v3049_v23, %v3049_v23 }
 0x180   : > { %2697 = vst [vmem:[%s177_s19 + $0x18] sm:$0xff] %v2693_v24   ;;  %v2678_v29 = vpack.c.bf16 %v3041_v25, %v3039_v17  ;;  %v2232_v30 = vadd.f32 %v3041_v25, %v3039_v17  ;;  %v2246_v31 = vmul.f32 %v3041_v25, %v3041_v25 }
 0x181   : > { %2695 = vst [vmem:[%s177_s19 + $0x8] sm:$0xff] %v2683_v26   ;;  %2696 = vst [vmem:[%s177_s19 + $0x10] sm:$0xff] %v2688_v27  }
 0x182   : > { %2679 = vst [vmem:[%s177_s19] sm:$0xff] %v2678_v29   ;;  %v2233_v33 = vadd.f32 %v3038_v13, %v2232_v30  ;;  %v2253_v34 = vadd.f32 %v2246_v31, %v2245_v28 }
 0x184   : > { %v2254_v36 = vadd.f32 %v2253_v34, %v2247_v32  ;;  %v2234_v37 = vadd.f32 %v3040_v21, %v2233_v33 }
 0x186   : > { %v2235_v39 = vadd.f32 %v3045_v15, %v2234_v37  ;;  %v2255_v40 = vadd.f32 %v2254_v36, %v2248_v35 }
 0x188   : > { %v2236_v41 = vadd.f32 %v3049_v23, %v2235_v39  ;;  %v2256_v43 = vadd.f32 %v2255_v40, %v2249_v38 }
 0x18a   : > { %v2237_v45 = vadd.f32 %v3043_v11, %v2236_v41  ;;  %v2257_v46 = vadd.f32 %v2256_v43, %v2250_v42 }
 0x18c   : > { %v2238_v48 = vadd.f32 %v3047_v19, %v2237_v45  ;;  %v2258_v49 = vadd.f32 %v2257_v46, %v2251_v44 }
 0x18e   : > { %v2239_v50 = vrot.slane %v2238_v48, 4  ;;  %v2259_v51 = vadd.f32 %v2258_v49, %v2252_v47 }
 0x190   : > { %v2240_v52 = vadd.f32 %v2239_v50, %v2238_v48  ;;  %v2260_v54 = vrot.slane %v2259_v51, 4 }
 0x192   : > { %v2241_v55 = vrot.slane %v2240_v52, 2  ;;  %v2261_v56 = vadd.f32 %v2260_v54, %v2259_v51 }
 0x194   : > { %v2242_v57 = vadd.f32 %v2241_v55, %v2240_v52  ;;  %v2262_v58 = vrot.slane %v2261_v56, 2 }
 0x196   : > { %v2243_v59 = vrot.slane %v2242_v57, 1  ;;  %v2263_v60 = vadd.f32 %v2262_v58, %v2261_v56 }
 0x198   : > { %v2264_v61 = vrot.slane %v2263_v60, 1  ;;  %v2244_v62 = vadd.f32 %v2243_v59, %v2242_v57 }
 0x19a   : > { %v2265_v63 = vadd.f32 %v2264_v61, %v2263_v60 }
 0x19c   : > { %v2267_v0 = vsel %vm2266_vm3, %v2244_v62, %v2265_v63 }
 0x19d   : > { %2268 = vst [vmem:[%s181_s23] sm:$0x3] %v2267_v0 }
 0x19e PF: > { %s14_s12 = sadd.s32 1, %s3213_s12  }
 0x19f   : > { %p11_p4 = scmp.ge.s32.totalorder %s14_s12, 4  }
 0x1a1   :  { %13 = sbr.rel (!%p11_p4) target bundleno = 1 (0x1), region = 83 }

</bundles_post_ra>
